<compile_context>
chip_gen: v7x
topology: tpu7x:2x2x1
jax: 0.10.0
libtpu: 0.0.40
codegen_flags: <defaults>
</compile_context>

<pallas_src>
import functools

import jax
import jax.numpy as jnp
from jax import lax
from jax.experimental import pallas as pl
from jax.experimental.pallas import tpu as pltpu

_EPS = 1e-5      # nn.BatchNorm2d default eps
_CPAD = 128      # every channel dim padded to the 128-lane width
_HALO = 16       # column offset of the interior in the bf16 halo scratch
                 # (16 = bf16 sublane tile -> tile-aligned staging stores)


# ------------------------------ Pallas kernel ------------------------------ #
def _mlp_fused_kernel(p1_ref, w1_ref, w2_ref, w3_ref,
                      b1_ref, b2_ref, b3_ref,
                      o_ref, pad_ref, *, H, W):
    """One image per grid step, fully VMEM-resident:
       conv3x3+BN+ReLU -> conv3x3+BN+ReLU -> conv3x3(+bias).
    BN scale is pre-folded into the bf16 weights; the epilogue is bias(+ReLU).
    pad_ref: (H+2, W+2*_HALO, C) bf16 scratch; each layer's input is staged at
    rows [1:H+1], cols [_HALO:_HALO+W] behind a zero 1-px halo."""
    C = pad_ref.shape[-1]
    WP = W + 2 * _HALO

    # Re-zero only the halo ring (4 aligned, full-lane stores).  The interior
    # is fully overwritten by the staging store before every read, so it never
    # needs clearing.  Done every step (not once behind program_id==0) so the
    # kernel stays correct when the "parallel" axis is split across cores.
    zrow = jnp.zeros((1, WP, C), jnp.bfloat16)
    zcol = jnp.zeros((H, _HALO, C), jnp.bfloat16)
    pad_ref[0:1, :, :] = zrow
    pad_ref[H + 1:H + 2, :, :] = zrow
    pad_ref[1:H + 1, 0:_HALO, :] = zcol
    pad_ref[1:H + 1, _HALO + W:WP, :] = zcol

    # ---- Layer 1 (conv3x3 cin->64, folded BN, ReLU): one lane-dense K=128
    #      MXU matmul on the wrapper-built (tap, cin)-interleaved im2col
    #      patches (9*cin real columns zero-padded to 128).  No in-kernel
    #      staging/slicing and an ~9x smaller contraction than the mid layers.
    y = jnp.dot(p1_ref[0], w1_ref[...], preferred_element_type=jnp.float32)
    y = jnp.maximum(y + b1_ref[...], 0.0)                      # (H*W, C) f32

    def conv3x3(y_flat, w_ref, b_ref, relu):
        """3x3 SAME conv of the staged activation: nine per-tap
        (H*W,C)@(C,C) bf16 MXU matmuls accumulated in f32.  The im2col tile is
        never materialized (no concatenate, no (H*W, 9C) buffer, no cast pass)."""
        # Stage this layer's input behind the zero halo (bf16, tile-aligned).
        pad_ref[1:H + 1, _HALO:_HALO + W, :] = (
            y_flat.reshape(H, W, C).astype(jnp.bfloat16))
        acc = jnp.zeros((H * W, C), jnp.float32)
        for dy in range(3):
            for dx in range(3):
                tap = pad_ref[dy:dy + H, _HALO - 1 + dx:_HALO - 1 + dx + W, :]
                acc = acc + jnp.dot(tap.reshape(H * W, C), w_ref[dy * 3 + dx],
                                    preferred_element_type=jnp.float32)
        out = acc + b_ref[...]                                 # folded BN / bias
        return jnp.maximum(out, 0.0) if relu else out

    y = conv3x3(y, w2_ref, b2_ref, True)                       # DoubleConv conv 2
    y = conv3x3(y, w3_ref, b3_ref, False)                      # output conv
    o_ref[0] = y.astype(o_ref.dtype)                           # lane-dense bf16 store


# --------------------------------- wrapper --------------------------------- #
def _im2col_3x3(x_nhwc, cpad=_CPAD):
    """Zero-padded 3x3 im2col: (N,H,W,cin) -> (N, H*W, cpad) bf16 with the
    9*cin real columns ordered (tap-major, channel-minor) and zero-padded to
    the 128-lane width.  Tiny tensors, done once in XLA, so the kernel's first
    conv is a single K=128 matmul."""
    n, h, w, c = x_nhwc.shape
    xp = jnp.pad(x_nhwc, ((0, 0), (1, 1), (1, 1), (0, 0)))
    cols = [xp[:, dy:dy + h, dx:dx + w, :].reshape(n, h * w, c)
            for dy in range(3) for dx in range(3)]
    p = jnp.concatenate(cols, axis=-1)                         # (n, h*w, 9c)
    return jnp.pad(p, ((0, 0), (0, 0), (0, cpad - 9 * c)))


@functools.partial(jax.jit, static_argnums=(2,))
def mlp_forward(x_nchw, params, n_classes):
    """x_nchw: (N, n_channels, H, W) float32 (PyTorch layout).
    Returns logits (N, n_classes, H, W) float32, matching MLP.forward."""
    w1p, b1, w2p, b2, w3p, b3 = params
    N, cin, H, W = x_nchw.shape
    C = _CPAD
    assert 9 * cin <= C, "layer-1 im2col packing needs 9*n_channels <= 128"
    assert (H * W) % 8 == 0, "H*W must be a multiple of 8 for the (8,128) rule"

    # Layout plumbing: NCHW -> NHWC bf16, then the tiny layer-1 im2col.
    x = jnp.transpose(x_nchw, (0, 2, 3, 1)).astype(jnp.bfloat16)
    patches1 = _im2col_3x3(x)                                  # (N, H*W, 128) bf16

    w1_spec = pl.BlockSpec((C, C), lambda b: (0, 0))
    w_spec = pl.BlockSpec((9, C, C), lambda b: (0, 0, 0))
    b_spec = pl.BlockSpec((1, C), lambda b: (0, 0))
    out = pl.pallas_call(
        functools.partial(_mlp_fused_kernel, H=H, W=W),
        out_shape=jax.ShapeDtypeStruct((N, H * W, C), jnp.bfloat16),
        grid=(N,),
        in_specs=[
            pl.BlockSpec((1, H * W, C), lambda b: (b, 0, 0)),  # layer-1 patches
            w1_spec, w_spec, w_spec,                           # w1, w2, w3
            b_spec, b_spec, b_spec,                            # b1, b2, b3
        ],
        out_specs=pl.BlockSpec((1, H * W, C), lambda b: (b, 0, 0)),
        scratch_shapes=[pltpu.VMEM((H + 2, W + 2 * _HALO, C), jnp.bfloat16)],
        compiler_params=pltpu.CompilerParams(
            dimension_semantics=("parallel",)),
    )(patches1, w1p, w2p, w3p, b1, b2, b3)

    logits = out[:, :, :n_classes].astype(jnp.float32).reshape(N, H, W, n_classes)
    return jnp.transpose(logits, (0, 3, 1, 2))                 # back to NCHW


# ----------------------------- parameter setup ------------------------------ #
def _conv_init(key, cin, cout):
    kw, kb = jax.random.split(key)
    bound = 1.0 / (cin * 9) ** 0.5                  # PyTorch Conv2d default init
    w = jax.random.uniform(kw, (3, 3, cin, cout), jnp.float32, -bound, bound)
    b = jax.random.uniform(kb, (cout,), jnp.float32, -bound, bound)
    return w, b


def _bn_init(key, c):
    k1, k2, k3, k4 = jax.random.split(key, 4)
    gamma = 1.0 + 0.1 * jax.random.normal(k1, (c,), jnp.float32)
    beta = 0.1 * jax.random.normal(k2, (c,), jnp.float32)
    mean = 0.1 * jax.random.normal(k3, (c,), jnp.float32)
    var = jnp.abs(jax.random.normal(k4, (c,), jnp.float32)) + 0.5
    return gamma, beta, mean, var


def _fold_bn(gamma, beta, mean, var, conv_bias):
    """Eval-mode BatchNorm2d folded to a per-output-channel scale / shift."""
    s = gamma / jnp.sqrt(var + _EPS)
    return s, beta + (conv_bias - mean) * s


def _pack_first(w_hwio, scale, shift, cpad=_CPAD):
    """Layer 1: fold BN scale into the weights, pad cout to 128 lanes, flatten
    (tap, cin) row-major into a zero-padded (128, 128) contraction matching
    the wrapper-built im2col patch layout."""
    kh, kw, cin, cout = w_hwio.shape
    w = w_hwio * scale
    w = jnp.pad(w, ((0, 0), (0, 0), (0, 0), (0, cpad - cout)))
    w = w.reshape(kh * kw * cin, cpad)
    w = jnp.pad(w, ((0, cpad - kh * kw * cin), (0, 0)))
    b = jnp.pad(shift, (0, cpad - cout))
    return w.astype(jnp.bfloat16), b.reshape(1, cpad).astype(jnp.float32)


def _pack_taps(w_hwio, scale, shift, cpad=_CPAD):
    """Layers 2/3: fold BN scale, pad cin/cout to 128 and keep a per-tap
    (9, 128, 128) layout for the kernel's per-tap MXU accumulation."""
    kh, kw, cin, cout = w_hwio.shape
    w = w_hwio * scale
    w = jnp.pad(w, ((0, 0), (0, 0), (0, cpad - cin), (0, cpad - cout)))
    w = w.reshape(kh * kw, cpad, cpad)
    b = jnp.pad(shift, (0, cpad - cout))
    return w.astype(jnp.bfloat16), b.reshape(1, cpad).astype(jnp.float32)


def init_mlp_params(key, n_channels, n_classes, mid=64):
    """MLP = DoubleConv(n_channels, 64) -> Conv2d(64, n_classes, 3, padding=1);
    DoubleConv = (conv3x3 -> BN -> ReLU) x 2, BN in eval mode (running stats)."""
    k1, k2, k3, k4, k5 = jax.random.split(key, 5)
    w1, cb1 = _conv_init(k1, n_channels, mid)
    s1, t1 = _fold_bn(*_bn_init(k2, mid), cb1)
    w1p, b1p = _pack_first(w1, s1, t1)
    w2, cb2 = _conv_init(k3, mid, mid)
    s2, t2 = _fold_bn(*_bn_init(k4, mid), cb2)
    w2p, b2p = _pack_taps(w2, s2, t2)
    w3, cb3 = _conv_init(k5, mid, n_classes)          # output conv: no BN, no ReLU
    w3p, b3p = _pack_taps(w3, jnp.ones((n_classes,), jnp.float32), cb3)
    return (w1p, b1p, w2p, b2p, w3p, b3p)


# ------------------------------ JAX reference ------------------------------- #
def mlp_ref(x_nchw, params, n_classes):
    """Pure-JAX reference consuming the SAME packed (scale-folded, bf16)
    weights and mirroring the kernel's rounding points (bf16 operands, f32
    accumulation, bf16 activation staging and bf16 output store)."""
    w1p, b1, w2p, b2, w3p, b3 = params
    _, cin, _, _ = x_nchw.shape
    C = _CPAD
    x = jnp.transpose(x_nchw, (0, 2, 3, 1))
    x = x.astype(jnp.bfloat16).astype(jnp.float32)            # bf16 MXU operands

    def conv(y, w_hwio, b, relu):
        y = lax.conv_general_dilated(
            y, w_hwio, (1, 1), "SAME",
            dimension_numbers=("NHWC", "HWIO", "NHWC"),
            precision=lax.Precision.HIGHEST)
        y = y + b.reshape(1, 1, 1, C)
        return jnp.maximum(y, 0.0) if relu else y

    w1 = w1p[:9 * cin, :].astype(jnp.float32).reshape(3, 3, cin, C)
    w2 = w2p.astype(jnp.float32).reshape(3, 3, C, C)
    w3 = w3p.astype(jnp.float32).reshape(3, 3, C, C)
    y = conv(x, w1, b1, True)
    y = y.astype(jnp.bfloat16).astype(jnp.float32)            # kernel stages bf16
    y = conv(y, w2, b2, True)
    y = y.astype(jnp.bfloat16).astype(jnp.float32)            # kernel stages bf16
    y = conv(y, w3, b3, False)
    y = y.astype(jnp.bfloat16).astype(jnp.float32)            # kernel stores bf16
    return jnp.transpose(y[..., :n_classes], (0, 3, 1, 2))


if __name__ == "__main__":
    key = jax.random.PRNGKey(0)
    N, C_IN, H, W = 2, 4, 16, 16
    N_CLASSES = 3

    k_x, k_p = jax.random.split(key)
    x_nchw = jax.random.normal(k_x, (N, C_IN, H, W), jnp.float32)   # PyTorch layout
    params = init_mlp_params(k_p, C_IN, N_CLASSES)

    logits = jax.block_until_ready(mlp_forward(x_nchw, params, N_CLASSES))
    ref = mlp_ref(x_nchw, params, N_CLASSES)

    assert logits.shape == (N, N_CLASSES, H, W)
    assert jnp.allclose(logits, ref, atol=5e-3, rtol=5e-3), "mismatch vs reference"

    print("KERNEL_OK")
</pallas_src>

<mosaic_0001>
module attributes {stable_mosaic.version = 11 : i64} {
  func.func @_mlp_fused_kernel(%arg0: i32, %arg1: memref<1x256x128xbf16, #tpu.memory_space<vmem>>, %arg2: memref<128x128xbf16, #tpu.memory_space<vmem>>, %arg3: memref<9x128x128xbf16, #tpu.memory_space<vmem>>, %arg4: memref<9x128x128xbf16, #tpu.memory_space<vmem>>, %arg5: memref<1x128xf32, #tpu.memory_space<vmem>>, %arg6: memref<1x128xf32, #tpu.memory_space<vmem>>, %arg7: memref<1x128xf32, #tpu.memory_space<vmem>>, %arg8: memref<1x256x128xbf16, #tpu.memory_space<vmem>>, %arg9: memref<18x48x128xbf16, #tpu.memory_space<vmem>>) attributes {dimension_semantics = [#tpu.dimension_semantics<parallel>], iteration_bounds = array<i64: 2>, scalar_prefetch = 0 : i64, scratch_operands = 1 : i64, tpu.core_type = #tpu.core_type<tc>, window_params = [{transform_indices = @transform_0, window_bounds = array<i64: 1, 256, 128>}, {pipeline_mode = #tpu.pipeline_mode<synchronous>, transform_indices = @transform_1, window_bounds = array<i64: 128, 128>}, {pipeline_mode = #tpu.pipeline_mode<synchronous>, transform_indices = @transform_2, window_bounds = array<i64: 9, 128, 128>}, {pipeline_mode = #tpu.pipeline_mode<synchronous>, transform_indices = @transform_3, window_bounds = array<i64: 9, 128, 128>}, {pipeline_mode = #tpu.pipeline_mode<synchronous>, transform_indices = @transform_4, window_bounds = array<i64: 1, 128>}, {pipeline_mode = #tpu.pipeline_mode<synchronous>, transform_indices = @transform_5, window_bounds = array<i64: 1, 128>}, {pipeline_mode = #tpu.pipeline_mode<synchronous>, transform_indices = @transform_6, window_bounds = array<i64: 1, 128>}, {transform_indices = @transform_7, window_bounds = array<i64: 1, 256, 128>}]} {
    %cst = arith.constant 0.000000e+00 : bf16
    %0 = vector.broadcast %cst : bf16 to vector<1x48x128xbf16>
    %cst_0 = arith.constant 0.000000e+00 : bf16
    %1 = vector.broadcast %cst_0 : bf16 to vector<16x16x128xbf16>
    %c0 = arith.constant 0 : index
    %c0_1 = arith.constant 0 : index
    %c0_2 = arith.constant 0 : index
    %2 = vector.load %arg9[%c0, %c0_1, %c0_2] : memref<18x48x128xbf16, #tpu.memory_space<vmem>>, vector<1x48x128xbf16>
    tpu.vector_store %arg9[%c0, %c0_1, %c0_2], %0 {strides = array<i32>} : memref<18x48x128xbf16, #tpu.memory_space<vmem>>, vector<1x48x128xbf16>,
    %c17 = arith.constant 17 : index
    %c0_3 = arith.constant 0 : index
    %c0_4 = arith.constant 0 : index
    %3 = vector.load %arg9[%c17, %c0_3, %c0_4] : memref<18x48x128xbf16, #tpu.memory_space<vmem>>, vector<1x48x128xbf16>
    tpu.vector_store %arg9[%c17, %c0_3, %c0_4], %0 {strides = array<i32>} : memref<18x48x128xbf16, #tpu.memory_space<vmem>>, vector<1x48x128xbf16>,
    %c1 = arith.constant 1 : index
    %c0_5 = arith.constant 0 : index
    %c0_6 = arith.constant 0 : index
    %4 = vector.load %arg9[%c1, %c0_5, %c0_6] : memref<18x48x128xbf16, #tpu.memory_space<vmem>>, vector<16x16x128xbf16>
    tpu.vector_store %arg9[%c1, %c0_5, %c0_6], %1 {strides = array<i32>} : memref<18x48x128xbf16, #tpu.memory_space<vmem>>, vector<16x16x128xbf16>,
    %c1_7 = arith.constant 1 : index
    %c32 = arith.constant 32 : index
    %c0_8 = arith.constant 0 : index
    %5 = vector.load %arg9[%c1_7, %c32, %c0_8] : memref<18x48x128xbf16, #tpu.memory_space<vmem>>, vector<16x16x128xbf16>
    tpu.vector_store %arg9[%c1_7, %c32, %c0_8], %1 {strides = array<i32>} : memref<18x48x128xbf16, #tpu.memory_space<vmem>>, vector<16x16x128xbf16>,
    %c0_9 = arith.constant 0 : index
    %c0_10 = arith.constant 0 : index
    %c0_11 = arith.constant 0 : index
    %6 = vector.load %arg1[%c0_9, %c0_10, %c0_11] : memref<1x256x128xbf16, #tpu.memory_space<vmem>>, vector<1x256x128xbf16>
    %7 = vector.shape_cast %6 : vector<1x256x128xbf16> to vector<256x128xbf16>
    %c0_12 = arith.constant 0 : index
    %c0_13 = arith.constant 0 : index
    %8 = vector.load %arg2[%c0_12, %c0_13] : memref<128x128xbf16, #tpu.memory_space<vmem>>, vector<128x128xbf16>
    %cst_14 = arith.constant dense<0.000000e+00> : vector<256x128xf32>
    %9 = tpu.matmul %7, %8, %cst_14 {dimension_numbers = #tpu.dot_dimension_numbers<[1], [0], [0], [1], [0, 0, 1, 1], [], []>} : vector<256x128xbf16>, vector<128x128xbf16>, vector<256x128xf32> -> vector<256x128xf32>
    %c0_15 = arith.constant 0 : index
    %c0_16 = arith.constant 0 : index
    %10 = vector.load %arg5[%c0_15, %c0_16] : memref<1x128xf32, #tpu.memory_space<vmem>>, vector<1x128xf32>
    %11 = vector.broadcast %10 : vector<1x128xf32> to vector<256x128xf32>
    %12 = arith.addf %9, %11 : vector<256x128xf32>
    %cst_17 = arith.constant 0.000000e+00 : f32
    %13 = vector.broadcast %cst_17 : f32 to vector<256x128xf32>
    %14 = arith.maximumf %12, %13 : vector<256x128xf32>
    %15 = vector.shape_cast %14 : vector<256x128xf32> to vector<16x16x128xf32>
    %16 = arith.truncf %15 : vector<16x16x128xf32> to vector<16x16x128xbf16>
    %c1_18 = arith.constant 1 : index
    %c16 = arith.constant 16 : index
    %c0_19 = arith.constant 0 : index
    %17 = vector.load %arg9[%c1_18, %c16, %c0_19] : memref<18x48x128xbf16, #tpu.memory_space<vmem>>, vector<16x16x128xbf16>
    tpu.vector_store %arg9[%c1_18, %c16, %c0_19], %16 {strides = array<i32>} : memref<18x48x128xbf16, #tpu.memory_space<vmem>>, vector<16x16x128xbf16>,
    %cst_20 = arith.constant 0.000000e+00 : f32
    %18 = vector.broadcast %cst_20 : f32 to vector<256x128xf32>
    %c0_21 = arith.constant 0 : index
    %c15 = arith.constant 15 : index
    %c0_22 = arith.constant 0 : index
    %19 = vector.load %arg9[%c0_21, %c15, %c0_22] : memref<18x48x128xbf16, #tpu.memory_space<vmem>>, vector<16x16x128xbf16>
    %20 = vector.shape_cast %19 : vector<16x16x128xbf16> to vector<256x128xbf16>
    %c0_23 = arith.constant 0 : index
    %c0_24 = arith.constant 0 : index
    %c0_25 = arith.constant 0 : index
    %21 = vector.load %arg3[%c0_23, %c0_24, %c0_25] : memref<9x128x128xbf16, #tpu.memory_space<vmem>>, vector<1x128x128xbf16>
    %22 = vector.shape_cast %21 : vector<1x128x128xbf16> to vector<128x128xbf16>
    %cst_26 = arith.constant dense<0.000000e+00> : vector<256x128xf32>
    %23 = tpu.matmul %20, %22, %cst_26 {dimension_numbers = #tpu.dot_dimension_numbers<[1], [0], [0], [1], [0, 0, 1, 1], [], []>} : vector<256x128xbf16>, vector<128x128xbf16>, vector<256x128xf32> -> vector<256x128xf32>
    %24 = arith.addf %18, %23 : vector<256x128xf32>
    %c0_27 = arith.constant 0 : index
    %c16_28 = arith.constant 16 : index
    %c0_29 = arith.constant 0 : index
    %25 = vector.load %arg9[%c0_27, %c16_28, %c0_29] : memref<18x48x128xbf16, #tpu.memory_space<vmem>>, vector<16x16x128xbf16>
    %26 = vector.shape_cast %25 : vector<16x16x128xbf16> to vector<256x128xbf16>
    %c1_30 = arith.constant 1 : index
    %c0_31 = arith.constant 0 : index
    %c0_32 = arith.constant 0 : index
    %27 = vector.load %arg3[%c1_30, %c0_31, %c0_32] : memref<9x128x128xbf16, #tpu.memory_space<vmem>>, vector<1x128x128xbf16>
    %28 = vector.shape_cast %27 : vector<1x128x128xbf16> to vector<128x128xbf16>
    %cst_33 = arith.constant dense<0.000000e+00> : vector<256x128xf32>
    %29 = tpu.matmul %26, %28, %cst_33 {dimension_numbers = #tpu.dot_dimension_numbers<[1], [0], [0], [1], [0, 0, 1, 1], [], []>} : vector<256x128xbf16>, vector<128x128xbf16>, vector<256x128xf32> -> vector<256x128xf32>
    %30 = arith.addf %24, %29 : vector<256x128xf32>
    %c0_34 = arith.constant 0 : index
    %c17_35 = arith.constant 17 : index
    %c0_36 = arith.constant 0 : index
    %31 = vector.load %arg9[%c0_34, %c17_35, %c0_36] : memref<18x48x128xbf16, #tpu.memory_space<vmem>>, vector<16x16x128xbf16>
    %32 = vector.shape_cast %31 : vector<16x16x128xbf16> to vector<256x128xbf16>
    %c2 = arith.constant 2 : index
    %c0_37 = arith.constant 0 : index
    %c0_38 = arith.constant 0 : index
    %33 = vector.load %arg3[%c2, %c0_37, %c0_38] : memref<9x128x128xbf16, #tpu.memory_space<vmem>>, vector<1x128x128xbf16>
    %34 = vector.shape_cast %33 : vector<1x128x128xbf16> to vector<128x128xbf16>
    %cst_39 = arith.constant dense<0.000000e+00> : vector<256x128xf32>
    %35 = tpu.matmul %32, %34, %cst_39 {dimension_numbers = #tpu.dot_dimension_numbers<[1], [0], [0], [1], [0, 0, 1, 1], [], []>} : vector<256x128xbf16>, vector<128x128xbf16>, vector<256x128xf32> -> vector<256x128xf32>
    %36 = arith.addf %30, %35 : vector<256x128xf32>
    %c1_40 = arith.constant 1 : index
    %c15_41 = arith.constant 15 : index
    %c0_42 = arith.constant 0 : index
    %37 = vector.load %arg9[%c1_40, %c15_41, %c0_42] : memref<18x48x128xbf16, #tpu.memory_space<vmem>>, vector<16x16x128xbf16>
    %38 = vector.shape_cast %37 : vector<16x16x128xbf16> to vector<256x128xbf16>
    %c3 = arith.constant 3 : index
    %c0_43 = arith.constant 0 : index
    %c0_44 = arith.constant 0 : index
    %39 = vector.load %arg3[%c3, %c0_43, %c0_44] : memref<9x128x128xbf16, #tpu.memory_space<vmem>>, vector<1x128x128xbf16>
    %40 = vector.shape_cast %39 : vector<1x128x128xbf16> to vector<128x128xbf16>
    %cst_45 = arith.constant dense<0.000000e+00> : vector<256x128xf32>
    %41 = tpu.matmul %38, %40, %cst_45 {dimension_numbers = #tpu.dot_dimension_numbers<[1], [0], [0], [1], [0, 0, 1, 1], [], []>} : vector<256x128xbf16>, vector<128x128xbf16>, vector<256x128xf32> -> vector<256x128xf32>
    %42 = arith.addf %36, %41 : vector<256x128xf32>
    %c1_46 = arith.constant 1 : index
    %c16_47 = arith.constant 16 : index
    %c0_48 = arith.constant 0 : index
    %43 = vector.load %arg9[%c1_46, %c16_47, %c0_48] : memref<18x48x128xbf16, #tpu.memory_space<vmem>>, vector<16x16x128xbf16>
    %44 = vector.shape_cast %43 : vector<16x16x128xbf16> to vector<256x128xbf16>
    %c4 = arith.constant 4 : index
    %c0_49 = arith.constant 0 : index
    %c0_50 = arith.constant 0 : index
    %45 = vector.load %arg3[%c4, %c0_49, %c0_50] : memref<9x128x128xbf16, #tpu.memory_space<vmem>>, vector<1x128x128xbf16>
    %46 = vector.shape_cast %45 : vector<1x128x128xbf16> to vector<128x128xbf16>
    %cst_51 = arith.constant dense<0.000000e+00> : vector<256x128xf32>
    %47 = tpu.matmul %44, %46, %cst_51 {dimension_numbers = #tpu.dot_dimension_numbers<[1], [0], [0], [1], [0, 0, 1, 1], [], []>} : vector<256x128xbf16>, vector<128x128xbf16>, vector<256x128xf32> -> vector<256x128xf32>
    %48 = arith.addf %42, %47 : vector<256x128xf32>
    %c1_52 = arith.constant 1 : index
    %c17_53 = arith.constant 17 : index
    %c0_54 = arith.constant 0 : index
    %49 = vector.load %arg9[%c1_52, %c17_53, %c0_54] : memref<18x48x128xbf16, #tpu.memory_space<vmem>>, vector<16x16x128xbf16>
    %50 = vector.shape_cast %49 : vector<16x16x128xbf16> to vector<256x128xbf16>
    %c5 = arith.constant 5 : index
    %c0_55 = arith.constant 0 : index
    %c0_56 = arith.constant 0 : index
    %51 = vector.load %arg3[%c5, %c0_55, %c0_56] : memref<9x128x128xbf16, #tpu.memory_space<vmem>>, vector<1x128x128xbf16>
    %52 = vector.shape_cast %51 : vector<1x128x128xbf16> to vector<128x128xbf16>
    %cst_57 = arith.constant dense<0.000000e+00> : vector<256x128xf32>
    %53 = tpu.matmul %50, %52, %cst_57 {dimension_numbers = #tpu.dot_dimension_numbers<[1], [0], [0], [1], [0, 0, 1, 1], [], []>} : vector<256x128xbf16>, vector<128x128xbf16>, vector<256x128xf32> -> vector<256x128xf32>
    %54 = arith.addf %48, %53 : vector<256x128xf32>
    %c2_58 = arith.constant 2 : index
    %c15_59 = arith.constant 15 : index
    %c0_60 = arith.constant 0 : index
    %55 = vector.load %arg9[%c2_58, %c15_59, %c0_60] : memref<18x48x128xbf16, #tpu.memory_space<vmem>>, vector<16x16x128xbf16>
    %56 = vector.shape_cast %55 : vector<16x16x128xbf16> to vector<256x128xbf16>
    %c6 = arith.constant 6 : index
    %c0_61 = arith.constant 0 : index
    %c0_62 = arith.constant 0 : index
    %57 = vector.load %arg3[%c6, %c0_61, %c0_62] : memref<9x128x128xbf16, #tpu.memory_space<vmem>>, vector<1x128x128xbf16>
    %58 = vector.shape_cast %57 : vector<1x128x128xbf16> to vector<128x128xbf16>
    %cst_63 = arith.constant dense<0.000000e+00> : vector<256x128xf32>
    %59 = tpu.matmul %56, %58, %cst_63 {dimension_numbers = #tpu.dot_dimension_numbers<[1], [0], [0], [1], [0, 0, 1, 1], [], []>} : vector<256x128xbf16>, vector<128x128xbf16>, vector<256x128xf32> -> vector<256x128xf32>
    %60 = arith.addf %54, %59 : vector<256x128xf32>
    %c2_64 = arith.constant 2 : index
    %c16_65 = arith.constant 16 : index
    %c0_66 = arith.constant 0 : index
    %61 = vector.load %arg9[%c2_64, %c16_65, %c0_66] : memref<18x48x128xbf16, #tpu.memory_space<vmem>>, vector<16x16x128xbf16>
    %62 = vector.shape_cast %61 : vector<16x16x128xbf16> to vector<256x128xbf16>
    %c7 = arith.constant 7 : index
    %c0_67 = arith.constant 0 : index
    %c0_68 = arith.constant 0 : index
    %63 = vector.load %arg3[%c7, %c0_67, %c0_68] : memref<9x128x128xbf16, #tpu.memory_space<vmem>>, vector<1x128x128xbf16>
    %64 = vector.shape_cast %63 : vector<1x128x128xbf16> to vector<128x128xbf16>
    %cst_69 = arith.constant dense<0.000000e+00> : vector<256x128xf32>
    %65 = tpu.matmul %62, %64, %cst_69 {dimension_numbers = #tpu.dot_dimension_numbers<[1], [0], [0], [1], [0, 0, 1, 1], [], []>} : vector<256x128xbf16>, vector<128x128xbf16>, vector<256x128xf32> -> vector<256x128xf32>
    %66 = arith.addf %60, %65 : vector<256x128xf32>
    %c2_70 = arith.constant 2 : index
    %c17_71 = arith.constant 17 : index
    %c0_72 = arith.constant 0 : index
    %67 = vector.load %arg9[%c2_70, %c17_71, %c0_72] : memref<18x48x128xbf16, #tpu.memory_space<vmem>>, vector<16x16x128xbf16>
    %68 = vector.shape_cast %67 : vector<16x16x128xbf16> to vector<256x128xbf16>
    %c8 = arith.constant 8 : index
    %c0_73 = arith.constant 0 : index
    %c0_74 = arith.constant 0 : index
    %69 = vector.load %arg3[%c8, %c0_73, %c0_74] : memref<9x128x128xbf16, #tpu.memory_space<vmem>>, vector<1x128x128xbf16>
    %70 = vector.shape_cast %69 : vector<1x128x128xbf16> to vector<128x128xbf16>
    %cst_75 = arith.constant dense<0.000000e+00> : vector<256x128xf32>
    %71 = tpu.matmul %68, %70, %cst_75 {dimension_numbers = #tpu.dot_dimension_numbers<[1], [0], [0], [1], [0, 0, 1, 1], [], []>} : vector<256x128xbf16>, vector<128x128xbf16>, vector<256x128xf32> -> vector<256x128xf32>
    %72 = arith.addf %66, %71 : vector<256x128xf32>
    %c0_76 = arith.constant 0 : index
    %c0_77 = arith.constant 0 : index
    %73 = vector.load %arg6[%c0_76, %c0_77] : memref<1x128xf32, #tpu.memory_space<vmem>>, vector<1x128xf32>
    %74 = vector.broadcast %73 : vector<1x128xf32> to vector<256x128xf32>
    %75 = arith.addf %72, %74 : vector<256x128xf32>
    %cst_78 = arith.constant 0.000000e+00 : f32
    %76 = vector.broadcast %cst_78 : f32 to vector<256x128xf32>
    %77 = arith.maximumf %75, %76 : vector<256x128xf32>
    %78 = vector.shape_cast %77 : vector<256x128xf32> to vector<16x16x128xf32>
    %79 = arith.truncf %78 : vector<16x16x128xf32> to vector<16x16x128xbf16>
    %c1_79 = arith.constant 1 : index
    %c16_80 = arith.constant 16 : index
    %c0_81 = arith.constant 0 : index
    %80 = vector.load %arg9[%c1_79, %c16_80, %c0_81] : memref<18x48x128xbf16, #tpu.memory_space<vmem>>, vector<16x16x128xbf16>
    tpu.vector_store %arg9[%c1_79, %c16_80, %c0_81], %79 {strides = array<i32>} : memref<18x48x128xbf16, #tpu.memory_space<vmem>>, vector<16x16x128xbf16>,
    %cst_82 = arith.constant 0.000000e+00 : f32
    %81 = vector.broadcast %cst_82 : f32 to vector<256x128xf32>
    %c0_83 = arith.constant 0 : index
    %c15_84 = arith.constant 15 : index
    %c0_85 = arith.constant 0 : index
    %82 = vector.load %arg9[%c0_83, %c15_84, %c0_85] : memref<18x48x128xbf16, #tpu.memory_space<vmem>>, vector<16x16x128xbf16>
    %83 = vector.shape_cast %82 : vector<16x16x128xbf16> to vector<256x128xbf16>
    %c0_86 = arith.constant 0 : index
    %c0_87 = arith.constant 0 : index
    %c0_88 = arith.constant 0 : index
    %84 = vector.load %arg4[%c0_86, %c0_87, %c0_88] : memref<9x128x128xbf16, #tpu.memory_space<vmem>>, vector<1x128x128xbf16>
    %85 = vector.shape_cast %84 : vector<1x128x128xbf16> to vector<128x128xbf16>
    %cst_89 = arith.constant dense<0.000000e+00> : vector<256x128xf32>
    %86 = tpu.matmul %83, %85, %cst_89 {dimension_numbers = #tpu.dot_dimension_numbers<[1], [0], [0], [1], [0, 0, 1, 1], [], []>} : vector<256x128xbf16>, vector<128x128xbf16>, vector<256x128xf32> -> vector<256x128xf32>
    %87 = arith.addf %81, %86 : vector<256x128xf32>
    %c0_90 = arith.constant 0 : index
    %c16_91 = arith.constant 16 : index
    %c0_92 = arith.constant 0 : index
    %88 = vector.load %arg9[%c0_90, %c16_91, %c0_92] : memref<18x48x128xbf16, #tpu.memory_space<vmem>>, vector<16x16x128xbf16>
    %89 = vector.shape_cast %88 : vector<16x16x128xbf16> to vector<256x128xbf16>
    %c1_93 = arith.constant 1 : index
    %c0_94 = arith.constant 0 : index
    %c0_95 = arith.constant 0 : index
    %90 = vector.load %arg4[%c1_93, %c0_94, %c0_95] : memref<9x128x128xbf16, #tpu.memory_space<vmem>>, vector<1x128x128xbf16>
    %91 = vector.shape_cast %90 : vector<1x128x128xbf16> to vector<128x128xbf16>
    %cst_96 = arith.constant dense<0.000000e+00> : vector<256x128xf32>
    %92 = tpu.matmul %89, %91, %cst_96 {dimension_numbers = #tpu.dot_dimension_numbers<[1], [0], [0], [1], [0, 0, 1, 1], [], []>} : vector<256x128xbf16>, vector<128x128xbf16>, vector<256x128xf32> -> vector<256x128xf32>
    %93 = arith.addf %87, %92 : vector<256x128xf32>
    %c0_97 = arith.constant 0 : index
    %c17_98 = arith.constant 17 : index
    %c0_99 = arith.constant 0 : index
    %94 = vector.load %arg9[%c0_97, %c17_98, %c0_99] : memref<18x48x128xbf16, #tpu.memory_space<vmem>>, vector<16x16x128xbf16>
    %95 = vector.shape_cast %94 : vector<16x16x128xbf16> to vector<256x128xbf16>
    %c2_100 = arith.constant 2 : index
    %c0_101 = arith.constant 0 : index
    %c0_102 = arith.constant 0 : index
    %96 = vector.load %arg4[%c2_100, %c0_101, %c0_102] : memref<9x128x128xbf16, #tpu.memory_space<vmem>>, vector<1x128x128xbf16>
    %97 = vector.shape_cast %96 : vector<1x128x128xbf16> to vector<128x128xbf16>
    %cst_103 = arith.constant dense<0.000000e+00> : vector<256x128xf32>
    %98 = tpu.matmul %95, %97, %cst_103 {dimension_numbers = #tpu.dot_dimension_numbers<[1], [0], [0], [1], [0, 0, 1, 1], [], []>} : vector<256x128xbf16>, vector<128x128xbf16>, vector<256x128xf32> -> vector<256x128xf32>
    %99 = arith.addf %93, %98 : vector<256x128xf32>
    %c1_104 = arith.constant 1 : index
    %c15_105 = arith.constant 15 : index
    %c0_106 = arith.constant 0 : index
    %100 = vector.load %arg9[%c1_104, %c15_105, %c0_106] : memref<18x48x128xbf16, #tpu.memory_space<vmem>>, vector<16x16x128xbf16>
    %101 = vector.shape_cast %100 : vector<16x16x128xbf16> to vector<256x128xbf16>
    %c3_107 = arith.constant 3 : index
    %c0_108 = arith.constant 0 : index
    %c0_109 = arith.constant 0 : index
    %102 = vector.load %arg4[%c3_107, %c0_108, %c0_109] : memref<9x128x128xbf16, #tpu.memory_space<vmem>>, vector<1x128x128xbf16>
    %103 = vector.shape_cast %102 : vector<1x128x128xbf16> to vector<128x128xbf16>
    %cst_110 = arith.constant dense<0.000000e+00> : vector<256x128xf32>
    %104 = tpu.matmul %101, %103, %cst_110 {dimension_numbers = #tpu.dot_dimension_numbers<[1], [0], [0], [1], [0, 0, 1, 1], [], []>} : vector<256x128xbf16>, vector<128x128xbf16>, vector<256x128xf32> -> vector<256x128xf32>
    %105 = arith.addf %99, %104 : vector<256x128xf32>
    %c1_111 = arith.constant 1 : index
    %c16_112 = arith.constant 16 : index
    %c0_113 = arith.constant 0 : index
    %106 = vector.load %arg9[%c1_111, %c16_112, %c0_113] : memref<18x48x128xbf16, #tpu.memory_space<vmem>>, vector<16x16x128xbf16>
    %107 = vector.shape_cast %106 : vector<16x16x128xbf16> to vector<256x128xbf16>
    %c4_114 = arith.constant 4 : index
    %c0_115 = arith.constant 0 : index
    %c0_116 = arith.constant 0 : index
    %108 = vector.load %arg4[%c4_114, %c0_115, %c0_116] : memref<9x128x128xbf16, #tpu.memory_space<vmem>>, vector<1x128x128xbf16>
    %109 = vector.shape_cast %108 : vector<1x128x128xbf16> to vector<128x128xbf16>
    %cst_117 = arith.constant dense<0.000000e+00> : vector<256x128xf32>
    %110 = tpu.matmul %107, %109, %cst_117 {dimension_numbers = #tpu.dot_dimension_numbers<[1], [0], [0], [1], [0, 0, 1, 1], [], []>} : vector<256x128xbf16>, vector<128x128xbf16>, vector<256x128xf32> -> vector<256x128xf32>
    %111 = arith.addf %105, %110 : vector<256x128xf32>
    %c1_118 = arith.constant 1 : index
    %c17_119 = arith.constant 17 : index
    %c0_120 = arith.constant 0 : index
    %112 = vector.load %arg9[%c1_118, %c17_119, %c0_120] : memref<18x48x128xbf16, #tpu.memory_space<vmem>>, vector<16x16x128xbf16>
    %113 = vector.shape_cast %112 : vector<16x16x128xbf16> to vector<256x128xbf16>
    %c5_121 = arith.constant 5 : index
    %c0_122 = arith.constant 0 : index
    %c0_123 = arith.constant 0 : index
    %114 = vector.load %arg4[%c5_121, %c0_122, %c0_123] : memref<9x128x128xbf16, #tpu.memory_space<vmem>>, vector<1x128x128xbf16>
    %115 = vector.shape_cast %114 : vector<1x128x128xbf16> to vector<128x128xbf16>
    %cst_124 = arith.constant dense<0.000000e+00> : vector<256x128xf32>
    %116 = tpu.matmul %113, %115, %cst_124 {dimension_numbers = #tpu.dot_dimension_numbers<[1], [0], [0], [1], [0, 0, 1, 1], [], []>} : vector<256x128xbf16>, vector<128x128xbf16>, vector<256x128xf32> -> vector<256x128xf32>
    %117 = arith.addf %111, %116 : vector<256x128xf32>
    %c2_125 = arith.constant 2 : index
    %c15_126 = arith.constant 15 : index
    %c0_127 = arith.constant 0 : index
    %118 = vector.load %arg9[%c2_125, %c15_126, %c0_127] : memref<18x48x128xbf16, #tpu.memory_space<vmem>>, vector<16x16x128xbf16>
    %119 = vector.shape_cast %118 : vector<16x16x128xbf16> to vector<256x128xbf16>
    %c6_128 = arith.constant 6 : index
    %c0_129 = arith.constant 0 : index
    %c0_130 = arith.constant 0 : index
    %120 = vector.load %arg4[%c6_128, %c0_129, %c0_130] : memref<9x128x128xbf16, #tpu.memory_space<vmem>>, vector<1x128x128xbf16>
    %121 = vector.shape_cast %120 : vector<1x128x128xbf16> to vector<128x128xbf16>
    %cst_131 = arith.constant dense<0.000000e+00> : vector<256x128xf32>
    %122 = tpu.matmul %119, %121, %cst_131 {dimension_numbers = #tpu.dot_dimension_numbers<[1], [0], [0], [1], [0, 0, 1, 1], [], []>} : vector<256x128xbf16>, vector<128x128xbf16>, vector<256x128xf32> -> vector<256x128xf32>
    %123 = arith.addf %117, %122 : vector<256x128xf32>
    %c2_132 = arith.constant 2 : index
    %c16_133 = arith.constant 16 : index
    %c0_134 = arith.constant 0 : index
    %124 = vector.load %arg9[%c2_132, %c16_133, %c0_134] : memref<18x48x128xbf16, #tpu.memory_space<vmem>>, vector<16x16x128xbf16>
    %125 = vector.shape_cast %124 : vector<16x16x128xbf16> to vector<256x128xbf16>
    %c7_135 = arith.constant 7 : index
    %c0_136 = arith.constant 0 : index
    %c0_137 = arith.constant 0 : index
    %126 = vector.load %arg4[%c7_135, %c0_136, %c0_137] : memref<9x128x128xbf16, #tpu.memory_space<vmem>>, vector<1x128x128xbf16>
    %127 = vector.shape_cast %126 : vector<1x128x128xbf16> to vector<128x128xbf16>
    %cst_138 = arith.constant dense<0.000000e+00> : vector<256x128xf32>
    %128 = tpu.matmul %125, %127, %cst_138 {dimension_numbers = #tpu.dot_dimension_numbers<[1], [0], [0], [1], [0, 0, 1, 1], [], []>} : vector<256x128xbf16>, vector<128x128xbf16>, vector<256x128xf32> -> vector<256x128xf32>
    %129 = arith.addf %123, %128 : vector<256x128xf32>
    %c2_139 = arith.constant 2 : index
    %c17_140 = arith.constant 17 : index
    %c0_141 = arith.constant 0 : index
    %130 = vector.load %arg9[%c2_139, %c17_140, %c0_141] : memref<18x48x128xbf16, #tpu.memory_space<vmem>>, vector<16x16x128xbf16>
    %131 = vector.shape_cast %130 : vector<16x16x128xbf16> to vector<256x128xbf16>
    %c8_142 = arith.constant 8 : index
    %c0_143 = arith.constant 0 : index
    %c0_144 = arith.constant 0 : index
    %132 = vector.load %arg4[%c8_142, %c0_143, %c0_144] : memref<9x128x128xbf16, #tpu.memory_space<vmem>>, vector<1x128x128xbf16>
    %133 = vector.shape_cast %132 : vector<1x128x128xbf16> to vector<128x128xbf16>
    %cst_145 = arith.constant dense<0.000000e+00> : vector<256x128xf32>
    %134 = tpu.matmul %131, %133, %cst_145 {dimension_numbers = #tpu.dot_dimension_numbers<[1], [0], [0], [1], [0, 0, 1, 1], [], []>} : vector<256x128xbf16>, vector<128x128xbf16>, vector<256x128xf32> -> vector<256x128xf32>
    %135 = arith.addf %129, %134 : vector<256x128xf32>
    %c0_146 = arith.constant 0 : index
    %c0_147 = arith.constant 0 : index
    %136 = vector.load %arg7[%c0_146, %c0_147] : memref<1x128xf32, #tpu.memory_space<vmem>>, vector<1x128xf32>
    %137 = vector.broadcast %136 : vector<1x128xf32> to vector<256x128xf32>
    %138 = arith.addf %135, %137 : vector<256x128xf32>
    %139 = arith.truncf %138 : vector<256x128xf32> to vector<256x128xbf16>
    %c0_148 = arith.constant 0 : index
    %c0_149 = arith.constant 0 : index
    %c0_150 = arith.constant 0 : index
    %140 = vector.load %arg8[%c0_148, %c0_149, %c0_150] : memref<1x256x128xbf16, #tpu.memory_space<vmem>>, vector<1x256x128xbf16>
    %141 = vector.shape_cast %140 : vector<1x256x128xbf16> to vector<256x128xbf16>
    %142 = vector.shape_cast %139 : vector<256x128xbf16> to vector<1x256x128xbf16>
    tpu.vector_store %arg8[%c0_148, %c0_149, %c0_150], %142 {strides = array<i32>} : memref<1x256x128xbf16, #tpu.memory_space<vmem>>, vector<1x256x128xbf16>,
    return
  }
  func.func @transform_0(%arg0: i32) -> (i32, i32, i32) {
    %c0_i32 = arith.constant 0 : i32
    %c0_i32_0 = arith.constant 0 : i32
    %c0_i32_1 = arith.constant 0 : i32
    return %arg0, %c0_i32, %c0_i32_0 : i32, i32, i32
  }
  func.func @transform_1(%arg0: i32) -> (i32, i32) {
    %c0_i32 = arith.constant 0 : i32
    %c0_i32_0 = arith.constant 0 : i32
    %c0_i32_1 = arith.constant 0 : i32
    return %c0_i32, %c0_i32_0 : i32, i32
  }
  func.func @transform_2(%arg0: i32) -> (i32, i32, i32) {
    %c0_i32 = arith.constant 0 : i32
    %c0_i32_0 = arith.constant 0 : i32
    %c0_i32_1 = arith.constant 0 : i32
    %c0_i32_2 = arith.constant 0 : i32
    return %c0_i32, %c0_i32_0, %c0_i32_1 : i32, i32, i32
  }
  func.func @transform_3(%arg0: i32) -> (i32, i32, i32) {
    %c0_i32 = arith.constant 0 : i32
    %c0_i32_0 = arith.constant 0 : i32
    %c0_i32_1 = arith.constant 0 : i32
    %c0_i32_2 = arith.constant 0 : i32
    return %c0_i32, %c0_i32_0, %c0_i32_1 : i32, i32, i32
  }
  func.func @transform_4(%arg0: i32) -> (i32, i32) {
    %c0_i32 = arith.constant 0 : i32
    %c0_i32_0 = arith.constant 0 : i32
    %c0_i32_1 = arith.constant 0 : i32
    return %c0_i32, %c0_i32_0 : i32, i32
  }
  func.func @transform_5(%arg0: i32) -> (i32, i32) {
    %c0_i32 = arith.constant 0 : i32
    %c0_i32_0 = arith.constant 0 : i32
    %c0_i32_1 = arith.constant 0 : i32
    return %c0_i32, %c0_i32_0 : i32, i32
  }
  func.func @transform_6(%arg0: i32) -> (i32, i32) {
    %c0_i32 = arith.constant 0 : i32
    %c0_i32_0 = arith.constant 0 : i32
    %c0_i32_1 = arith.constant 0 : i32
    return %c0_i32, %c0_i32_0 : i32, i32
  }
  func.func @transform_7(%arg0: i32) -> (i32, i32, i32) {
    %c0_i32 = arith.constant 0 : i32
    %c0_i32_0 = arith.constant 0 : i32
    %c0_i32_1 = arith.constant 0 : i32
    return %arg0, %c0_i32, %c0_i32_0 : i32, i32, i32
  }
}

</mosaic_0001>

<bundles_post_ra>
// kernel: mlp_forward.1
= control target key start
LH: loop header
LB: loop body
LE: loop exit
PB: predicated region body
PF: predicated region fallthrough
CT: control target
= control target key end

     0   :  { %s11252_s24 = smov 0   ;;  %s13340_s0 = inlined_call_operand.vmem [shape: bf16[2,256,128], index: 0, kind: input, shape index: {}]   ;;  %s13341_s1 = inlined_call_operand.vmem [shape: bf16[128,128], index: 1, kind: input, shape index: {}]   ;;  %s13342_s2 = inlined_call_operand.vmem [shape: bf16[9,128,128], index: 2, kind: input, shape index: {}]   ;;  %s13343_s3 = inlined_call_operand.vmem [shape: bf16[9,128,128], index: 3, kind: input, shape index: {}]   ;;  %s13344_s4 = inlined_call_operand.vmem [shape: f32[1,128], index: 4, kind: input, shape index: {}]   ;;  %s13345_s5 = inlined_call_operand.vmem [shape: f32[1,128], index: 5, kind: input, shape index: {}]   ;;  %s13346_s6 = inlined_call_operand.vmem [shape: f32[1,128], index: 6, kind: input, shape index: {}]   ;;  %s13347_s7 = inlined_call_operand.vmem [shape: bf16[2,256,128], index: 7, kind: output, shape index: {}]  }
   0x1 LB: > { %s8498_s25 = sadd.s32 4294967295, %s11209_s24   ;;  %p8502_p0 = scmp.ge.s32.totalorder %s11209_s24, 1  ;;  %s11209_s24 = sphi %s11252_s24, %s17_s24  }
   0x2   : > { %p237_p1 = scmp.lt.s32.totalorder %s11209_s24, 3 }
   0x4   : > { %p238_p2 = pnand %p8502_p0, %p237_p1 }
   0x6   : > { %241 = sbr.rel (%p238_p2) target bundleno = 1790 (0x6fe), region = 48 }
   0xd   : > { %v11002_v0 = vld [vmem:[%s13341_s1] sm:$0xff]   ;;  %p269_p3 = scmp.lt.s32.totalorder %s8498_s25, 1  ;;  %v11003_v1 = vld [vmem:[%s13341_s1 + $0x8] sm:$0xff]   ;;  %v11004_v2 = vld [vmem:[%s13341_s1 + $0x10] sm:$0xff]   ;;  %v13358_v31 = vmov 0  }
   0xe   : > { %9553 = vmatprep.subr.bf16.mxu0 %v11002_v0  ;;  %10465 = vmatprep.subr.bf16.mxu1 %v11002_v0  ;;  %v11005_v3 = vld [vmem:[%s13341_s1 + $0x18] sm:$0xff]   ;;  %v11006_v5 = vld [vmem:[%s13341_s1 + $0x20] sm:$0xff]   ;;  %v11007_v6 = vld [vmem:[%s13341_s1 + $0x28] sm:$0xff]   ;;  %281 = vst [vmem:[#allocation2 + $0x8] sm:$0xff] %v13358_v31  ;;  %vm776_vm0 = vsmask.f32 256 }
   0xf   : > { %s13603_s25 = smov (!%p269_p3, %s8498_s25), 1  ;;  %9554 = vmatpush3.bf16.msra.mxu0 %v11002_v0  ;;  %10473 = vmatpush3.bf16.msra.mxu1 %v11002_v0  ;;  %v11008_v8 = vld [vmem:[%s13341_s1 + $0x30] sm:$0xff]   ;;  %v11009_v9 = vld [vmem:[%s13341_s1 + $0x38] sm:$0xff]   ;;  %v11026_v10 = vld [vmem:[%s13342_s2 + $0x40] sm:$0xff]   ;;  %280 = vst [vmem:[#allocation2] sm:$0xff] %v13358_v31 }
  0x10   : > { %9555 = vmatprep.subr.bf16.mxu0 %v11003_v1  ;;  %10466 = vmatprep.subr.bf16.mxu1 %v11003_v1  ;;  %s8968_s9 = sshll.u32 %s13603_s25, 7  ;;  %v11027_v15 = vld [vmem:[%s13342_s2 + $0x48] sm:$0xff]   ;;  %v11028_v16 = vld [vmem:[%s13342_s2 + $0x50] sm:$0xff]   ;;  %v11029_v21 = vld [vmem:[%s13342_s2 + $0x58] sm:$0xff]   ;;  %282 = vst [vmem:[#allocation2 + $0x10] sm:$0xff] %v13358_v31 }
  0x11   : > { %s11277_s12 = scalar_lea.vmem %s13340_s0, %s8968_s9  ;;  %v11030_v28 = vld [vmem:[%s13342_s2 + $0x60] sm:$0xff]   ;;  %v11031_v29 = vld [vmem:[%s13342_s2 + $0x68] sm:$0xff]   ;;  %v11032_v30 = vld [vmem:[%s13342_s2 + $0x70] sm:$0xff]   ;;  %284 = vst [vmem:[#allocation2 + $0x198] sm:$0xff] %v13358_v31  ;;  %vm1468_vm1 = vsmask.f32 7424  ;;  %s13290_s19 = scalar_lea.vmem %s13347_s7, %s8968_s9 }
  0x12   : > { %v11010_v4 = vld [vmem:[%s11277_s12] sm:$0xff]   ;;  %v11011_v11 = vld [vmem:[%s11277_s12 + $0x8] sm:$0xff]   ;;  %v11012_v13 = vld [vmem:[%s11277_s12 + $0x10] sm:$0xff]   ;;  %286 = vst [vmem:[#allocation2 + $0x1a8] sm:$0xff] %v13358_v31 }
  0x13   : > { %9556 = vmatpush3.bf16.msra.mxu0 %v11003_v1  ;;  %10474 = vmatpush3.bf16.msra.mxu1 %v11003_v1  ;;  %v11018_v7 = vld [vmem:[%s11277_s12 + $0x40] sm:$0xff]   ;;  %v11019_v12 = vld [vmem:[%s11277_s12 + $0x48] sm:$0xff]   ;;  %v11020_v14 = vld [vmem:[%s11277_s12 + $0x50] sm:$0xff]   ;;  %288 = vst [vmem:[#allocation2 + $0x18] sm:$0xff] %v13358_v31 }
  0x14   : > { %9557 = vmatprep.subr.bf16.mxu0 %v11004_v2  ;;  %10467 = vmatprep.subr.bf16.mxu1 %v11004_v2  ;;  %v11013_v17 = vld [vmem:[%s11277_s12 + $0x18] sm:$0xff]   ;;  %v11014_v19 = vld [vmem:[%s11277_s12 + $0x20] sm:$0xff]   ;;  %v11015_v22 = vld [vmem:[%s11277_s12 + $0x28] sm:$0xff]   ;;  %289 = vst [vmem:[#allocation2 + $0x30] sm:$0xff] %v13358_v31 }
  0x15   : > { %9569 = vmatprep.mubr.bf16.mxu0 %v11010_v4  ;;  %9585 = vmatprep.mubr.bf16.mxu1 %v11018_v7  ;;  %v11021_v18 = vld [vmem:[%s11277_s12 + $0x58] sm:$0xff]   ;;  %v11022_v20 = vld [vmem:[%s11277_s12 + $0x60] sm:$0xff]   ;;  %v11023_v23 = vld [vmem:[%s11277_s12 + $0x68] sm:$0xff]   ;;  %290 = vst [vmem:[#allocation2 + $0x48] sm:$0xff] %v13358_v31 }
  0x16   : > { %v11016_v24 = vld [vmem:[%s11277_s12 + $0x30] sm:$0xff]   ;;  %v11017_v26 = vld [vmem:[%s11277_s12 + $0x38] sm:$0xff]   ;;  %291 = vst [vmem:[#allocation2 + $0x60] sm:$0xff] %v13358_v31  ;;  %292 = vst [vmem:[#allocation2 + $0x78] sm:$0xff] %v13358_v31 }
  0x17   : > { %9558 = vmatpush3.bf16.msra.mxu0 %v11004_v2  ;;  %10475 = vmatpush3.bf16.msra.mxu1 %v11004_v2  ;;  %v11024_v25 = vld [vmem:[%s11277_s12 + $0x70] sm:$0xff]   ;;  %v11025_v27 = vld [vmem:[%s11277_s12 + $0x78] sm:$0xff]   ;;  %293 = vst [vmem:[#allocation2 + $0x90] sm:$0xff] %v13358_v31  ;;  %294 = vst [vmem:[#allocation2 + $0xa8] sm:$0xff] %v13358_v31 }
  0x18   : > { %9559 = vmatprep.subr.bf16.mxu0 %v11005_v3  ;;  %10468 = vmatprep.subr.bf16.mxu1 %v11005_v3  ;;  %295 = vst [vmem:[#allocation2 + $0xc0] sm:$0xff] %v13358_v31  ;;  %296 = vst [vmem:[#allocation2 + $0xd8] sm:$0xff] %v13358_v31  ;;  %v11033_v32 = vld [vmem:[%s13342_s2 + $0x78] sm:$0xff]   ;;  %v11034_v33 = vld [vmem:[%s13342_s2] sm:$0xff]  }
  0x19   : > { %297 = vst [vmem:[#allocation2 + $0xf0] sm:$0xff] %v13358_v31  ;;  %298 = vst [vmem:[#allocation2 + $0x108] sm:$0xff] %v13358_v31  ;;  %v11379_v34 = vld [vmem:[%s13344_s4] ss:$0 sm:$0xff]  ;;  %v11035_v63 = vld [vmem:[%s13342_s2 + $0x8] sm:$0xff]  }
  0x1a   : > { %299 = vst [vmem:[#allocation2 + $0x120] sm:$0xff] %v13358_v31  ;;  %300 = vst [vmem:[#allocation2 + $0x138] sm:$0xff] %v13358_v31 }
  0x1b   : > { %9560 = vmatpush3.bf16.msra.mxu0 %v11005_v3  ;;  %10476 = vmatpush3.bf16.msra.mxu1 %v11005_v3  ;;  %301 = vst [vmem:[#allocation2 + $0x150] sm:$0xff] %v13358_v31  ;;  %302 = vst [vmem:[#allocation2 + $0x168] sm:$0xff] %v13358_v31 }
  0x1c   : > { %9561 = vmatprep.subr.bf16.mxu0 %v11006_v5  ;;  %10469 = vmatprep.subr.bf16.mxu1 %v11006_v5  ;;  %303 = vst [vmem:[#allocation2 + $0x180] sm:$0xff] %v13358_v31  ;;  %304 = vst [vmem:[#allocation2 + $0x28] sm:$0xff] %v13358_v31 }
  0x1d   : > { %305 = vst [vmem:[#allocation2 + $0x40] sm:$0xff] %v13358_v31  ;;  %306 = vst [vmem:[#allocation2 + $0x58] sm:$0xff] %v13358_v31 }
  0x1e   : > { %307 = vst [vmem:[#allocation2 + $0x70] sm:$0xff] %v13358_v31  ;;  %308 = vst [vmem:[#allocation2 + $0x88] sm:$0xff] %v13358_v31 }
  0x1f   : > { %9562 = vmatpush3.bf16.msra.mxu0 %v11006_v5  ;;  %10477 = vmatpush3.bf16.msra.mxu1 %v11006_v5  ;;  %309 = vst [vmem:[#allocation2 + $0xa0] sm:$0xff] %v13358_v31  ;;  %310 = vst [vmem:[#allocation2 + $0xb8] sm:$0xff] %v13358_v31 }
  0x20   : > { %9563 = vmatprep.subr.bf16.mxu0 %v11007_v6  ;;  %10470 = vmatprep.subr.bf16.mxu1 %v11007_v6  ;;  %311 = vst [vmem:[#allocation2 + $0xd0] sm:$0xff] %v13358_v31  ;;  %312 = vst [vmem:[#allocation2 + $0xe8] sm:$0xff] %v13358_v31 }
  0x21   : > { %313 = vst [vmem:[#allocation2 + $0x100] sm:$0xff] %v13358_v31  ;;  %314 = vst [vmem:[#allocation2 + $0x118] sm:$0xff] %v13358_v31 }
  0x22   : > { %315 = vst [vmem:[#allocation2 + $0x130] sm:$0xff] %v13358_v31  ;;  %316 = vst [vmem:[#allocation2 + $0x148] sm:$0xff] %v13358_v31 }
  0x23   : > { %9564 = vmatpush3.bf16.msra.mxu0 %v11007_v6  ;;  %10478 = vmatpush3.bf16.msra.mxu1 %v11007_v6  ;;  %317 = vst [vmem:[#allocation2 + $0x160] sm:$0xff] %v13358_v31  ;;  %318 = vst [vmem:[#allocation2 + $0x178] sm:$0xff] %v13358_v31 }
  0x24   : > { %9565 = vmatprep.subr.bf16.mxu0 %v11008_v8  ;;  %10471 = vmatprep.subr.bf16.mxu1 %v11008_v8  ;;  %319 = vst [vmem:[#allocation2 + $0x190] sm:$0xff] %v13358_v31 }
  0x27   : > { %9566 = vmatpush3.bf16.msra.mxu0 %v11008_v8  ;;  %10479 = vmatpush3.bf16.msra.mxu1 %v11008_v8 }
  0x28   : > { %9567 = vmatprep.subr.bf16.mxu0 %v11009_v9  ;;  %10472 = vmatprep.subr.bf16.mxu1 %v11009_v9 }
  0x2b   : > { %9568 = vmatpush3.bf16.msra.mxu0 %v11009_v9  ;;  %10480 = vmatpush3.bf16.msra.mxu1 %v11009_v9 }
  0x2c   : > { %9601 = vmatprep.subr.bf16.mxu1 %v11026_v10 }
  0x2e   : > { %9570 = vmatmul.mubr.bf16.vlgmr.msra.gmra.mrb[0].mxu0 %v11011_v11  ;;  %9586 = vmatmul.mubr.bf16.vlgmr.msra.gmra.mrb[0].mxu1 %v11019_v12 }
  0x2f   : > { %9573 = vmatprep.mubr.bf16.mxu0 %v11012_v13  ;;  %9589 = vmatprep.mubr.bf16.mxu1 %v11020_v14 }
  0x30   : > { %9602 = vmatpush3.bf16.msra.mxu1 %v11026_v10 }
  0x31   : > { %9603 = vmatprep.subr.bf16.mxu1 %v11027_v15 }
  0x34   : > { %9604 = vmatpush3.bf16.msra.mxu1 %v11027_v15  ;;  %v11036_v15 = vld [vmem:[%s13342_s2 + $0x10] sm:$0xff]  }
  0x35   : > { %9605 = vmatprep.subr.bf16.mxu1 %v11028_v16 }
  0x36   : > { %9574 = vmatmul.mubr.bf16.gmra.mrb[4].mxu0 %v11013_v17  ;;  %9590 = vmatmul.mubr.bf16.gmra.mrb[4].mxu1 %v11021_v18 }
  0x37   : > { %9577 = vmatprep.mubr.bf16.mxu0 %v11014_v19  ;;  %9593 = vmatprep.mubr.bf16.mxu1 %v11022_v20 }
  0x38   : > { %9606 = vmatpush3.bf16.msra.mxu1 %v11028_v16 }
  0x39   : > { %9607 = vmatprep.subr.bf16.mxu1 %v11029_v21 }
  0x3c   : > { %9608 = vmatpush3.bf16.msra.mxu1 %v11029_v21 }
  0x3d   : > { %9609 = vmatprep.subr.bf16.mxu1 %v11030_v28 }
  0x3e   : > { %9578 = vmatmul.mubr.bf16.gmra.mrb[8].mxu0 %v11015_v22  ;;  %9594 = vmatmul.mubr.bf16.gmra.mrb[8].mxu1 %v11023_v23 }
  0x3f   : > { %9581 = vmatprep.mubr.bf16.mxu0 %v11016_v24  ;;  %9597 = vmatprep.mubr.bf16.mxu1 %v11024_v25 }
  0x40   : > { %9610 = vmatpush3.bf16.msra.mxu1 %v11030_v28  ;;  %v11037_v28 = vld [vmem:[%s13342_s2 + $0x18] sm:$0xff]  }
  0x41   : > { %9611 = vmatprep.subr.bf16.mxu1 %v11031_v29 }
  0x44   : > { %9612 = vmatpush3.bf16.msra.mxu1 %v11031_v29 }
  0x45   : > { %9613 = vmatprep.subr.bf16.mxu1 %v11032_v30 }
  0x46   : > { %9582 = vmatmul.mubr.bf16.gmra.mrb[12].mxu0 %v11017_v26  ;;  %9598 = vmatmul.mubr.bf16.gmra.mrb[12].mxu1 %v11025_v27 }
  0x47   : > { %9617 = vmatprep.mubr.bf16.mxu1 %v13358_v31  ;;  %10049 = vmatprep.mubr.bf16.mxu0 %v13358_v31 }
  0x48   : > { %9614 = vmatpush3.bf16.msra.mxu1 %v11032_v30 }
  0x49   : > { %9615 = vmatprep.subr.bf16.mxu1 %v11033_v32 }
  0x4c   : > { %9616 = vmatpush3.bf16.msra.mxu1 %v11033_v32 }
  0x4d   : > { %9649 = vmatprep.subr.bf16.mxu1 %v11034_v33 }
 0x101   : > { %v9571_v35 = vpop.f32.mrb[0].mxu0  ;;  %v9587_v36 = vpop.f32.mrb[0].mxu1 }
 0x102   : > { %v562_v37 = vadd.f32 %v9571_v35, %v11379_v34  ;;  %v553_v38 = vpop.f32.mrb[1].mxu0  ;;  %v626_v39 = vadd.f32 %v9587_v36, %v11379_v34  ;;  %v617_v40 = vpop.f32.mrb[1].mxu1 }
 0x103   : > { %v554_v41 = vadd.f32 %v11379_v34, %v553_v38  ;;  %v9572_v42 = vpop.f32.mrb[2].mxu0  ;;  %v618_v43 = vadd.f32 %v11379_v34, %v617_v40  ;;  %v9588_v44 = vpop.f32.mrb[2].mxu1 }
 0x104   : > { %v565_v45 = vadd.f32 %v9572_v42, %v11379_v34  ;;  %v556_v46 = vpop.f32.mrb[3].mxu0  ;;  %v698_v47 = vmax.f32 %v626_v39, 0.0  ;;  %v629_v48 = vadd.f32 %v9588_v44, %v11379_v34  ;;  %v620_v49 = vpop.f32.mrb[3].mxu1  ;;  %v682_v53 = vmax.f32 %v562_v37, 0.0 }
 0x105   : > { %v557_v50 = vadd.f32 %v11379_v34, %v556_v46  ;;  %v696_v51 = vmax.f32 %v618_v43, 0.0  ;;  %v621_v52 = vadd.f32 %v11379_v34, %v620_v49  ;;  %v680_v56 = vmax.f32 %v554_v41, 0.0 }
 0x106   : > { %v683_v54 = vmax.f32 %v565_v45, 0.0  ;;  %v699_v55 = vmax.f32 %v629_v48, 0.0 }
 0x107   : > { %v681_v57 = vmax.f32 %v557_v50, 0.0  ;;  %v697_v58 = vmax.f32 %v621_v52, 0.0 }
 0x108   : > { %v11389_v59 = vpack.c.bf16 %v683_v54, %v682_v53  ;;  %v11391_v60 = vpack.c.bf16 %v699_v55, %v698_v47  ;;  %v11038_v47 = vld [vmem:[%s13342_s2 + $0x20] sm:$0xff]  }
 0x109   : > { %v11393_v61 = vpack.c.bf16 %v681_v57, %v680_v56  ;;  %v9575_v62 = vpop.f32.mrb[4].mxu0  ;;  %v11398_v0 = vpack.c.bf16 %v697_v58, %v696_v51  ;;  %v9591_v1 = vpop.f32.mrb[4].mxu1 }
 0x10a   : > { %729 = vst [vmem:[#allocation2 + $0x38] sm:$0xff] %v11389_v59  ;;  %v578_v2 = vadd.f32 %v9575_v62, %v11379_v34  ;;  %v569_v3 = vpop.f32.mrb[5].mxu0  ;;  %737 = vst [vmem:[#allocation2 + $0xf8] sm:$0xff] %v11391_v60  ;;  %v642_v4 = vadd.f32 %v9591_v1, %v11379_v34  ;;  %v633_v5 = vpop.f32.mrb[5].mxu1  ;;  %v11039_v1 = vld [vmem:[%s13342_s2 + $0x28] sm:$0xff]  }
 0x10b   : > { %728 = vst [vmem:[#allocation2 + $0x20] sm:$0xff] %v11393_v61  ;;  %v570_v6 = vadd.f32 %v11379_v34, %v569_v3  ;;  %v9576_v7 = vpop.f32.mrb[6].mxu0  ;;  %9618 = vmatmul.mubr.bf16.vlgmr.msra.gmra.mrb[16].mxu1 %v11393_v61  ;;  %736 = vst [vmem:[#allocation2 + $0xe0] sm:$0xff] %v11398_v0  ;;  %v634_v8 = vadd.f32 %v11379_v34, %v633_v5  ;;  %v9592_v9 = vpop.f32.mrb[6].mxu1 }
 0x10c   : > { %v581_v10 = vadd.f32 %v9576_v7, %v11379_v34  ;;  %v572_v11 = vpop.f32.mrb[7].mxu0  ;;  %9650 = vmatpush3.bf16.msra.mxu1 %v11034_v33  ;;  %9621 = vmatprep.mubr.bf16.mxu1 %v11389_v59  ;;  %v636_v12 = vpop.f32.mrb[7].mxu1  ;;  %v686_v13 = vmax.f32 %v578_v2, 0.0  ;;  %v702_v17 = vmax.f32 %v642_v4, 0.0  ;;  %v645_v18 = vadd.f32 %v9592_v9, %v11379_v34 }
 0x10d   : > { %v573_v14 = vadd.f32 %v11379_v34, %v572_v11  ;;  %9651 = vmatprep.subr.bf16.mxu1 %v11035_v63  ;;  %v637_v19 = vadd.f32 %v11379_v34, %v636_v12  ;;  %v684_v20 = vmax.f32 %v570_v6, 0.0  ;;  %v700_v22 = vmax.f32 %v634_v8, 0.0 }
 0x10e   : > { %v687_v16 = vmax.f32 %v581_v10, 0.0  ;;  %v703_v24 = vmax.f32 %v645_v18, 0.0 }
 0x10f   : > { %v685_v21 = vmax.f32 %v573_v14, 0.0  ;;  %v701_v25 = vmax.f32 %v637_v19, 0.0 }
 0x110   : > { %v11417_v23 = vpack.c.bf16 %v687_v16, %v686_v13  ;;  %9652 = vmatpush3.bf16.msra.mxu1 %v11035_v63  ;;  %v11426_v33 = vpack.c.bf16 %v703_v24, %v702_v17  ;;  %v11040_v17 = vld [vmem:[%s13342_s2 + $0x30] sm:$0xff]  }
 0x111   : > { %v11419_v26 = vpack.c.bf16 %v685_v21, %v684_v20  ;;  %v9579_v27 = vpop.f32.mrb[8].mxu0  ;;  %9653 = vmatprep.subr.bf16.mxu1 %v11036_v15  ;;  %v9595_v29 = vpop.f32.mrb[8].mxu1  ;;  %v11431_v38 = vpack.c.bf16 %v701_v25, %v700_v22 }
 0x112   : > { %731 = vst [vmem:[#allocation2 + $0x68] sm:$0xff] %v11417_v23  ;;  %v594_v30 = vadd.f32 %v9579_v27, %v11379_v34  ;;  %v585_v32 = vpop.f32.mrb[9].mxu0  ;;  %v649_v35 = vpop.f32.mrb[9].mxu1  ;;  %739 = vst [vmem:[#allocation2 + $0x128] sm:$0xff] %v11426_v33  ;;  %v658_v42 = vadd.f32 %v9595_v29, %v11379_v34 }
 0x113   : > { %730 = vst [vmem:[#allocation2 + $0x50] sm:$0xff] %v11419_v26  ;;  %v586_v36 = vadd.f32 %v11379_v34, %v585_v32  ;;  %v9580_v37 = vpop.f32.mrb[10].mxu0  ;;  %9622 = vmatmul.mubr.bf16.gmra.mrb[20].mxu1 %v11419_v26  ;;  %v9596_v39 = vpop.f32.mrb[10].mxu1  ;;  %738 = vst [vmem:[#allocation2 + $0x110] sm:$0xff] %v11431_v38  ;;  %v650_v46 = vadd.f32 %v11379_v34, %v649_v35  ;;  %v11041_v32 = vld [vmem:[%s13342_s2 + $0x38] sm:$0xff]  }
 0x114   : > { %v597_v40 = vadd.f32 %v9580_v37, %v11379_v34  ;;  %v588_v41 = vpop.f32.mrb[11].mxu0  ;;  %9625 = vmatprep.mubr.bf16.mxu1 %v11417_v23  ;;  %9654 = vmatpush3.bf16.msra.mxu1 %v11036_v15  ;;  %v652_v43 = vpop.f32.mrb[11].mxu1  ;;  %v690_v44 = vmax.f32 %v594_v30, 0.0  ;;  %v706_v49 = vmax.f32 %v658_v42, 0.0  ;;  %v661_v50 = vadd.f32 %v9596_v39, %v11379_v34 }
 0x115   : > { %v589_v45 = vadd.f32 %v11379_v34, %v588_v41  ;;  %9655 = vmatprep.subr.bf16.mxu1 %v11037_v28  ;;  %v653_v51 = vadd.f32 %v11379_v34, %v652_v43  ;;  %v688_v52 = vmax.f32 %v586_v36, 0.0  ;;  %v704_v54 = vmax.f32 %v650_v46, 0.0 }
 0x116   : > { %v691_v48 = vmax.f32 %v597_v40, 0.0  ;;  %v707_v56 = vmax.f32 %v661_v50, 0.0  ;;  %v806_v37 = vshrl.u32 %v11389_v59, 16  ;;  %v809_v39 = vshll.u32 %v11389_v59, 16 }
 0x117   : > { %v689_v53 = vmax.f32 %v589_v45, 0.0  ;;  %v705_v57 = vmax.f32 %v653_v51, 0.0  ;;  %v794_v40 = vshrl.u32 %v11393_v61, 16  ;;  %v797_v41 = vshll.u32 %v11393_v61, 16  ;;  %v11641_v61 = vld [vmem:[#allocation2 + $0x38] sm:$0xff] }
 0x118   : > { %v11445_v55 = vpack.c.bf16 %v691_v48, %v690_v44  ;;  %9656 = vmatpush3.bf16.msra.mxu1 %v11037_v28  ;;  %v11454_v4 = vpack.c.bf16 %v707_v56, %v706_v49  ;;  %v13360_v42 = vshll.u32 %v11398_v0, 16  ;;  %v13354_v43 = vshll.u32 %v11391_v60, 16 }
 0x119   : > { %v11447_v58 = vpack.c.bf16 %v689_v53, %v688_v52  ;;  %v9583_v62 = vpop.f32.mrb[12].mxu0  ;;  %9657 = vmatprep.subr.bf16.mxu1 %v11038_v47  ;;  %v9599_v63 = vpop.f32.mrb[12].mxu1  ;;  %v11459_v8 = vpack.c.bf16 %v705_v57, %v704_v54  ;;  %v818_v44 = vshrl.u32 %v11419_v26, 16  ;;  %v821_v45 = vshll.u32 %v11419_v26, 16 }
 0x11a   : > { %733 = vst [vmem:[#allocation2 + $0x98] sm:$0xff] %v11445_v55  ;;  %v610_v2 = vadd.f32 %v9583_v62, %v11379_v34  ;;  %v601_v3 = vpop.f32.mrb[13].mxu0  ;;  %v665_v5 = vpop.f32.mrb[13].mxu1  ;;  %741 = vst [vmem:[#allocation2 + $0x158] sm:$0xff] %v11454_v4  ;;  %v674_v12 = vadd.f32 %v9599_v63, %v11379_v34  ;;  %v830_v46 = vshrl.u32 %v11417_v23, 16  ;;  %v13367_v49 = vshll.u32 %v11445_v55, 16 }
 0x11b   : > { %732 = vst [vmem:[#allocation2 + $0x80] sm:$0xff] %v11447_v58  ;;  %v602_v6 = vadd.f32 %v11379_v34, %v601_v3  ;;  %v9584_v7 = vpop.f32.mrb[14].mxu0  ;;  %9626 = vmatmul.mubr.bf16.gmra.mrb[24].mxu1 %v11447_v58  ;;  %v9600_v9 = vpop.f32.mrb[14].mxu1  ;;  %740 = vst [vmem:[#allocation2 + $0x140] sm:$0xff] %v11459_v8  ;;  %v666_v16 = vadd.f32 %v11379_v34, %v665_v5  ;;  %v13368_v48 = vshll.u32 %v11447_v58, 16  ;;  %v13352_v51 = vshll.u32 %v11431_v38, 16 }
 0x11c   : > { %v613_v10 = vadd.f32 %v9584_v7, %v11379_v34  ;;  %v604_v11 = vpop.f32.mrb[15].mxu0  ;;  %9629 = vmatprep.mubr.bf16.mxu1 %v11445_v55  ;;  %9658 = vmatpush3.bf16.msra.mxu1 %v11038_v47  ;;  %v668_v13 = vpop.f32.mrb[15].mxu1  ;;  %v694_v14 = vmax.f32 %v610_v2, 0.0  ;;  %v710_v19 = vmax.f32 %v674_v12, 0.0  ;;  %v677_v20 = vadd.f32 %v9600_v9, %v11379_v34 }
 0x11d   : > { %v605_v15 = vadd.f32 %v11379_v34, %v604_v11  ;;  %9659 = vmatprep.subr.bf16.mxu1 %v11039_v1  ;;  %v669_v21 = vadd.f32 %v11379_v34, %v668_v13  ;;  %v692_v22 = vmax.f32 %v602_v6, 0.0  ;;  %v708_v25 = vmax.f32 %v666_v16, 0.0  ;;  %v11490_v34 = vld [vmem:[%s13342_s2 + $0x80] sm:$0xff]  }
 0x11e   : > { %v695_v18 = vmax.f32 %v613_v10, 0.0  ;;  %v711_v28 = vmax.f32 %v677_v20, 0.0  ;;  %v833_v47 = vshll.u32 %v11417_v23, 16  ;;  %v842_v52 = vshrl.u32 %v11447_v58, 16 }
 0x11f   : > { %v693_v24 = vmax.f32 %v605_v15, 0.0  ;;  %v709_v29 = vmax.f32 %v669_v21, 0.0  ;;  %v854_v53 = vshrl.u32 %v11445_v55, 16  ;;  %v13348_v56 = vshll.u32 %v11426_v33, 16 }
 0x120   : > { %v11473_v27 = vpack.c.bf16 %v695_v18, %v694_v14  ;;  %9660 = vmatpush3.bf16.msra.mxu1 %v11039_v1  ;;  %v727_v35 = vpack.c.bf16 %v711_v28, %v710_v19  ;;  %v13351_v62 = vshll.u32 %v11459_v8, 16  ;;  %v13349_v63 = vshll.u32 %v11454_v4, 16 }
 0x121   : > { %v11475_v30 = vpack.c.bf16 %v693_v24, %v692_v22  ;;  %9661 = vmatprep.subr.bf16.mxu1 %v11040_v17  ;;  %v11481_v36 = vpack.c.bf16 %v709_v29, %v708_v25  ;;  %v1486_v1 = vrot.slane %v797_v41, 1  ;;  %v1498_v3 = vrot.slane %v809_v39, 1 }
 0x122   : > { %735 = vst [vmem:[#allocation2 + $0xc8] sm:$0xff] %v11473_v27  ;;  %743 = vst [vmem:[#allocation2 + $0x188] sm:$0xff] %v727_v35  ;;  %v13363_v54 = vshll.u32 %v11473_v27, 16  ;;  %v13365_v57 = vshrl.u32 %v11473_v27, 16  ;;  %v1510_v5 = vrot.slane %v821_v45, 1  ;;  %v1522_v6 = vrot.slane %v833_v47, 1 }
 0x123   : > { %734 = vst [vmem:[#allocation2 + $0xb0] sm:$0xff] %v11475_v30  ;;  %9630 = vmatmul.mubr.bf16.gmra.mrb[28].mxu1 %v11475_v30  ;;  %742 = vst [vmem:[#allocation2 + $0x170] sm:$0xff] %v11481_v36  ;;  %v13364_v50 = vshll.u32 %v11475_v30, 16  ;;  %v13366_v2 = vshrl.u32 %v11475_v30, 16  ;;  %v11527_v7 = vor.u32 %v1486_v1, %v794_v40  ;;  %v1534_v9 = vrot.slane %v13368_v48, 1  ;;  %v11699_v48 = vld [vmem:[#allocation2 + $0x110] sm:$0xff] }
 0x124   : > { %9633 = vmatprep.mubr.bf16.mxu1 %v11473_v27  ;;  %9662 = vmatpush3.bf16.msra.mxu1 %v11040_v17  ;;  %v1546_v10 = vrot.slane %v13367_v49, 1  ;;  %v11537_v12 = vor.u32 %v1498_v3, %v806_v37  ;;  %v11541_v13 = vor.u32 %v1510_v5, %v818_v44  ;;  %v11545_v14 = vor.u32 %v1522_v6, %v830_v46 }
 0x125   : > { %9663 = vmatprep.subr.bf16.mxu1 %v11041_v32  ;;  %v1558_v11 = vrot.slane %v13364_v50, 1  ;;  %v1570_v15 = vrot.slane %v13363_v54, 1  ;;  %v13350_v16 = vshll.u32 %v11481_v36, 16  ;;  %v11552_v17 = vor.u32 %v1534_v9, %v842_v52 }
 0x126   : > { %v11556_v18 = vor.u32 %v1546_v10, %v854_v53  ;;  %v13362_v20 = vshrl.u32 %v11398_v0, 16  ;;  %v13361_v21 = vshrl.u32 %v11391_v60, 16  ;;  %v13353_v22 = vshrl.u32 %v11431_v38, 16 }
 0x127   : > { %v11560_v19 = vor.u32 %v1558_v11, %v13366_v2  ;;  %v11567_v24 = vor.u32 %v1570_v15, %v13365_v57  ;;  %v13359_v25 = vshrl.u32 %v11426_v33, 16  ;;  %v13357_v28 = vshrl.u32 %v11459_v8, 16  ;;  %v11692_v57 = vld [vmem:[#allocation2 + $0xf8] sm:$0xff]  ;;  %v11043_v2 = vld [vmem:[%s13342_s2 + $0x88] sm:$0xff]  }
 0x128   : > { %9664 = vmatpush3.bf16.msra.mxu1 %v11041_v32  ;;  %v13355_v29 = vshrl.u32 %v11454_v4, 16  ;;  %v1582_v32 = vrot.slane %v13360_v42, 1  ;;  %v13356_v35 = vshrl.u32 %v11481_v36, 16  ;;  %v1594_v1 = vrot.slane %v13354_v43, 1  ;;  %v748_v43 = vld [vmem:[#allocation2 + $0x30] sm:$0x80] }
 0x129   : > { %9697 = vmatprep.subr.bf16.mxu1 %v11490_v34  ;;  %v1606_v3 = vrot.slane %v13352_v51, 1  ;;  %v1618_v5 = vrot.slane %v13348_v56, 1  ;;  %v1630_v9 = vrot.slane %v13351_v62, 1  ;;  %v1642_v10 = vrot.slane %v13349_v63, 1  ;;  %v744_v62 = vld [vmem:[#allocation2] sm:$0x80] }
 0x12a   : > { %v11584_v6 = vor.u32 %v1582_v32, %v13362_v20  ;;  %v1654_v11 = vrot.slane %v13350_v16, 1  ;;  %v11595_v15 = vor.u32 %v1594_v1, %v13361_v21  ;;  %v778_v51 = vshrl.u32 %v744_v62, 16  ;;  %v11680_v23 = vld [vmem:[#allocation2 + $0xc8] sm:$0xff] }
 0x12b   : > { %9634 = vmatmul.mubr.bf16.gmra.mrb[32].mxu1 %v11398_v0  ;;  %v11599_v56 = vor.u32 %v1606_v3, %v13353_v22  ;;  %v11603_v32 = vor.u32 %v1618_v5, %v13359_v25  ;;  %v11607_v63 = vor.u32 %v1630_v9, %v13357_v28  ;;  %v11611_v16 = vor.u32 %v1642_v10, %v13355_v29  ;;  %v746_v22 = vld [vmem:[#allocation2 + $0x18] sm:$0x80]  ;;  %v750_v5 = vld [vmem:[#allocation2 + $0x48] sm:$0x80]  ;;  %v752_v29 = vld [vmem:[#allocation2 + $0x60] sm:$0x80] }
 0x12c   : > { %9637 = vmatprep.mubr.bf16.mxu1 %v11391_v60  ;;  %v11615_v1 = vor.u32 %v1654_v11, %v13356_v35  ;;  %v784_v3 = vrot.slane %v13358_v31, 7  ;;  %v796_v9 = vrot.slane %v794_v40, 7  ;;  %v790_v10 = vshrl.u32 %v746_v22, 16  ;;  %v11628_v40 = vld [vmem:[#allocation2 + $0x90] sm:$0x80]  ;;  %v11751_v50 = vld [vmem:[#allocation2 + $0x188] sm:$0xff] }
 0x12d   : > { %v808_v11 = vrot.slane %v806_v37, 7  ;;  %v780_v35 = vrot.slane %v778_v51, 7  ;;  %v802_v28 = vshrl.u32 %v748_v43, 16  ;;  %v820_v62 = vrot.slane %v818_v44, 7  ;;  %v11635_v51 = vld [vmem:[#allocation2 + $0x78] sm:$0x80] }
 0x12e   : > { %v814_v31 = vshrl.u32 %v750_v5, 16  ;;  %v826_v25 = vshrl.u32 %v752_v29, 16  ;;  %v792_v42 = vrot.slane %v790_v10, 7  ;;  %v799_v21 = vor.u32 %v797_v41, %v796_v9  ;;  %v11639_v5 = vld [vmem:[#allocation2 + $0x20] sm:$0xff]  ;;  %v11670_v9 = vld [vmem:[#allocation2 + $0x98] sm:$0xff] }
 0x12f   : > { %v832_v22 = vrot.slane %v830_v46, 7  ;;  %v788_v20 = vsel %vm776_vm0, %v780_v35, %v784_v3  ;;  %v804_v37 = vrot.slane %v802_v28, 7  ;;  %v811_v43 = vor.u32 %v809_v39, %v808_v11  ;;  %v11647_v28 = vld [vmem:[#allocation2 + $0x50] sm:$0xff]  ;;  %v11728_v46 = vld [vmem:[#allocation2 + $0x158] sm:$0xff] }
 0x130   : > { %v816_v44 = vrot.slane %v814_v31, 7  ;;  %v823_v29 = vor.u32 %v821_v45, %v820_v62  ;;  %v11644_v41 = vrot.slane %v826_v25, 7  ;;  %v11651_v59 = vrot.slane %v842_v52, 7  ;;  %v11659_v45 = vld [vmem:[#allocation2 + $0x68] sm:$0xff]  ;;  %v11661_v25 = vld [vmem:[#allocation2 + $0x80] sm:$0xff] }
 0x131   : > { %v11655_v31 = vrot.slane %v854_v53, 7  ;;  %v800_v26 = vsel %vm776_vm0, %v792_v42, %v799_v21  ;;  %13414 = vst [vmem:[#allocation3_spill] sm:$0xff] %v11661_v25  ;;  %v812_v35 = vsel %vm776_vm0, %v804_v37, %v811_v43  ;;  %v11666_v3 = vor.u32 %v833_v47, %v832_v22  ;;  %v11686_v43 = vld [vmem:[#allocation2 + $0xe0] sm:$0xff]  ;;  %v11708_v62 = vld [vmem:[#allocation2 + $0x128] sm:$0xff] }
 0x132   : > { %v13369_v52 = vshll.u32 %v11639_v5, 16  ;;  %v13370_v53 = vshll.u32 %v11641_v61, 16  ;;  %v11675_v42 = vsel %vm776_vm0, %v816_v44, %v823_v29  ;;  %v13372_v21 = vshrl.u32 %v11639_v5, 16  ;;  %v11713_v44 = vld [vmem:[#allocation2 + $0x140] sm:$0xff] }
 0x133   : > { %9638 = vmatmul.mubr.bf16.gmra.mrb[36].mxu1 %v11431_v38  ;;  %v13374_v10 = vshrl.u32 %v11641_v61, 16  ;;  %v13371_v11 = vshll.u32 %v11647_v28, 16  ;;  %v13375_v47 = vshrl.u32 %v11647_v28, 16  ;;  %v13373_v22 = vshll.u32 %v11659_v45, 16 }
 0x134   : > { %9641 = vmatprep.mubr.bf16.mxu1 %v11426_v33  ;;  %v2728_v39 = vrot.slane %v13369_v52, 1  ;;  %v2740_v29 = vrot.slane %v13370_v53, 1  ;;  %v13429_v54 = vshll.u32 %v11686_v43, 16 }
 0x135   : > { %v2752_v49 = vrot.slane %v13371_v11, 1  ;;  %v2764_v37 = vrot.slane %v13373_v22, 1  ;;  %v11044_v22 = vld [vmem:[%s13342_s2 + $0x90] sm:$0xff]   ;;  %v13420_v11 = vshrl.u32 %v11659_v45, 16 }
 0x136   : > { %v11717_v52 = vor.u32 %v2728_v39, %v13372_v21  ;;  %v11721_v53 = vor.u32 %v2740_v29, %v13374_v10  ;;  %v13419_v21 = vshll.u32 %v11661_v25, 16  ;;  %v11741_v10 = vld [vmem:[#allocation2 + $0x170] sm:$0xff] }
 0x137   : > { %v11732_v39 = vor.u32 %v2752_v49, %v13375_v47  ;;  %v13422_v49 = vshll.u32 %v11670_v9, 16 }
 0x138   : > { %13416 = vst [vmem:[#allocation5_spill] sm:$0xff] %v11717_v52  ;;  %13417 = vst [vmem:[#allocation6_spill] sm:$0xff] %v11721_v53  ;;  %v2776_v29 = vrot.slane %v13419_v21, 1 }
 0x139   : > { %13418 = vst [vmem:[#allocation7_spill] sm:$0xff] %v11732_v39  ;;  %v2788_v47 = vrot.slane %v13422_v49, 1  ;;  %v13423_v39 = vshrl.u32 %v11661_v25, 16  ;;  %v13428_v49 = vshll.u32 %v11680_v23, 16 }
 0x13b   : > { %9642 = vmatmul.mubr.bf16.gmra.mrb[40].mxu1 %v11459_v8  ;;  %v2812_v21 = vrot.slane %v13428_v49, 1 }
 0x13c   : > { %9645 = vmatprep.mubr.bf16.mxu1 %v11454_v4 }
 0x143   : > { %9646 = vmatmul.mubr.bf16.gmra.mrb[44].mxu1 %v11481_v36 }
 0x144   : > { %9665 = vmatprep.mubr.bf16.mxu1 %v788_v20  ;;  %v11672_v20 = vld [vmem:[#allocation2 + $0xb0] sm:$0xff] }
 0x145   : > { %13415 = vst [vmem:[#allocation4_spill] sm:$0xff] %v11672_v20 }
 0x14b   : > { %9666 = vmatmul.mubr.bf16.vlgmr.msra.gmra.mrb[16].mxu1 %v800_v26  ;;  %v11745_v26 = vor.u32 %v2764_v37, %v13420_v11  ;;  %v13426_v11 = vshrl.u32 %v11670_v9, 16 }
 0x14c   : > { %9698 = vmatpush3.bf16.msra.mxu1 %v11490_v34  ;;  %9669 = vmatprep.mubr.bf16.mxu1 %v812_v35  ;;  %v11755_v34 = vor.u32 %v2776_v29, %v13423_v39  ;;  %v13425_v35 = vshll.u32 %v11672_v20, 16  ;;  %v13430_v39 = vshrl.u32 %v11672_v20, 16  ;;  %v13438_v20 = vshrl.u32 %v11699_v48, 16 }
 0x14d   : > { %9699 = vmatprep.subr.bf16.mxu1 %v11043_v2  ;;  %13421 = vst [vmem:[#allocation8_spill] sm:$0xff] %v11745_v26  ;;  %v11762_v37 = vor.u32 %v2788_v47, %v13426_v11  ;;  %v2824_v26 = vrot.slane %v13429_v54, 1  ;;  %v11045_v11 = vld [vmem:[%s13342_s2 + $0x98] sm:$0xff]  }
 0x14e   : > { %13424 = vst [vmem:[#allocation9_spill] sm:$0xff] %v11755_v34  ;;  %v2800_v53 = vrot.slane %v13425_v35, 1  ;;  %v13432_v35 = vshll.u32 %v11692_v57, 16  ;;  %v13433_v34 = vshll.u32 %v11699_v48, 16 }
 0x14f   : > { %13427 = vst [vmem:[#allocation10_spill] sm:$0xff] %v11762_v37 }
 0x150   : > { %9700 = vmatpush3.bf16.msra.mxu1 %v11043_v2  ;;  %v11771_v29 = vor.u32 %v2800_v53, %v13430_v39  ;;  %v2836_v52 = vrot.slane %v13432_v35, 1  ;;  %v2848_v47 = vrot.slane %v13433_v34, 1  ;;  %v13434_v2 = vshrl.u32 %v11680_v23, 16 }
 0x151   : > { %9701 = vmatprep.subr.bf16.mxu1 %v11044_v22  ;;  %v13435_v53 = vshrl.u32 %v11686_v43, 16  ;;  %v13436_v35 = vshll.u32 %v11708_v62, 16 }
 0x152   : > { %13431 = vst [vmem:[#allocation11_spill] sm:$0xff] %v11771_v29  ;;  %v11783_v49 = vor.u32 %v2812_v21, %v13434_v2  ;;  %v13437_v29 = vshrl.u32 %v11692_v57, 16  ;;  %v11798_v54 = vor.u32 %v2848_v47, %v13438_v20  ;;  %v13439_v21 = vshll.u32 %v11713_v44, 16 }
 0x153   : > { %v11787_v39 = vor.u32 %v2824_v26, %v13435_v53  ;;  %v2860_v25 = vrot.slane %v13436_v35, 1  ;;  %9670 = vmatmul.mubr.bf16.gmra.mrb[20].mxu1 %v11675_v42  ;;  %v836_v26 = vsel %vm776_vm0, %v11644_v41, %v11666_v3  ;;  %v13380_v53 = vshrl.u32 %v11728_v46, 16 }
 0x154   : > { %v11794_v37 = vor.u32 %v2836_v52, %v13437_v29  ;;  %v2872_v2 = vrot.slane %v13439_v21, 1  ;;  %v13440_v35 = vshrl.u32 %v11708_v62, 16  ;;  %v13442_v52 = vshll.u32 %v11728_v46, 16  ;;  %9673 = vmatprep.mubr.bf16.mxu1 %v836_v26  ;;  %9702 = vmatpush3.bf16.msra.mxu1 %v11044_v22 }
 0x155   : > { %v2140_v20 = vshrl.u32 %v11741_v10, 16  ;;  %v13443_v47 = vshrl.u32 %v11713_v44, 16  ;;  %v13445_v21 = vshll.u32 %v11741_v10, 16  ;;  %9703 = vmatprep.subr.bf16.mxu1 %v11045_v11  ;;  %v13447_v22 = vshll.u32 %v11751_v50, 16 }
 0x156   : > { %v11809_v34 = vor.u32 %v2860_v25, %v13440_v35  ;;  %v2884_v29 = vrot.slane %v13442_v52, 1  ;;  %v11046_v25 = vld [vmem:[%s13342_s2 + $0xa0] sm:$0xff]   ;;  %v13450_v3 = vshrl.u32 %v11628_v40, 16 }
 0x157   : > { %v11816_v42 = vor.u32 %v2872_v2, %v13443_v47  ;;  %v2896_v41 = vrot.slane %v13445_v21, 1  ;;  %v2908_v35 = vrot.slane %v13447_v22, 1  ;;  %v13448_v2 = vshrl.u32 %v11635_v51, 16 }
 0x158   : > { %13441 = vst [vmem:[#allocation12_spill] sm:$0xff] %v11809_v34  ;;  %v11826_v26 = vor.u32 %v2884_v29, %v13380_v53  ;;  %v13449_v47 = vshll.u32 %v11447_v58, 16  ;;  %v852_v34 = vrot.slane %v13450_v3, 7  ;;  %v13451_v29 = vshll.u32 %v11445_v55, 16  ;;  %9704 = vmatpush3.bf16.msra.mxu1 %v11045_v11  ;;  %v11047_v58 = vld [vmem:[%s13342_s2 + $0xa8] sm:$0xff]   ;;  %v11048_v11 = vld [vmem:[%s13342_s2 + $0xb0] sm:$0xff]  }
 0x159   : > { %13444 = vst [vmem:[#allocation13_spill] sm:$0xff] %v11816_v42  ;;  %v840_v52 = vrot.slane %v13448_v2, 7  ;;  %v11837_v42 = vor.u32 %v2896_v41, %v2140_v20  ;;  %v13452_v22 = vshrl.u32 %v11751_v50, 16  ;;  %v760_v2 = vld [vmem:[#allocation2 + $0xc0] sm:$0x80]  ;;  %9705 = vmatprep.subr.bf16.mxu1 %v11046_v25  ;;  %v13454_v55 = vshrl.u32 %v11473_v27, 16 }
 0x15a   : > { %13446 = vst [vmem:[#allocation14_spill] sm:$0xff] %v11826_v26  ;;  %v847_v21 = vor.u32 %v13449_v47, %v11651_v59  ;;  %v859_v53 = vor.u32 %v13451_v29, %v11655_v31  ;;  %v758_v26 = vld [vmem:[#allocation2 + $0xa8] sm:$0x80]  ;;  %v13453_v59 = vshrl.u32 %v11475_v30, 16  ;;  %v874_v47 = vshrl.u32 %v760_v2, 16 }
 0x15b   : > { %v11846_v51 = vor.u32 %v2908_v35, %v13452_v22  ;;  %v862_v3 = vshrl.u32 %v758_v26, 16  ;;  %v880_v31 = vrot.slane %v13454_v55, 7  ;;  %v13455_v22 = vshll.u32 %v11475_v30, 16  ;;  %v762_v55 = vld [vmem:[#allocation2 + $0xd8] sm:$0x80] }
 0x15c   : > { %v868_v40 = vrot.slane %v13453_v59, 7  ;;  %v848_v41 = vsel %vm776_vm0, %v840_v52, %v847_v21  ;;  %v860_v35 = vsel %vm776_vm0, %v852_v34, %v859_v53  ;;  %9706 = vmatpush3.bf16.msra.mxu1 %v11046_v25  ;;  %v876_v52 = vrot.slane %v874_v47, 7  ;;  %v11049_v34 = vld [vmem:[%s13342_s2 + $0xb8] sm:$0xff]  }
 0x15d   : > { %9674 = vmatmul.mubr.bf16.gmra.mrb[24].mxu1 %v848_v41  ;;  %9707 = vmatprep.subr.bf16.mxu1 %v11047_v58  ;;  %v864_v29 = vrot.slane %v862_v3, 7  ;;  %v13456_v26 = vshll.u32 %v11473_v27, 16  ;;  %v764_v41 = vld [vmem:[#allocation2 + $0xf0] sm:$0x80]  ;;  %v13457_v53 = vshrl.u32 %v11398_v0, 16  ;;  %v886_v3 = vshrl.u32 %v762_v55, 16 }
 0x15e   : > { %9677 = vmatprep.mubr.bf16.mxu1 %v860_v35  ;;  %v871_v59 = vor.u32 %v13455_v22, %v868_v40  ;;  %v13458_v30 = vshrl.u32 %v11391_v60, 16  ;;  %v13459_v47 = vshll.u32 %v11398_v0, 16  ;;  %v766_v55 = vld [vmem:[#allocation2 + $0x108] sm:$0x80] }
 0x15f   : > { %v883_v21 = vor.u32 %v13456_v26, %v880_v31  ;;  %v892_v25 = vrot.slane %v13457_v53, 7  ;;  %v898_v31 = vshrl.u32 %v764_v41, 16  ;;  %v888_v35 = vrot.slane %v886_v3, 7  ;;  %v768_v53 = vld [vmem:[#allocation2 + $0x120] sm:$0x80] }
 0x160   : > { %9708 = vmatpush3.bf16.msra.mxu1 %v11047_v58  ;;  %v872_v2 = vsel %vm776_vm0, %v864_v29, %v871_v59  ;;  %v904_v40 = vrot.slane %v13458_v30, 7  ;;  %v11876_v58 = vld [vmem:[%s13342_s2 + $0xc0] sm:$0xff]   ;;  %v13460_v59 = vshll.u32 %v11391_v60, 16  ;;  %v910_v41 = vshrl.u32 %v766_v55, 16 }
 0x161   : > { %9709 = vmatprep.subr.bf16.mxu1 %v11048_v11  ;;  %v884_v27 = vsel %vm776_vm0, %v876_v52, %v883_v21  ;;  %v895_v29 = vor.u32 %v13459_v47, %v892_v25  ;;  %v900_v22 = vrot.slane %v898_v31, 7  ;;  %v922_v25 = vshrl.u32 %v768_v53, 16  ;;  %v770_v47 = vld [vmem:[#allocation2 + $0x138] sm:$0x80] }
 0x162   : > { %v907_v26 = vor.u32 %v13460_v59, %v904_v40  ;;  %v912_v60 = vrot.slane %v910_v41, 7  ;;  %v13463_v30 = vshll.u32 %v11431_v38, 16  ;;  %v772_v59 = vld [vmem:[#allocation2 + $0x150] sm:$0x80]  ;;  %v1437_v41 = vld [vmem:[#allocation2 + $0x10] sm:$0x1] }
 0x163   : > { %v896_v21 = vsel %vm776_vm0, %v888_v35, %v895_v29  ;;  %v924_v40 = vrot.slane %v922_v25, 7  ;;  %v13465_v35 = vshrl.u32 %v11459_v8, 16  ;;  %v774_v25 = vld [vmem:[#allocation2 + $0x168] sm:$0x80] }
 0x164   : > { %9710 = vmatpush3.bf16.msra.mxu1 %v11048_v11  ;;  %v13461_v11 = vshrl.u32 %v11431_v38, 16  ;;  %v908_v0 = vsel %vm776_vm0, %v900_v22, %v907_v26  ;;  %v13466_v22 = vshrl.u32 %v11454_v4, 16  ;;  %v946_v38 = vshrl.u32 %v772_v59, 16 }
 0x165   : > { %9678 = vmatmul.mubr.bf16.gmra.mrb[28].mxu1 %v872_v2  ;;  %9711 = vmatprep.subr.bf16.mxu1 %v11049_v34  ;;  %v13462_v2 = vshrl.u32 %v11426_v33, 16  ;;  %v940_v29 = vrot.slane %v13465_v35, 7 }
 0x166   : > { %9681 = vmatprep.mubr.bf16.mxu1 %v884_v27  ;;  %v916_v52 = vrot.slane %v13461_v11, 7  ;;  %v13464_v27 = vshll.u32 %v11426_v33, 16  ;;  %v934_v11 = vshrl.u32 %v770_v47, 16  ;;  %v952_v26 = vrot.slane %v13466_v22, 7 }
 0x167   : > { %v928_v3 = vrot.slane %v13462_v2, 7  ;;  %v13467_v33 = vshll.u32 %v11459_v8, 16  ;;  %v948_v2 = vrot.slane %v946_v38, 7 }
 0x168   : > { %9712 = vmatpush3.bf16.msra.mxu1 %v11049_v34  ;;  %v919_v34 = vor.u32 %v13463_v30, %v916_v52  ;;  %v936_v52 = vrot.slane %v934_v11, 7  ;;  %v1441_v11 = vld [vmem:[#allocation2 + $0x40] sm:$0x1] }
 0x169   : > { %9745 = vmatprep.subr.bf16.mxu1 %v11876_v58  ;;  %v931_v31 = vor.u32 %v13464_v27, %v928_v3  ;;  %v13468_v3 = vshll.u32 %v11454_v4, 16  ;;  %v13470_v27 = vshrl.u32 %v11481_v36, 16  ;;  %v1501_v38 = vshll.u32 %v1441_v11, 16 }
 0x16a   : > { %v920_v55 = vsel %vm776_vm0, %v912_v60, %v919_v34  ;;  %v13469_v60 = vmov 0   ;;  %v1477_v34 = vshll.u32 %v1437_v41, 16  ;;  %v1445_v41 = vld [vmem:[#allocation2 + $0x70] sm:$0x1] }
 0x16b   : > { %v932_v53 = vsel %vm776_vm0, %v924_v40, %v931_v31  ;;  %v1474_v30 = vrot.slane %v13469_v60, 1  ;;  %v964_v47 = vrot.slane %v13470_v27, 7  ;;  %v958_v31 = vshrl.u32 %v774_v25, 16  ;;  %v11052_v60 = vld [vmem:[%s13342_s2 + $0xd0] sm:$0xff]   ;;  %v1447_v27 = vld [vmem:[#allocation2 + $0x88] sm:$0x1] }
 0x16c   : > { %v1479_v8 = vrot.slane %v1477_v34, 1  ;;  %v1525_v25 = vshll.u32 %v1445_v41, 16 }
 0x16d   : > { %9682 = vmatmul.mubr.bf16.gmra.mrb[32].mxu1 %v896_v21  ;;  %v943_v21 = vor.u32 %v13467_v33, %v940_v29  ;;  %v960_v35 = vrot.slane %v958_v31, 7  ;;  %v13471_v29 = vshll.u32 %v11481_v36, 16  ;;  %v1503_v33 = vrot.slane %v1501_v38, 1  ;;  %v11051_v36 = vld [vmem:[%s13342_s2 + $0xc8] sm:$0xff]  }
 0x16e   : > { %9685 = vmatprep.mubr.bf16.mxu1 %v908_v0  ;;  %v955_v0 = vor.u32 %v13468_v3, %v952_v26  ;;  %v1480_v22 = vsel %vm1468_vm1, %v1474_v30, %v1479_v8  ;;  %v1527_v34 = vrot.slane %v1525_v25, 1  ;;  %v1459_v25 = vld [vmem:[#allocation2 + $0x118] sm:$0x1] }
 0x16f   : > { %v944_v40 = vsel %vm776_vm0, %v936_v52, %v943_v21  ;;  %v967_v4 = vor.u32 %v13471_v29, %v964_v47  ;;  %v1443_v21 = vld [vmem:[#allocation2 + $0x58] sm:$0x1]  ;;  %v1449_v47 = vld [vmem:[#allocation2 + $0xa0] sm:$0x1] }
 0x170   : > { %v956_v59 = vsel %vm776_vm0, %v948_v2, %v955_v0  ;;  %v1513_v3 = vshll.u32 %v1443_v21, 16  ;;  %v1504_v0 = vsel %vm1468_vm1, %v11537_v12, %v1503_v33  ;;  %v1549_v31 = vshll.u32 %v1449_v47, 16  ;;  %v1451_v29 = vld [vmem:[#allocation2 + $0xb8] sm:$0x1]  ;;  %v1457_v33 = vld [vmem:[#allocation2 + $0x100] sm:$0x1] }
 0x171   : > { %v968_v26 = vsel %vm776_vm0, %v960_v35, %v967_v4  ;;  %v1453_v4 = vld [vmem:[#allocation2 + $0xd0] sm:$0x1] }
 0x172   : > { %v1515_v30 = vrot.slane %v1513_v3, 1  ;;  %v1551_v35 = vrot.slane %v1549_v31, 1 }
 0x174   : > { %v1516_v12 = vsel %vm1468_vm1, %v11541_v13, %v1515_v30  ;;  %v11055_v13 = vld [vmem:[%s13342_s2 + $0xe8] sm:$0xff]   ;;  %v1552_v11 = vsel %vm1468_vm1, %v11556_v18, %v1551_v35  ;;  %v1609_v30 = vshll.u32 %v1459_v25, 16  ;;  %v1467_v35 = vld [vmem:[#allocation2 + $0x178] sm:$0x1] }
 0x175   : > { %9686 = vmatmul.mubr.bf16.gmra.mrb[36].mxu1 %v920_v55  ;;  %v1439_v55 = vld [vmem:[#allocation2 + $0x28] sm:$0x1] }
 0x176   : > { %9689 = vmatprep.mubr.bf16.mxu1 %v932_v53  ;;  %v1489_v53 = vshll.u32 %v1439_v55, 16  ;;  %v1561_v55 = vshll.u32 %v1451_v29, 16 }
 0x178   : > { %v1491_v52 = vrot.slane %v1489_v53, 1  ;;  %v1563_v53 = vrot.slane %v1561_v55, 1 }
 0x17a   : > { %v1492_v2 = vsel %vm1468_vm1, %v11527_v7, %v1491_v52  ;;  %v11053_v7 = vld [vmem:[%s13342_s2 + $0xd8] sm:$0xff]   ;;  %v1455_v52 = vld [vmem:[#allocation2 + $0xe8] sm:$0x1]  ;;  %v1564_v18 = vsel %vm1468_vm1, %v11560_v19, %v1563_v53  ;;  %v1937_v53 = vld [vmem:[#allocation2 + $0x30] sm:$0x80] }
 0x17b   : > { %v1585_v21 = vshll.u32 %v1455_v52, 16  ;;  %v1980_v52 = vshrl.u32 %v1937_v53, 16 }
 0x17d   : > { %9690 = vmatmul.mubr.bf16.gmra.mrb[40].mxu1 %v944_v40  ;;  %v1528_v40 = vsel %vm1468_vm1, %v11545_v14, %v1527_v34  ;;  %v1587_v3 = vrot.slane %v1585_v21, 1  ;;  %v13475_v21 = vshrl.u32 %v11647_v28, 16 }
 0x17e   : > { %9693 = vmatprep.mubr.bf16.mxu1 %v956_v59  ;;  %v11054_v59 = vld [vmem:[%s13342_s2 + $0xe0] sm:$0xff]  }
 0x17f   : > { %v1588_v19 = vsel %vm1468_vm1, %v11584_v6, %v1587_v3  ;;  %v13476_v3 = vshll.u32 %v11641_v61, 16 }
 0x185   : > { %9694 = vmatmul.mubr.bf16.gmra.mrb[44].mxu1 %v968_v26  ;;  %v11056_v26 = vld [vmem:[%s13342_s2 + $0xf0] sm:$0xff]  }
 0x186   : > { %9713 = vmatprep.mubr.bf16.mxu1 %v1480_v22  ;;  %v1573_v22 = vshll.u32 %v1453_v4, 16  ;;  %v1657_v4 = vshll.u32 %v1467_v35, 16  ;;  %v13481_v35 = vshll.u32 %v11659_v45, 16 }
 0x188   : > { %v1575_v38 = vrot.slane %v1573_v22, 1  ;;  %v13473_v22 = vshll.u32 %v11639_v5, 16 }
 0x18a   : > { %v1576_v41 = vsel %vm1468_vm1, %v11567_v24, %v1575_v38  ;;  %v1939_v38 = vld [vmem:[#allocation2 + $0x48] sm:$0x80] }
 0x18d   : > { %9714 = vmatmul.mubr.bf16.vlgmr.msra.gmra.mrb[16].mxu1 %v1492_v2  ;;  %v11058_v2 = vld [vmem:[%s13342_s2 + $0x100] sm:$0xff]  }
 0x18e   : > { %9746 = vmatpush3.bf16.msra.mxu1 %v11876_v58  ;;  %9717 = vmatprep.mubr.bf16.mxu1 %v1504_v0  ;;  %v1537_v58 = vshll.u32 %v1447_v27, 16  ;;  %v1611_v27 = vrot.slane %v1609_v30, 1  ;;  %v1943_v30 = vld [vmem:[#allocation2 + $0x78] sm:$0x80] }
 0x18f   : > { %9747 = vmatprep.subr.bf16.mxu1 %v11051_v36 }
 0x190   : > { %v1539_v8 = vrot.slane %v1537_v58, 1  ;;  %v1612_v58 = vsel %vm1468_vm1, %v11599_v56, %v1611_v27 }
 0x192   : > { %9748 = vmatpush3.bf16.msra.mxu1 %v11051_v36  ;;  %v1540_v14 = vsel %vm1468_vm1, %v11552_v17, %v1539_v8  ;;  %v11057_v17 = vld [vmem:[%s13342_s2 + $0xf8] sm:$0xff]   ;;  %v1597_v36 = vshll.u32 %v1457_v33, 16  ;;  %v13474_v33 = vshrl.u32 %v11641_v61, 16 }
 0x193   : > { %9749 = vmatprep.subr.bf16.mxu1 %v11052_v60 }
 0x194   : > { %v1599_v0 = vrot.slane %v1597_v36, 1  ;;  %v1982_v36 = vrot.slane %v1980_v52, 7 }
 0x195   : > { %9718 = vmatmul.mubr.bf16.gmra.mrb[20].mxu1 %v1516_v12  ;;  %v1465_v12 = vld [vmem:[#allocation2 + $0x160] sm:$0x1] }
 0x196   : > { %9721 = vmatprep.mubr.bf16.mxu1 %v1528_v40  ;;  %9750 = vmatpush3.bf16.msra.mxu1 %v11052_v60  ;;  %v1461_v60 = vld [vmem:[#allocation2 + $0x130] sm:$0x1]  ;;  %v1600_v24 = vsel %vm1468_vm1, %v11595_v15, %v1599_v0  ;;  %v1645_v6 = vshll.u32 %v1465_v12, 16  ;;  %v1935_v15 = vld [vmem:[#allocation2 + $0x18] sm:$0x80] }
 0x197   : > { %9751 = vmatprep.subr.bf16.mxu1 %v11053_v7  ;;  %v1621_v34 = vshll.u32 %v1461_v60, 16  ;;  %v1968_v56 = vshrl.u32 %v1935_v15, 16 }
 0x198   : > { %v1647_v8 = vrot.slane %v1645_v6, 1 }
 0x199   : > { %v1623_v47 = vrot.slane %v1621_v34, 1 }
 0x19a   : > { %9752 = vmatpush3.bf16.msra.mxu1 %v11053_v7  ;;  %v1463_v7 = vld [vmem:[#allocation2 + $0x148] sm:$0x1] }
 0x19b   : > { %9753 = vmatprep.subr.bf16.mxu1 %v11054_v59  ;;  %v1633_v40 = vshll.u32 %v1463_v7, 16  ;;  %v1624_v31 = vsel %vm1468_vm1, %v11603_v32, %v1623_v47  ;;  %v1659_v32 = vrot.slane %v1657_v4, 1  ;;  %v13478_v47 = vshrl.u32 %v11659_v45, 16 }
 0x19d   : > { %9722 = vmatmul.mubr.bf16.gmra.mrb[24].mxu1 %v1540_v14  ;;  %v13472_v14 = vshrl.u32 %v11639_v5, 16  ;;  %v2010_v7 = vrot.slane %v13478_v47, 7 }
 0x19e   : > { %9725 = vmatprep.mubr.bf16.mxu1 %v1552_v11  ;;  %9754 = vmatpush3.bf16.msra.mxu1 %v11054_v59  ;;  %v1635_v59 = vrot.slane %v1633_v40, 1  ;;  %v1970_v11 = vrot.slane %v1968_v56, 7  ;;  %v13479_v40 = vld [vmem:[#allocation3_spill] sm:$0xff] }
 0x19f   : > { %9755 = vmatprep.subr.bf16.mxu1 %v11055_v13  ;;  %v1974_v55 = vrot.slane %v13472_v14, 7  ;;  %v12000_v15 = vor.u32 %v13481_v35, %v2010_v7  ;;  %v13482_v4 = vshll.u32 %v13479_v40, 16  ;;  %v1945_v56 = vld [vmem:[#allocation2 + $0x90] sm:$0x80]  ;;  %v1947_v14 = vld [vmem:[#allocation2 + $0xa8] sm:$0x80] }
 0x1a0   : > { %v1636_v29 = vsel %vm1468_vm1, %v11607_v63, %v1635_v59  ;;  %v1660_v63 = vsel %vm1468_vm1, %v11615_v1, %v1659_v32  ;;  %v13477_v1 = vshll.u32 %v11647_v28, 16  ;;  %v11060_v59 = vld [vmem:[%s13342_s2 + $0x110] sm:$0xff]   ;;  %v2028_v32 = vshrl.u32 %v1945_v56, 16  ;;  %v1955_v56 = vld [vmem:[#allocation2 + $0x108] sm:$0x80] }
 0x1a1   : > { %v2040_v53 = vshrl.u32 %v1947_v14, 16  ;;  %v13489_v7 = vshrl.u32 %v11686_v43, 16  ;;  %v13491_v35 = vshll.u32 %v11686_v43, 16  ;;  %v11065_v14 = vld [vmem:[%s13342_s2 + $0x138] sm:$0xff]  }
 0x1a2   : > { %9756 = vmatpush3.bf16.msra.mxu1 %v11055_v13  ;;  %v1648_v13 = vsel %vm1468_vm1, %v11611_v16, %v1647_v8 }
 0x1a3   : > { %9757 = vmatprep.subr.bf16.mxu1 %v11056_v26 }
 0x1a5   : > { %9726 = vmatmul.mubr.bf16.gmra.mrb[28].mxu1 %v1564_v18  ;;  %v1992_v18 = vshrl.u32 %v1939_v38, 16  ;;  %v13484_v38 = vld [vmem:[#allocation4_spill] sm:$0xff] }
 0x1a6   : > { %9729 = vmatprep.mubr.bf16.mxu1 %v1576_v41  ;;  %9758 = vmatpush3.bf16.msra.mxu1 %v11056_v26  ;;  %v1977_v26 = vor.u32 %v13473_v22, %v1974_v55  ;;  %v1998_v41 = vrot.slane %v13475_v21, 7  ;;  %v2042_v21 = vrot.slane %v2040_v53, 7  ;;  %v13493_v53 = vshrl.u32 %v11699_v48, 16 }
 0x1a7   : > { %9759 = vmatprep.subr.bf16.mxu1 %v11057_v17  ;;  %v1994_v25 = vrot.slane %v1992_v18, 7 }
 0x1a8   : > { %v1978_v16 = vsel %vm776_vm0, %v1970_v11, %v1977_v26  ;;  %v11982_v60 = vor.u32 %v13477_v1, %v1998_v41  ;;  %v13483_v11 = vshrl.u32 %v11670_v9, 16  ;;  %v13487_v41 = vshll.u32 %v13484_v38, 16  ;;  %v11063_v1 = vld [vmem:[%s13342_s2 + $0x128] sm:$0xff]  }
 0x1aa   : > { %9760 = vmatpush3.bf16.msra.mxu1 %v11057_v17  ;;  %v1986_v17 = vrot.slane %v13474_v33, 7  ;;  %v2002_v12 = vsel %vm776_vm0, %v1994_v25, %v11982_v60  ;;  %v2034_v22 = vrot.slane %v13483_v11, 7  ;;  %v11062_v33 = vld [vmem:[%s13342_s2 + $0x120] sm:$0xff]   ;;  %v1951_v25 = vld [vmem:[#allocation2 + $0xd8] sm:$0x80] }
 0x1ab   : > { %9793 = vmatprep.subr.bf16.mxu1 %v11058_v2  ;;  %v2064_v47 = vshrl.u32 %v1951_v25, 16  ;;  %v1957_v25 = vld [vmem:[#allocation2 + $0x120] sm:$0x80] }
 0x1ac   : > { %v11978_v0 = vor.u32 %v13476_v3, %v1986_v17  ;;  %v2030_v17 = vrot.slane %v2028_v32, 7  ;;  %v1949_v3 = vld [vmem:[#allocation2 + $0xc0] sm:$0x80]  ;;  %v13492_v32 = vshrl.u32 %v11692_v57, 16 }
 0x1ad   : > { %9730 = vmatmul.mubr.bf16.gmra.mrb[32].mxu1 %v1588_v19  ;;  %v1941_v19 = vld [vmem:[#allocation2 + $0x60] sm:$0x80] }
 0x1ae   : > { %9733 = vmatprep.mubr.bf16.mxu1 %v1600_v24  ;;  %v11059_v24 = vld [vmem:[%s13342_s2 + $0x108] sm:$0xff]   ;;  %v1990_v34 = vsel %vm776_vm0, %v1982_v36, %v11978_v0  ;;  %v2004_v27 = vshrl.u32 %v1941_v19, 16  ;;  %v2082_v11 = vrot.slane %v13492_v32, 7  ;;  %v13500_v32 = vshrl.u32 %v11728_v46, 16 }
 0x1b0   : > { %v2006_v8 = vrot.slane %v2004_v27, 7 }
 0x1b2   : > { %v2014_v55 = vsel %vm776_vm0, %v2006_v8, %v12000_v15  ;;  %v2066_v8 = vrot.slane %v2064_v47, 7 }
 0x1b5   : > { %9734 = vmatmul.mubr.bf16.gmra.mrb[36].mxu1 %v1612_v58  ;;  %v2016_v58 = vshrl.u32 %v1943_v30, 16  ;;  %v2052_v30 = vshrl.u32 %v1949_v3, 16 }
 0x1b6   : > { %9737 = vmatprep.mubr.bf16.mxu1 %v1624_v31  ;;  %v13480_v31 = vshrl.u32 %v13479_v40, 16 }
 0x1b8   : > { %v2022_v6 = vrot.slane %v13480_v31, 7  ;;  %v2054_v31 = vrot.slane %v2052_v30, 7  ;;  %v2100_v30 = vshrl.u32 %v1957_v25, 16 }
 0x1bd   : > { %9738 = vmatmul.mubr.bf16.gmra.mrb[40].mxu1 %v1636_v29  ;;  %v2018_v29 = vrot.slane %v2016_v58, 7  ;;  %v11064_v58 = vld [vmem:[%s13342_s2 + $0x130] sm:$0xff]  }
 0x1be   : > { %9741 = vmatprep.mubr.bf16.mxu1 %v1648_v13  ;;  %v12004_v13 = vor.u32 %v13482_v4, %v2022_v6  ;;  %v13490_v6 = vshll.u32 %v11680_v23, 16  ;;  %v1953_v4 = vld [vmem:[#allocation2 + $0xf0] sm:$0x80] }
 0x1c0   : > { %v2026_v26 = vsel %vm776_vm0, %v2018_v29, %v12004_v13 }
 0x1c5   : > { %9742 = vmatmul.mubr.bf16.gmra.mrb[44].mxu1 %v1660_v63  ;;  %v13485_v63 = vshrl.u32 %v13484_v38, 16 }
 0x1c6   : > { %9761 = vmatprep.mubr.bf16.mxu1 %v1978_v16  ;;  %v13486_v16 = vshll.u32 %v11670_v9, 16 }
 0x1c7   : > { %v2046_v52 = vrot.slane %v13485_v63, 7  ;;  %v2094_v63 = vrot.slane %v13493_v53, 7  ;;  %v2142_v53 = vrot.slane %v2140_v20, 7 }
 0x1c8   : > { %v12022_v18 = vor.u32 %v13486_v16, %v2034_v22 }
 0x1c9   : > { %v12026_v36 = vor.u32 %v13487_v41, %v2046_v52  ;;  %v11066_v52 = vld [vmem:[%s13342_s2 + $0x140] sm:$0xff]   ;;  %v13495_v41 = vshll.u32 %v11699_v48, 16 }
 0x1ca   : > { %v2038_v19 = vsel %vm776_vm0, %v2030_v17, %v12022_v18  ;;  %v13494_v17 = vshll.u32 %v11692_v57, 16 }
 0x1cb   : > { %v2050_v27 = vsel %vm776_vm0, %v2042_v21, %v12026_v36  ;;  %v12070_v3 = vor.u32 %v13495_v41, %v2094_v63  ;;  %v13502_v41 = vshll.u32 %v11741_v10, 16 }
 0x1cc   : > { %v12066_v16 = vor.u32 %v13494_v17, %v2082_v11  ;;  %v2130_v11 = vrot.slane %v13500_v32, 7 }
 0x1cd   : > { %9762 = vmatmul.mubr.bf16.vlgmr.msra.gmra.mrb[16].mxu1 %v1990_v34  ;;  %v12102_v25 = vor.u32 %v13502_v41, %v2142_v53  ;;  %v11077_v41 = vld [vmem:[%s13342_s2 + $0x198] sm:$0xff]  }
 0x1ce   : > { %9794 = vmatpush3.bf16.msra.mxu1 %v11058_v2  ;;  %9765 = vmatprep.mubr.bf16.mxu1 %v2002_v12  ;;  %v11061_v2 = vld [vmem:[%s13342_s2 + $0x118] sm:$0xff]   ;;  %v2070_v12 = vrot.slane %v13489_v7, 7  ;;  %v13497_v7 = vshrl.u32 %v11713_v44, 16 }
 0x1cf   : > { %9795 = vmatprep.subr.bf16.mxu1 %v11059_v24 }
 0x1d0   : > { %v12048_v29 = vor.u32 %v13491_v35, %v2070_v12  ;;  %v2118_v12 = vrot.slane %v13497_v7, 7  ;;  %v13499_v35 = vshll.u32 %v11713_v44, 16 }
 0x1d2   : > { %9796 = vmatpush3.bf16.msra.mxu1 %v11059_v24  ;;  %v13488_v24 = vshrl.u32 %v11680_v23, 16  ;;  %v2074_v22 = vsel %vm776_vm0, %v2066_v8, %v12048_v29 }
 0x1d3   : > { %9797 = vmatprep.subr.bf16.mxu1 %v11060_v59 }
 0x1d4   : > { %v2058_v34 = vrot.slane %v13488_v24, 7  ;;  %v13496_v24 = vshrl.u32 %v11708_v62, 16 }
 0x1d5   : > { %9766 = vmatmul.mubr.bf16.gmra.mrb[20].mxu1 %v2014_v55  ;;  %v2076_v55 = vshrl.u32 %v1953_v4, 16  ;;  %v12086_v4 = vor.u32 %v13499_v35, %v2118_v12 }
 0x1d6   : > { %9769 = vmatprep.mubr.bf16.mxu1 %v2026_v26  ;;  %9798 = vmatpush3.bf16.msra.mxu1 %v11060_v59  ;;  %v12044_v59 = vor.u32 %v13490_v6, %v2058_v34  ;;  %v2088_v26 = vshrl.u32 %v1955_v56, 16  ;;  %v2106_v34 = vrot.slane %v13496_v24, 7  ;;  %v1961_v56 = vld [vmem:[#allocation2 + $0x150] sm:$0x80]  ;;  %v13503_v24 = vshrl.u32 %v11751_v50, 16 }
 0x1d7   : > { %9799 = vmatprep.subr.bf16.mxu1 %v11061_v2 }
 0x1d8   : > { %v2090_v21 = vrot.slane %v2088_v26, 7 }
 0x1da   : > { %9800 = vmatpush3.bf16.msra.mxu1 %v11061_v2  ;;  %v2062_v2 = vsel %vm776_vm0, %v2054_v31, %v12044_v59  ;;  %v13498_v31 = vshll.u32 %v11708_v62, 16 }
 0x1db   : > { %9801 = vmatprep.subr.bf16.mxu1 %v11062_v33 }
 0x1dc   : > { %v12082_v6 = vor.u32 %v13498_v31, %v2106_v34  ;;  %v2154_v34 = vrot.slane %v13503_v24, 7  ;;  %v11068_v31 = vld [vmem:[%s13342_s2 + $0x150] sm:$0xff]   ;;  %v13509_v24 = vld [vmem:[#allocation9_spill] sm:$0xff] }
 0x1dd   : > { %9770 = vmatmul.mubr.bf16.gmra.mrb[24].mxu1 %v2038_v19 }
 0x1de   : > { %9773 = vmatprep.mubr.bf16.mxu1 %v2050_v27  ;;  %9802 = vmatpush3.bf16.msra.mxu1 %v11062_v33  ;;  %v2078_v33 = vrot.slane %v2076_v55, 7  ;;  %v2098_v27 = vsel %vm776_vm0, %v2090_v21, %v12070_v3  ;;  %v2124_v55 = vshrl.u32 %v1961_v56, 16  ;;  %v13505_v56 = vld [vmem:[#allocation5_spill] sm:$0xff] }
 0x1df   : > { %9803 = vmatprep.subr.bf16.mxu1 %v11063_v1 }
 0x1e0   : > { %v2086_v19 = vsel %vm776_vm0, %v2078_v33, %v12066_v16  ;;  %v2126_v63 = vrot.slane %v2124_v55, 7  ;;  %v13501_v33 = vshll.u32 %v11728_v46, 16 }
 0x1e2   : > { %9804 = vmatpush3.bf16.msra.mxu1 %v11063_v1  ;;  %v1959_v1 = vld [vmem:[#allocation2 + $0x138] sm:$0x80]  ;;  %v12098_v17 = vor.u32 %v13501_v33, %v2130_v11  ;;  %v13507_v11 = vld [vmem:[#allocation7_spill] sm:$0xff]  ;;  %v2702_v33 = vld [vmem:[#allocation2 + $0xa0] sm:$0x1] }
 0x1e3   : > { %9805 = vmatprep.subr.bf16.mxu1 %v11064_v58  ;;  %v2112_v47 = vshrl.u32 %v1959_v1, 16  ;;  %v1965_v1 = vld [vmem:[#allocation2 + $0x180] sm:$0x80] }
 0x1e5   : > { %9774 = vmatmul.mubr.bf16.gmra.mrb[28].mxu1 %v2062_v2  ;;  %v2114_v8 = vrot.slane %v2112_v47, 7  ;;  %v13504_v47 = vshll.u32 %v11751_v50, 16 }
 0x1e6   : > { %9777 = vmatprep.mubr.bf16.mxu1 %v2074_v22  ;;  %9806 = vmatpush3.bf16.msra.mxu1 %v11064_v58  ;;  %v2102_v58 = vrot.slane %v2100_v30, 7  ;;  %v2148_v30 = vshrl.u32 %v1965_v1, 16  ;;  %v13508_v1 = vld [vmem:[#allocation8_spill] sm:$0xff] }
 0x1e7   : > { %9807 = vmatprep.subr.bf16.mxu1 %v11065_v14  ;;  %v2122_v22 = vsel %vm776_vm0, %v2114_v8, %v12086_v4  ;;  %v12112_v7 = vor.u32 %v13504_v47, %v2154_v34  ;;  %v2696_v8 = vld [vmem:[#allocation2 + $0x58] sm:$0x1] }
 0x1e8   : > { %v2110_v2 = vsel %vm776_vm0, %v2102_v58, %v12082_v6  ;;  %v11067_v58 = vld [vmem:[%s13342_s2 + $0x148] sm:$0xff]  }
 0x1ea   : > { %9808 = vmatpush3.bf16.msra.mxu1 %v11065_v14  ;;  %v1963_v14 = vld [vmem:[#allocation2 + $0x168] sm:$0x80] }
 0x1eb   : > { %9841 = vmatprep.subr.bf16.mxu1 %v11066_v52  ;;  %v2136_v26 = vshrl.u32 %v1963_v14, 16 }
 0x1ed   : > { %9778 = vmatmul.mubr.bf16.gmra.mrb[32].mxu1 %v2086_v19  ;;  %v2138_v21 = vrot.slane %v2136_v26, 7  ;;  %v2134_v19 = vsel %vm776_vm0, %v2126_v63, %v12098_v17  ;;  %v11076_v26 = vld [vmem:[%s13342_s2 + $0x190] sm:$0xff]  }
 0x1ee   : > { %9781 = vmatprep.mubr.bf16.mxu1 %v2098_v27  ;;  %v2150_v27 = vrot.slane %v2148_v30, 7  ;;  %v2791_v30 = vshll.u32 %v2702_v33, 16 }
 0x1ef   : > { %v2146_v20 = vsel %vm776_vm0, %v2138_v21, %v12102_v25  ;;  %v2704_v21 = vld [vmem:[#allocation2 + $0xb8] sm:$0x1] }
 0x1f0   : > { %v2158_v12 = vsel %vm776_vm0, %v2150_v27, %v12112_v7  ;;  %v11078_v27 = vld [vmem:[%s13342_s2 + $0x1a0] sm:$0xff]   ;;  %v2793_v47 = vrot.slane %v2791_v30, 1 }
 0x1f5   : > { %9782 = vmatmul.mubr.bf16.gmra.mrb[36].mxu1 %v2110_v2  ;;  %v2700_v2 = vld [vmem:[#allocation2 + $0x88] sm:$0x1] }
 0x1f6   : > { %9785 = vmatprep.mubr.bf16.mxu1 %v2122_v22  ;;  %v2779_v22 = vshll.u32 %v2700_v2, 16 }
 0x1f8   : > { %v2781_v63 = vrot.slane %v2779_v22, 1 }
 0x1fa   : > { %v2782_v34 = vsel %vm1468_vm1, %v13509_v24, %v2781_v63  ;;  %v13512_v63 = vld [vmem:[#allocation12_spill] sm:$0xff]  ;;  %v2722_v24 = vld [vmem:[#allocation2 + $0x190] sm:$0x1] }
 0x1fd   : > { %9786 = vmatmul.mubr.bf16.gmra.mrb[40].mxu1 %v2134_v19 }
 0x1fe   : > { %9789 = vmatprep.mubr.bf16.mxu1 %v2146_v20  ;;  %v2803_v20 = vshll.u32 %v2704_v21, 16 }
 0x205   : > { %9790 = vmatmul.mubr.bf16.gmra.mrb[44].mxu1 %v2158_v12  ;;  %v2805_v12 = vrot.slane %v2803_v20, 1 }
 0x206   : > { %9809 = vmatprep.mubr.bf16.mxu1 %v11639_v5  ;;  %v11069_v5 = vld [vmem:[%s13342_s2 + $0x158] sm:$0xff]  }
 0x20d   : > { %9810 = vmatmul.mubr.bf16.vlgmr.msra.gmra.mrb[16].mxu1 %v11641_v61  ;;  %v11070_v61 = vld [vmem:[%s13342_s2 + $0x160] sm:$0xff]  }
 0x20e   : > { %9842 = vmatpush3.bf16.msra.mxu1 %v11066_v52  ;;  %9813 = vmatprep.mubr.bf16.mxu1 %v11647_v28  ;;  %v11071_v28 = vld [vmem:[%s13342_s2 + $0x168] sm:$0xff]   ;;  %v2694_v52 = vld [vmem:[#allocation2 + $0x40] sm:$0x1] }
 0x20f   : > { %9843 = vmatprep.subr.bf16.mxu1 %v11067_v58  ;;  %v2743_v35 = vshll.u32 %v2694_v52, 16 }
 0x212   : > { %9844 = vmatpush3.bf16.msra.mxu1 %v11067_v58  ;;  %v2706_v58 = vld [vmem:[#allocation2 + $0xd0] sm:$0x1] }
 0x213   : > { %9845 = vmatprep.subr.bf16.mxu1 %v11068_v31 }
 0x215   : > { %9814 = vmatmul.mubr.bf16.gmra.mrb[20].mxu1 %v11659_v45  ;;  %v11072_v45 = vld [vmem:[%s13342_s2 + $0x170] sm:$0xff]  }
 0x216   : > { %9817 = vmatprep.mubr.bf16.mxu1 %v13479_v40  ;;  %9846 = vmatpush3.bf16.msra.mxu1 %v11068_v31  ;;  %v11073_v40 = vld [vmem:[%s13342_s2 + $0x178] sm:$0xff]   ;;  %v2708_v31 = vld [vmem:[#allocation2 + $0xe8] sm:$0x1] }
 0x217   : > { %9847 = vmatprep.subr.bf16.mxu1 %v11069_v5 }
 0x21a   : > { %9848 = vmatpush3.bf16.msra.mxu1 %v11069_v5  ;;  %v11079_v5 = vld [vmem:[%s13342_s2 + $0x1a8] sm:$0xff]  }
 0x21b   : > { %9849 = vmatprep.subr.bf16.mxu1 %v11070_v61 }
 0x21d   : > { %9818 = vmatmul.mubr.bf16.gmra.mrb[24].mxu1 %v11670_v9  ;;  %v11074_v9 = vld [vmem:[%s13342_s2 + $0x180] sm:$0xff]  }
 0x21e   : > { %9821 = vmatprep.mubr.bf16.mxu1 %v13484_v38  ;;  %9850 = vmatpush3.bf16.msra.mxu1 %v11070_v61  ;;  %v2692_v38 = vld [vmem:[#allocation2 + $0x28] sm:$0x1] }
 0x21f   : > { %9851 = vmatprep.subr.bf16.mxu1 %v11071_v28  ;;  %v13510_v61 = vld [vmem:[#allocation10_spill] sm:$0xff] }
 0x222   : > { %9852 = vmatpush3.bf16.msra.mxu1 %v11071_v28  ;;  %v2794_v28 = vsel %vm1468_vm1, %v13510_v61, %v2793_v47  ;;  %v3194_v61 = vld [vmem:[#allocation2 + $0x60] sm:$0x80] }
 0x223   : > { %9853 = vmatprep.subr.bf16.mxu1 %v11072_v45 }
 0x225   : > { %9822 = vmatmul.mubr.bf16.gmra.mrb[28].mxu1 %v11680_v23  ;;  %v2731_v23 = vshll.u32 %v2692_v38, 16  ;;  %v2827_v38 = vshll.u32 %v2708_v31, 16 }
 0x226   : > { %9825 = vmatprep.mubr.bf16.mxu1 %v11686_v43  ;;  %9854 = vmatpush3.bf16.msra.mxu1 %v11072_v45  ;;  %v2815_v45 = vshll.u32 %v2706_v58, 16 }
 0x227   : > { %9855 = vmatprep.subr.bf16.mxu1 %v11073_v40  ;;  %v2733_v43 = vrot.slane %v2731_v23, 1  ;;  %v11080_v23 = vld [vmem:[%s13342_s2 + $0x1b0] sm:$0xff]   ;;  %v2829_v52 = vrot.slane %v2827_v38, 1 }
 0x22a   : > { %9856 = vmatpush3.bf16.msra.mxu1 %v11073_v40  ;;  %v13511_v40 = vld [vmem:[#allocation11_spill] sm:$0xff] }
 0x22b   : > { %9889 = vmatprep.subr.bf16.mxu1 %v11074_v9 }
 0x22d   : > { %9826 = vmatmul.mubr.bf16.gmra.mrb[32].mxu1 %v11692_v57  ;;  %v2734_v57 = vsel %vm1468_vm1, %v13505_v56, %v2733_v43  ;;  %v2817_v43 = vrot.slane %v2815_v45, 1  ;;  %v11081_v56 = vld [vmem:[%s13342_s2 + $0x1b8] sm:$0xff]  }
 0x22e   : > { %9829 = vmatprep.mubr.bf16.mxu1 %v11699_v48  ;;  %v2755_v48 = vshll.u32 %v2696_v8, 16  ;;  %v2710_v8 = vld [vmem:[#allocation2 + $0x100] sm:$0x1] }
 0x230   : > { %v2757_v14 = vrot.slane %v2755_v48, 1  ;;  %v2839_v48 = vshll.u32 %v2710_v8, 16 }
 0x232   : > { %v2841_v2 = vrot.slane %v2839_v48, 1 }
 0x235   : > { %9830 = vmatmul.mubr.bf16.gmra.mrb[36].mxu1 %v11708_v62  ;;  %v2745_v62 = vrot.slane %v2743_v35, 1  ;;  %v2712_v35 = vld [vmem:[#allocation2 + $0x118] sm:$0x1] }
 0x236   : > { %9833 = vmatprep.mubr.bf16.mxu1 %v11713_v44  ;;  %v2698_v44 = vld [vmem:[#allocation2 + $0x70] sm:$0x1] }
 0x237   : > { %v2767_v32 = vshll.u32 %v2698_v44, 16  ;;  %v11082_v44 = vld [vmem:[%s13342_s2 + $0x1c0] sm:$0xff]  }
 0x239   : > { %v2769_v53 = vrot.slane %v2767_v32, 1 }
 0x23b   : > { %v2770_v19 = vsel %vm1468_vm1, %v13508_v1, %v2769_v53  ;;  %v2720_v53 = vld [vmem:[#allocation2 + $0x178] sm:$0x1] }
 0x23d   : > { %9834 = vmatmul.mubr.bf16.gmra.mrb[40].mxu1 %v11728_v46  ;;  %v11075_v46 = vld [vmem:[%s13342_s2 + $0x188] sm:$0xff]  }
 0x23e   : > { %9837 = vmatprep.mubr.bf16.mxu1 %v11741_v10  ;;  %v13506_v10 = vld [vmem:[#allocation6_spill] sm:$0xff] }
 0x23f   : > { %v2746_v55 = vsel %vm1468_vm1, %v13506_v10, %v2745_v62  ;;  %v2830_v62 = vsel %vm1468_vm1, %v11787_v39, %v2829_v52  ;;  %v2714_v10 = vld [vmem:[#allocation2 + $0x130] sm:$0x1]  ;;  %v11083_v52 = vld [vmem:[%s13342_s2 + $0x1c8] sm:$0xff]  }
 0x240   : > { %v2863_v32 = vshll.u32 %v2714_v10, 16  ;;  %v11086_v10 = vld [vmem:[%s13342_s2 + $0x1e0] sm:$0xff]  }
 0x245   : > { %9838 = vmatmul.mubr.bf16.gmra.mrb[44].mxu1 %v11751_v50  ;;  %v2758_v50 = vsel %vm1468_vm1, %v13507_v11, %v2757_v14  ;;  %v2851_v14 = vshll.u32 %v2712_v35, 16 }
 0x246   : > { %9857 = vmatprep.mubr.bf16.mxu1 %v2734_v57  ;;  %v2818_v57 = vsel %vm1468_vm1, %v11783_v49, %v2817_v43  ;;  %v2842_v49 = vsel %vm1468_vm1, %v11794_v37, %v2841_v2  ;;  %v2899_v37 = vshll.u32 %v2720_v53, 16  ;;  %v3196_v43 = vld [vmem:[#allocation2 + $0x78] sm:$0x80] }
 0x247   : > { %v3259_v35 = vshrl.u32 %v3196_v43, 16 }
 0x248   : > { %v2901_v30 = vrot.slane %v2899_v37, 1 }
 0x24a   : > { %v2902_v47 = vsel %vm1468_vm1, %v11837_v42, %v2901_v30  ;;  %v3198_v42 = vld [vmem:[#allocation2 + $0x90] sm:$0x80] }
 0x24d   : > { %9858 = vmatmul.mubr.bf16.vlgmr.msra.gmra.mrb[16].mxu1 %v2746_v55  ;;  %v2716_v55 = vld [vmem:[#allocation2 + $0x148] sm:$0x1] }
 0x24e   : > { %9890 = vmatpush3.bf16.msra.mxu1 %v11074_v9  ;;  %9861 = vmatprep.mubr.bf16.mxu1 %v2758_v50  ;;  %v2806_v9 = vsel %vm1468_vm1, %v13511_v40, %v2805_v12  ;;  %v2875_v11 = vshll.u32 %v2716_v55, 16  ;;  %v2865_v50 = vrot.slane %v2863_v32, 1  ;;  %v3204_v32 = vld [vmem:[#allocation2 + $0xd8] sm:$0x80] }
 0x24f   : > { %9891 = vmatprep.subr.bf16.mxu1 %v11075_v46 }
 0x250   : > { %v2877_v22 = vrot.slane %v2875_v11, 1  ;;  %v2866_v33 = vsel %vm1468_vm1, %v13512_v63, %v2865_v50  ;;  %v3307_v11 = vshrl.u32 %v3204_v32, 16  ;;  %v11097_v32 = vld [vmem:[%s13342_s2 + $0x238] sm:$0xff]  }
 0x252   : > { %9892 = vmatpush3.bf16.msra.mxu1 %v11075_v46  ;;  %v2853_v46 = vrot.slane %v2851_v14, 1  ;;  %v3202_v14 = vld [vmem:[#allocation2 + $0xc0] sm:$0x80]  ;;  %v3309_v53 = vrot.slane %v3307_v11, 7  ;;  %v11181_v11 = vld [vmem:[#allocation2 + $0x128] sm:$0xff] }
 0x253   : > { %9893 = vmatprep.subr.bf16.mxu1 %v11076_v26 }
 0x254   : > { %v2854_v39 = vsel %vm1468_vm1, %v11798_v54, %v2853_v46  ;;  %v3190_v54 = vld [vmem:[#allocation2 + $0x30] sm:$0x80]  ;;  %v3295_v46 = vshrl.u32 %v3202_v14, 16 }
 0x255   : > { %9862 = vmatmul.mubr.bf16.gmra.mrb[20].mxu1 %v2770_v19  ;;  %v3223_v12 = vshrl.u32 %v3190_v54, 16  ;;  %v3212_v54 = vld [vmem:[#allocation2 + $0x138] sm:$0x80]  ;;  %v11092_v14 = vld [vmem:[%s13342_s2 + $0x210] sm:$0xff]  }
 0x256   : > { %9865 = vmatprep.mubr.bf16.mxu1 %v2782_v34  ;;  %9894 = vmatpush3.bf16.msra.mxu1 %v11076_v26  ;;  %v2718_v26 = vld [vmem:[#allocation2 + $0x160] sm:$0x1]  ;;  %v13514_v34 = vld [vmem:[#allocation14_spill] sm:$0xff] }
 0x257   : > { %9895 = vmatprep.subr.bf16.mxu1 %v11077_v41  ;;  %v2887_v21 = vshll.u32 %v2718_v26, 16  ;;  %v3225_v31 = vrot.slane %v3223_v12, 7  ;;  %v11088_v26 = vld [vmem:[%s13342_s2 + $0x1f0] sm:$0xff]  }
 0x259   : > { %v2889_v19 = vrot.slane %v2887_v21, 1  ;;  %v3233_v40 = vsel %vm776_vm0, %v3225_v31, %v11978_v0  ;;  %v11084_v0 = vld [vmem:[%s13342_s2 + $0x1d0] sm:$0xff]   ;;  %v3210_v21 = vld [vmem:[#allocation2 + $0x120] sm:$0x80] }
 0x25a   : > { %9896 = vmatpush3.bf16.msra.mxu1 %v11077_v41  ;;  %v13513_v41 = vld [vmem:[#allocation13_spill] sm:$0xff]  ;;  %v3343_v37 = vshrl.u32 %v3210_v21, 16 }
 0x25b   : > { %9897 = vmatprep.subr.bf16.mxu1 %v11078_v27  ;;  %v2878_v1 = vsel %vm1468_vm1, %v13513_v41, %v2877_v22  ;;  %v2890_v20 = vsel %vm1468_vm1, %v13514_v34, %v2889_v19  ;;  %v11090_v19 = vld [vmem:[%s13342_s2 + $0x200] sm:$0xff]   ;;  %v3214_v34 = vld [vmem:[#allocation2 + $0x150] sm:$0x80] }
 0x25c   : > { %v3218_v31 = vld [vmem:[#allocation2 + $0x180] sm:$0x80] }
 0x25d   : > { %9866 = vmatmul.mubr.bf16.gmra.mrb[24].mxu1 %v2794_v28 }
 0x25e   : > { %9869 = vmatprep.mubr.bf16.mxu1 %v2806_v9  ;;  %9898 = vmatpush3.bf16.msra.mxu1 %v11078_v27  ;;  %v2911_v27 = vshll.u32 %v2722_v24, 16  ;;  %v3247_v9 = vshrl.u32 %v3194_v61, 16  ;;  %v3345_v24 = vrot.slane %v3343_v37, 7 }
 0x25f   : > { %9899 = vmatprep.subr.bf16.mxu1 %v11079_v5 }
 0x260   : > { %v2913_v58 = vrot.slane %v2911_v27, 1  ;;  %v3367_v27 = vshrl.u32 %v3214_v34, 16 }
 0x262   : > { %9900 = vmatpush3.bf16.msra.mxu1 %v11079_v5  ;;  %v3192_v5 = vld [vmem:[#allocation2 + $0x48] sm:$0x80]  ;;  %v2914_v28 = vsel %vm1468_vm1, %v11846_v51, %v2913_v58  ;;  %v3369_v12 = vrot.slane %v3367_v27, 7 }
 0x263   : > { %9901 = vmatprep.subr.bf16.mxu1 %v11080_v23  ;;  %v3235_v45 = vshrl.u32 %v3192_v5, 16  ;;  %v3216_v58 = vld [vmem:[#allocation2 + $0x168] sm:$0x80] }
 0x264   : > { %v3379_v61 = vshrl.u32 %v3216_v58, 16  ;;  %v3952_v58 = vld [vmem:[#allocation2 + $0x80] sm:$0xff] }
 0x265   : > { %9870 = vmatmul.mubr.bf16.gmra.mrb[28].mxu1 %v2818_v57  ;;  %v3237_v38 = vrot.slane %v3235_v45, 7  ;;  %v3261_v57 = vrot.slane %v3259_v35, 7  ;;  %v12262_v45 = vld [vmem:[#allocation2 + $0x8] sm:$0xff] }
 0x266   : > { %9873 = vmatprep.mubr.bf16.mxu1 %v2830_v62  ;;  %9902 = vmatpush3.bf16.msra.mxu1 %v11080_v23  ;;  %v3249_v23 = vrot.slane %v3247_v9, 7  ;;  %v3200_v62 = vld [vmem:[#allocation2 + $0xa8] sm:$0x80]  ;;  %v3381_v9 = vrot.slane %v3379_v61, 7 }
 0x267   : > { %9903 = vmatprep.subr.bf16.mxu1 %v11081_v56  ;;  %v3245_v8 = vsel %vm776_vm0, %v3237_v38, %v11982_v60  ;;  %v11085_v60 = vld [vmem:[%s13342_s2 + $0x1d8] sm:$0xff]  }
 0x268   : > { %v3257_v51 = vsel %vm776_vm0, %v3249_v23, %v12000_v15  ;;  %v3269_v15 = vsel %vm776_vm0, %v3261_v57, %v12004_v13  ;;  %v11087_v13 = vld [vmem:[%s13342_s2 + $0x1e8] sm:$0xff]   ;;  %v11172_v57 = vld [vmem:[#allocation2 + $0x50] sm:$0xff] }
 0x26a   : > { %9904 = vmatpush3.bf16.msra.mxu1 %v11081_v56  ;;  %v3271_v56 = vshrl.u32 %v3198_v42, 16  ;;  %v3389_v42 = vsel %vm776_vm0, %v3381_v9, %v12102_v25  ;;  %v11099_v25 = vld [vmem:[%s13343_s3 + $0x48] sm:$0xff]  }
 0x26b   : > { %9937 = vmatprep.subr.bf16.mxu1 %v11082_v44 }
 0x26c   : > { %v3273_v48 = vrot.slane %v3271_v56, 7  ;;  %v11171_v56 = vld [vmem:[#allocation2 + $0x38] sm:$0xff] }
 0x26d   : > { %9874 = vmatmul.mubr.bf16.gmra.mrb[32].mxu1 %v2842_v49  ;;  %v3297_v49 = vrot.slane %v3295_v46, 7  ;;  %v11095_v46 = vld [vmem:[%s13342_s2 + $0x228] sm:$0xff]  }
 0x26e   : > { %9877 = vmatprep.mubr.bf16.mxu1 %v2854_v39  ;;  %v3281_v2 = vsel %vm776_vm0, %v3273_v48, %v12022_v18  ;;  %v3206_v39 = vld [vmem:[#allocation2 + $0xf0] sm:$0x80]  ;;  %v11101_v48 = vld [vmem:[%s13343_s3 + $0x58] sm:$0xff]  }
 0x26f   : > { %v3305_v50 = vsel %vm776_vm0, %v3297_v49, %v12044_v59  ;;  %v3319_v22 = vshrl.u32 %v3206_v39, 16  ;;  %v3317_v59 = vsel %vm776_vm0, %v3309_v53, %v12048_v29  ;;  %v11096_v49 = vld [vmem:[%s13342_s2 + $0x230] sm:$0xff]   ;;  %v11178_v39 = vld [vmem:[#allocation2 + $0xe0] sm:$0xff] }
 0x271   : > { %v3321_v63 = vrot.slane %v3319_v22, 7  ;;  %v11183_v22 = vld [vmem:[#allocation2 + $0x158] sm:$0xff] }
 0x275   : > { %9878 = vmatmul.mubr.bf16.gmra.mrb[36].mxu1 %v2866_v33  ;;  %v3208_v33 = vld [vmem:[#allocation2 + $0x108] sm:$0x80] }
 0x276   : > { %9881 = vmatprep.mubr.bf16.mxu1 %v2878_v1  ;;  %v3331_v41 = vshrl.u32 %v3208_v33, 16  ;;  %v3329_v1 = vsel %vm776_vm0, %v3321_v63, %v12066_v16  ;;  %v3353_v16 = vsel %vm776_vm0, %v3345_v24, %v12082_v6  ;;  %v3407_v6 = vshrl.u32 %v12262_v45, 16  ;;  %v3947_v63 = vld [vmem:[#allocation2 + $0x40] sm:$0x1]  ;;  %v11184_v33 = vld [vmem:[#allocation2 + $0x170] sm:$0xff] }
 0x278   : > { %v3333_v30 = vrot.slane %v3331_v41, 7  ;;  %v3409_v43 = vrot.slane %v3407_v6, 7  ;;  %v11185_v41 = vld [vmem:[#allocation2 + $0x188] sm:$0xff] }
 0x27a   : > { %v3341_v29 = vsel %vm776_vm0, %v3333_v30, %v12070_v3  ;;  %v3391_v3 = vshrl.u32 %v3218_v31, 16 }
 0x27c   : > { %v3393_v38 = vrot.slane %v3391_v3, 7 }
 0x27d   : > { %9882 = vmatmul.mubr.bf16.gmra.mrb[40].mxu1 %v2890_v20  ;;  %v3355_v20 = vshrl.u32 %v3212_v54, 16  ;;  %v3949_v54 = vld [vmem:[#allocation2 + $0x58] sm:$0x1] }
 0x27e   : > { %9885 = vmatprep.mubr.bf16.mxu1 %v2902_v47 }
 0x27f   : > { %v3357_v47 = vrot.slane %v3355_v20, 7 }
 0x281   : > { %v3365_v5 = vsel %vm776_vm0, %v3357_v47, %v12086_v4  ;;  %v3410_v4 = vshll.u32 %v12262_v45, 16 }
 0x285   : > { %9886 = vmatmul.mubr.bf16.gmra.mrb[44].mxu1 %v2914_v28  ;;  %v3377_v28 = vsel %vm776_vm0, %v3369_v12, %v12098_v17  ;;  %v3401_v17 = vsel %vm776_vm0, %v3393_v38, %v12112_v7  ;;  %v11100_v7 = vld [vmem:[%s13343_s3 + $0x50] sm:$0xff]  }
 0x286   : > { %9905 = vmatprep.mubr.bf16.mxu1 %v3233_v40  ;;  %v3220_v40 = vld [vmem:[#allocation2 + $0x198] sm:$0x80] }
 0x287   : > { %v3403_v23 = vshrl.u32 %v3220_v40, 16  ;;  %v4017_v40 = vshll.u32 %v3952_v58, 16 }
 0x28d   : > { %9906 = vmatmul.mubr.bf16.vlgmr.msra.gmra.mrb[16].mxu1 %v3245_v8  ;;  %v12274_v8 = vor.u32 %v3410_v4, %v3409_v43 }
 0x28e   : > { %9938 = vmatpush3.bf16.msra.mxu1 %v11082_v44  ;;  %9909 = vmatprep.mubr.bf16.mxu1 %v3257_v51  ;;  %v3283_v44 = vshrl.u32 %v3200_v62, 16  ;;  %v11098_v51 = vld [vmem:[%s13343_s3 + $0x40] sm:$0xff]   ;;  %v11173_v62 = vld [vmem:[#allocation2 + $0x68] sm:$0xff] }
 0x28f   : > { %9939 = vmatprep.subr.bf16.mxu1 %v11083_v52  ;;  %10033 = vmatprep.subr.bf16.mxu0 %v11098_v51 }
 0x290   : > { %v3285_v55 = vrot.slane %v3283_v44, 7  ;;  %10034 = vmatpush3.bf16.msra.mxu0 %v11098_v51  ;;  %v11175_v44 = vld [vmem:[#allocation2 + $0x98] sm:$0xff] }
 0x291   : > { %10035 = vmatprep.subr.bf16.mxu0 %v11099_v25 }
 0x292   : > { %9940 = vmatpush3.bf16.msra.mxu1 %v11083_v52  ;;  %v3293_v18 = vsel %vm776_vm0, %v3285_v55, %v12026_v36  ;;  %v11089_v36 = vld [vmem:[%s13342_s2 + $0x1f8] sm:$0xff]   ;;  %v3405_v52 = vrot.slane %v3403_v23, 7  ;;  %v11177_v55 = vld [vmem:[#allocation2 + $0xc8] sm:$0xff] }
 0x293   : > { %9941 = vmatprep.subr.bf16.mxu1 %v11084_v0  ;;  %v3953_v23 = vld [vmem:[#allocation2 + $0x88] sm:$0x1] }
 0x294   : > { %v3413_v35 = vsel %vm776_vm0, %v3405_v52, %v12274_v8  ;;  %10036 = vmatpush3.bf16.msra.mxu0 %v11099_v25  ;;  %v4019_v52 = vrot.slane %v4017_v40, 1 }
 0x295   : > { %9910 = vmatmul.mubr.bf16.gmra.mrb[20].mxu1 %v3269_v15  ;;  %10037 = vmatprep.subr.bf16.mxu0 %v11100_v7  ;;  %v11174_v15 = vld [vmem:[#allocation2 + $0x80] sm:$0xff] }
 0x296   : > { %9913 = vmatprep.mubr.bf16.mxu1 %v3281_v2  ;;  %9942 = vmatpush3.bf16.msra.mxu1 %v11084_v0  ;;  %v11091_v0 = vld [vmem:[%s13342_s2 + $0x208] sm:$0xff]   ;;  %v11094_v2 = vld [vmem:[%s13342_s2 + $0x220] sm:$0xff]  }
 0x297   : > { %9943 = vmatprep.subr.bf16.mxu1 %v11085_v60 }
 0x298   : > { %10038 = vmatpush3.bf16.msra.mxu0 %v11100_v7  ;;  %v3956_v7 = vld [vmem:[#allocation2 + $0xb0] sm:$0xff] }
 0x299   : > { %10039 = vmatprep.subr.bf16.mxu0 %v11101_v48 }
 0x29a   : > { %9944 = vmatpush3.bf16.msra.mxu1 %v11085_v60  ;;  %v11093_v60 = vld [vmem:[%s13342_s2 + $0x218] sm:$0xff]  }
 0x29b   : > { %9945 = vmatprep.subr.bf16.mxu1 %v11086_v10 }
 0x29c   : > { %10040 = vmatpush3.bf16.msra.mxu0 %v11101_v48 }
 0x29d   : > { %9914 = vmatmul.mubr.bf16.gmra.mrb[24].mxu1 %v3293_v18  ;;  %v11180_v18 = vld [vmem:[#allocation2 + $0x110] sm:$0xff] }
 0x29e   : > { %9917 = vmatprep.mubr.bf16.mxu1 %v3305_v50  ;;  %9946 = vmatpush3.bf16.msra.mxu1 %v11086_v10  ;;  %v11176_v10 = vld [vmem:[#allocation2 + $0xb0] sm:$0xff]  ;;  %v11182_v50 = vld [vmem:[#allocation2 + $0x140] sm:$0xff] }
 0x29f   : > { %9947 = vmatprep.subr.bf16.mxu1 %v11087_v13 }
 0x2a2   : > { %9948 = vmatpush3.bf16.msra.mxu1 %v11087_v13  ;;  %v11179_v13 = vld [vmem:[#allocation2 + $0xf8] sm:$0xff] }
 0x2a3   : > { %9949 = vmatprep.subr.bf16.mxu1 %v11088_v26 }
 0x2a5   : > { %9918 = vmatmul.mubr.bf16.gmra.mrb[28].mxu1 %v3317_v59  ;;  %v3948_v59 = vld [vmem:[#allocation2 + $0x50] sm:$0xff] }
 0x2a6   : > { %9921 = vmatprep.mubr.bf16.mxu1 %v3329_v1  ;;  %9950 = vmatpush3.bf16.msra.mxu1 %v11088_v26  ;;  %v3946_v26 = vld [vmem:[#allocation2 + $0x38] sm:$0xff]  ;;  %v3950_v1 = vld [vmem:[#allocation2 + $0x68] sm:$0xff]  ;;  %v3991_v31 = vshrl.u32 %v3948_v59, 16 }
 0x2a7   : > { %9951 = vmatprep.subr.bf16.mxu1 %v11089_v36  ;;  %v3981_v53 = vshll.u32 %v3946_v26, 16  ;;  %v3979_v37 = vshrl.u32 %v3946_v26, 16  ;;  %v4005_v34 = vshll.u32 %v3950_v1, 16  ;;  %v4003_v61 = vshrl.u32 %v3950_v1, 16  ;;  %v3963_v1 = vld [vmem:[#allocation2 + $0x100] sm:$0x1] }
 0x2a9   : > { %v3983_v21 = vrot.slane %v3981_v53, 1  ;;  %v4007_v47 = vrot.slane %v4005_v34, 1 }
 0x2aa   : > { %9952 = vmatpush3.bf16.msra.mxu1 %v11089_v36  ;;  %v3986_v36 = vshll.u32 %v3947_v63, 16 }
 0x2ab   : > { %9985 = vmatprep.subr.bf16.mxu1 %v11090_v19  ;;  %v3984_v30 = vor.u32 %v3983_v21, %v3979_v37  ;;  %v4008_v9 = vor.u32 %v4007_v47, %v4003_v61  ;;  %v3965_v61 = vld [vmem:[#allocation2 + $0x118] sm:$0x1] }
 0x2ac   : > { %v3988_v24 = vrot.slane %v3986_v36, 1 }
 0x2ad   : > { %9922 = vmatmul.mubr.bf16.gmra.mrb[32].mxu1 %v3341_v29  ;;  %v3951_v29 = vld [vmem:[#allocation2 + $0x70] sm:$0x1] }
 0x2ae   : > { %9925 = vmatprep.mubr.bf16.mxu1 %v3353_v16  ;;  %v3998_v16 = vshll.u32 %v3949_v54, 16  ;;  %v3989_v27 = vsel %vm1468_vm1, %v3984_v30, %v3988_v24  ;;  %v4010_v12 = vshll.u32 %v3951_v29, 16 }
 0x2b0   : > { %v4000_v3 = vrot.slane %v3998_v16, 1  ;;  %v4012_v38 = vrot.slane %v4010_v12, 1  ;;  %v3964_v16 = vld [vmem:[#allocation2 + $0x110] sm:$0xff] }
 0x2b2   : > { %v4013_v51 = vsel %vm1468_vm1, %v4008_v9, %v4012_v38  ;;  %v4087_v9 = vshrl.u32 %v3964_v16, 16 }
 0x2b5   : > { %9926 = vmatmul.mubr.bf16.gmra.mrb[36].mxu1 %v3365_v5  ;;  %v3954_v5 = vld [vmem:[#allocation2 + $0x98] sm:$0xff] }
 0x2b6   : > { %9929 = vmatprep.mubr.bf16.mxu1 %v3377_v28  ;;  %v4029_v43 = vshll.u32 %v3954_v5, 16  ;;  %v4027_v48 = vshrl.u32 %v3954_v5, 16 }
 0x2b8   : > { %v4031_v25 = vrot.slane %v4029_v43, 1 }
 0x2bd   : > { %9930 = vmatmul.mubr.bf16.gmra.mrb[40].mxu1 %v3389_v42  ;;  %v3955_v42 = vld [vmem:[#allocation2 + $0xa0] sm:$0x1] }
 0x2be   : > { %9933 = vmatprep.mubr.bf16.mxu1 %v3401_v17 }
 0x2c5   : > { %9934 = vmatmul.mubr.bf16.gmra.mrb[44].mxu1 %v3413_v35  ;;  %v4022_v35 = vshll.u32 %v3953_v23, 16  ;;  %v4094_v23 = vshll.u32 %v3965_v61, 16  ;;  %v11106_v61 = vld [vmem:[%s13343_s3] sm:$0xff]  }
 0x2c6   : > { %9953 = vmatprep.mubr.bf16.mxu1 %v11171_v56  ;;  %v4034_v56 = vshll.u32 %v3955_v42, 16 }
 0x2cd   : > { %9954 = vmatmul.mubr.bf16.vlgmr.msra.gmra.mrb[16].mxu1 %v11172_v57  ;;  %v3958_v57 = vld [vmem:[#allocation2 + $0xc8] sm:$0xff] }
 0x2ce   : > { %9986 = vmatpush3.bf16.msra.mxu1 %v11090_v19  ;;  %9957 = vmatprep.mubr.bf16.mxu1 %v11173_v62  ;;  %v3993_v19 = vshll.u32 %v3948_v59, 16  ;;  %v4051_v26 = vshrl.u32 %v3958_v57, 16  ;;  %v3961_v59 = vld [vmem:[#allocation2 + $0xe8] sm:$0x1] }
 0x2cf   : > { %9987 = vmatprep.subr.bf16.mxu1 %v11091_v0  ;;  %v4070_v24 = vshll.u32 %v3961_v59, 16 }
 0x2d0   : > { %v3995_v20 = vrot.slane %v3993_v19, 1 }
 0x2d1   : > { %v4072_v12 = vrot.slane %v4070_v24, 1 }
 0x2d2   : > { %9988 = vmatpush3.bf16.msra.mxu1 %v11091_v0  ;;  %v3996_v28 = vor.u32 %v3995_v20, %v3991_v31  ;;  %v4015_v0 = vshrl.u32 %v3952_v58, 16  ;;  %v4082_v20 = vshll.u32 %v3963_v1, 16  ;;  %v4089_v58 = vshll.u32 %v3964_v16, 16 }
 0x2d3   : > { %9989 = vmatprep.subr.bf16.mxu1 %v11092_v14 }
 0x2d4   : > { %v4001_v17 = vsel %vm1468_vm1, %v3996_v28, %v4000_v3  ;;  %v4020_v62 = vor.u32 %v4019_v52, %v4015_v0  ;;  %v4084_v5 = vrot.slane %v4082_v20, 1  ;;  %v3967_v3 = vld [vmem:[#allocation2 + $0x130] sm:$0x1]  ;;  %v4091_v38 = vrot.slane %v4089_v58, 1 }
 0x2d5   : > { %9958 = vmatmul.mubr.bf16.gmra.mrb[20].mxu1 %v11174_v15  ;;  %v4032_v15 = vor.u32 %v4031_v25, %v4027_v48  ;;  %v4106_v52 = vshll.u32 %v3967_v3, 16  ;;  %v3969_v48 = vld [vmem:[#allocation2 + $0x148] sm:$0x1]  ;;  %v4163_v20 = vrot.slane %v3410_v4, 1 }
 0x2d6   : > { %9961 = vmatprep.mubr.bf16.mxu1 %v11175_v44  ;;  %9990 = vmatpush3.bf16.msra.mxu1 %v11092_v14  ;;  %v4024_v14 = vrot.slane %v4022_v35, 1  ;;  %v4036_v44 = vrot.slane %v4034_v56, 1  ;;  %v3968_v35 = vld [vmem:[#allocation2 + $0x140] sm:$0xff]  ;;  %v4092_v25 = vor.u32 %v4091_v38, %v4087_v9  ;;  %v4096_v56 = vrot.slane %v4094_v23, 1  ;;  %v11103_v4 = vld [vmem:[%s13343_s3 + $0x68] sm:$0xff]  }
 0x2d7   : > { %9991 = vmatprep.subr.bf16.mxu1 %v11093_v60 }
 0x2da   : > { %9992 = vmatpush3.bf16.msra.mxu1 %v11093_v60  ;;  %v4041_v60 = vshll.u32 %v3956_v7, 16 }
 0x2db   : > { %9993 = vmatprep.subr.bf16.mxu1 %v11094_v2 }
 0x2dd   : > { %9962 = vmatmul.mubr.bf16.gmra.mrb[24].mxu1 %v11176_v10  ;;  %v3959_v10 = vld [vmem:[#allocation2 + $0xd0] sm:$0x1] }
 0x2de   : > { %9965 = vmatprep.mubr.bf16.mxu1 %v11177_v55  ;;  %9994 = vmatpush3.bf16.msra.mxu1 %v11094_v2  ;;  %v3957_v2 = vld [vmem:[#allocation2 + $0xb8] sm:$0x1]  ;;  %v4025_v55 = vsel %vm1468_vm1, %v4020_v62, %v4024_v14  ;;  %v3971_v14 = vld [vmem:[#allocation2 + $0x160] sm:$0x1] }
 0x2df   : > { %9995 = vmatprep.subr.bf16.mxu1 %v11095_v46 }
 0x2e2   : > { %9996 = vmatpush3.bf16.msra.mxu1 %v11095_v46  ;;  %v4053_v46 = vshll.u32 %v3958_v57, 16  ;;  %v4108_v57 = vrot.slane %v4106_v52, 1 }
 0x2e3   : > { %9997 = vmatprep.subr.bf16.mxu1 %v11096_v49 }
 0x2e5   : > { %9966 = vmatmul.mubr.bf16.gmra.mrb[28].mxu1 %v11178_v39  ;;  %v4037_v39 = vsel %vm1468_vm1, %v4032_v15, %v4036_v44  ;;  %v4111_v15 = vshrl.u32 %v3968_v35, 16 }
 0x2e6   : > { %9969 = vmatprep.mubr.bf16.mxu1 %v11179_v13  ;;  %9998 = vmatpush3.bf16.msra.mxu1 %v11096_v49  ;;  %v4043_v49 = vrot.slane %v4041_v60, 1  ;;  %v4055_v13 = vrot.slane %v4053_v46, 1  ;;  %v4097_v60 = vsel %vm1468_vm1, %v4092_v25, %v4096_v56 }
 0x2e7   : > { %9999 = vmatprep.subr.bf16.mxu1 %v11097_v32 }
 0x2e8   : > { %v4056_v21 = vor.u32 %v4055_v13, %v4051_v26  ;;  %v3973_v26 = vld [vmem:[#allocation2 + $0x178] sm:$0x1] }
 0x2e9   : > { %v4142_v59 = vshll.u32 %v3973_v26, 16 }
 0x2ea   : > { %10000 = vmatpush3.bf16.msra.mxu1 %v11097_v32  ;;  %v4046_v32 = vshll.u32 %v3957_v2, 16  ;;  %v4118_v2 = vshll.u32 %v3969_v48, 16 }
 0x2ec   : > { %v4048_v63 = vrot.slane %v4046_v32, 1  ;;  %v3972_v32 = vld [vmem:[#allocation2 + $0x170] sm:$0xff] }
 0x2ed   : > { %9970 = vmatmul.mubr.bf16.gmra.mrb[32].mxu1 %v11180_v18  ;;  %v4058_v18 = vshll.u32 %v3959_v10, 16 }
 0x2ee   : > { %9973 = vmatprep.mubr.bf16.mxu1 %v11181_v11  ;;  %v3960_v11 = vld [vmem:[#allocation2 + $0xe0] sm:$0xff] }
 0x2ef   : > { %v4060_v36 = vrot.slane %v4058_v18, 1  ;;  %v4063_v19 = vshrl.u32 %v3960_v11, 16  ;;  %v4120_v18 = vrot.slane %v4118_v2, 1 }
 0x2f1   : > { %v4061_v54 = vsel %vm1468_vm1, %v4056_v21, %v4060_v36  ;;  %v4135_v21 = vshrl.u32 %v3972_v32, 16 }
 0x2f5   : > { %9974 = vmatmul.mubr.bf16.gmra.mrb[36].mxu1 %v11182_v50  ;;  %v4039_v50 = vshrl.u32 %v3956_v7, 16  ;;  %v4113_v7 = vshll.u32 %v3968_v35, 16 }
 0x2f6   : > { %9977 = vmatprep.mubr.bf16.mxu1 %v11183_v22  ;;  %v3962_v22 = vld [vmem:[#allocation2 + $0xf8] sm:$0xff] }
 0x2f7   : > { %v4044_v53 = vor.u32 %v4043_v49, %v4039_v50  ;;  %v4075_v34 = vshrl.u32 %v3962_v22, 16  ;;  %v4115_v44 = vrot.slane %v4113_v7, 1  ;;  %v4130_v49 = vshll.u32 %v3971_v14, 16 }
 0x2f9   : > { %v4049_v37 = vsel %vm1468_vm1, %v4044_v53, %v4048_v63  ;;  %v4116_v13 = vor.u32 %v4115_v44, %v4111_v15  ;;  %v3975_v63 = vld [vmem:[#allocation2 + $0x190] sm:$0x1] }
 0x2fd   : > { %9978 = vmatmul.mubr.bf16.gmra.mrb[40].mxu1 %v11184_v33  ;;  %v4065_v33 = vshll.u32 %v3960_v11, 16  ;;  %v4137_v11 = vshll.u32 %v3972_v32, 16 }
 0x2fe   : > { %9981 = vmatprep.mubr.bf16.mxu1 %v11185_v41  ;;  %v4077_v41 = vshll.u32 %v3962_v22, 16  ;;  %v4132_v22 = vrot.slane %v4130_v49, 1 }
 0x2ff   : > { %v4067_v30 = vrot.slane %v4065_v33, 1  ;;  %v4121_v33 = vsel %vm1468_vm1, %v4116_v13, %v4120_v18  ;;  %v4139_v36 = vrot.slane %v4137_v11, 1 }
 0x300   : > { %v4079_v29 = vrot.slane %v4077_v41, 1 }
 0x301   : > { %v4068_v47 = vor.u32 %v4067_v30, %v4063_v19  ;;  %v4154_v19 = vshll.u32 %v3975_v63, 16  ;;  %v3977_v30 = vld [vmem:[#allocation2 + $0x1a8] sm:$0x1]  ;;  %v4140_v24 = vor.u32 %v4139_v36, %v4135_v21  ;;  %v11109_v36 = vld [vmem:[%s13343_s3 + $0x18] sm:$0xff]  }
 0x302   : > { %v4080_v31 = vor.u32 %v4079_v29, %v4075_v34  ;;  %v4166_v16 = vshll.u32 %v3977_v30, 16 }
 0x303   : > { %v4073_v40 = vsel %vm1468_vm1, %v4068_v47, %v4072_v12  ;;  %v4156_v29 = vrot.slane %v4154_v19, 1  ;;  %v4164_v12 = vor.u32 %v4163_v20, %v3407_v6  ;;  %v11105_v6 = vld [vmem:[%s13343_s3 + $0x78] sm:$0xff]  }
 0x304   : > { %v4085_v43 = vsel %vm1468_vm1, %v4080_v31, %v4084_v5  ;;  %v4168_v58 = vrot.slane %v4166_v16, 1  ;;  %v11102_v5 = vld [vmem:[%s13343_s3 + $0x60] sm:$0xff]  }
 0x305   : > { %9982 = vmatmul.mubr.bf16.gmra.mrb[44].mxu1 %v12262_v45  ;;  %10041 = vmatprep.subr.bf16.mxu0 %v11102_v5  ;;  %v11104_v45 = vld [vmem:[%s13343_s3 + $0x70] sm:$0xff]  }
 0x306   : > { %10001 = vmatprep.mubr.bf16.mxu1 %v3989_v27  ;;  %v3966_v27 = vld [vmem:[#allocation2 + $0x128] sm:$0xff]  ;;  %v4169_v31 = vsel %vm1468_vm1, %v4164_v12, %v4168_v58  ;;  %10042 = vmatpush3.bf16.msra.mxu0 %v11102_v5 }
 0x307   : > { %v4101_v28 = vshll.u32 %v3966_v27, 16  ;;  %v4099_v42 = vshrl.u32 %v3966_v27, 16  ;;  %10043 = vmatprep.subr.bf16.mxu0 %v11103_v4 }
 0x30a   : > { %10044 = vmatpush3.bf16.msra.mxu0 %v11103_v4 }
 0x30b   : > { %10045 = vmatprep.subr.bf16.mxu0 %v11104_v45 }
 0x30d   : > { %10002 = vmatmul.mubr.bf16.vlgmr.msra.gmra.mrb[16].mxu1 %v4001_v17  ;;  %v4103_v17 = vrot.slane %v4101_v28, 1  ;;  %v12350_v28 = vld [vmem:[%s13345_s5] ss:$0 sm:$0xff] }
 0x30e   : > { %10005 = vmatprep.mubr.bf16.mxu1 %v4013_v51  ;;  %v3970_v51 = vld [vmem:[#allocation2 + $0x158] sm:$0xff]  ;;  %10046 = vmatpush3.bf16.msra.mxu0 %v11104_v45 }
 0x30f   : > { %v4104_v0 = vor.u32 %v4103_v17, %v4099_v42  ;;  %v4125_v62 = vshll.u32 %v3970_v51, 16  ;;  %v4123_v10 = vshrl.u32 %v3970_v51, 16  ;;  %10047 = vmatprep.subr.bf16.mxu0 %v11105_v6 }
 0x311   : > { %v4109_v46 = vsel %vm1468_vm1, %v4104_v0, %v4108_v57  ;;  %v11107_v57 = vld [vmem:[%s13343_s3 + $0x8] sm:$0xff]  }
 0x312   : > { %10048 = vmatpush3.bf16.msra.mxu0 %v11105_v6 }
 0x313   : > { %10081 = vmatprep.subr.bf16.mxu0 %v11106_v61 }
 0x315   : > { %10006 = vmatmul.mubr.bf16.gmra.mrb[20].mxu1 %v4025_v55  ;;  %v4127_v55 = vrot.slane %v4125_v62, 1 }
 0x316   : > { %10009 = vmatprep.mubr.bf16.mxu1 %v4037_v39  ;;  %v3974_v39 = vld [vmem:[#allocation2 + $0x188] sm:$0xff] }
 0x317   : > { %v4128_v50 = vor.u32 %v4127_v55, %v4123_v10  ;;  %v4149_v53 = vshll.u32 %v3974_v39, 16  ;;  %v4147_v1 = vshrl.u32 %v3974_v39, 16  ;;  %v11108_v39 = vld [vmem:[%s13343_s3 + $0x10] sm:$0xff]  }
 0x319   : > { %v4133_v41 = vsel %vm1468_vm1, %v4128_v50, %v4132_v22 }
 0x31d   : > { %10010 = vmatmul.mubr.bf16.gmra.mrb[24].mxu1 %v4049_v37  ;;  %v4151_v37 = vrot.slane %v4149_v53, 1 }
 0x31e   : > { %10013 = vmatprep.mubr.bf16.mxu1 %v4061_v54  ;;  %v4144_v54 = vrot.slane %v4142_v59, 1 }
 0x31f   : > { %v4152_v34 = vor.u32 %v4151_v37, %v4147_v1 }
 0x320   : > { %v4145_v27 = vsel %vm1468_vm1, %v4140_v24, %v4144_v54 }
 0x321   : > { %v4157_v47 = vsel %vm1468_vm1, %v4152_v34, %v4156_v29 }
 0x325   : > { %10014 = vmatmul.mubr.bf16.gmra.mrb[28].mxu1 %v4073_v40 }
 0x326   : > { %10017 = vmatprep.mubr.bf16.mxu1 %v4085_v43 }
 0x32d   : > { %10018 = vmatmul.mubr.bf16.gmra.mrb[32].mxu1 %v4097_v60 }
 0x32e   : > { %10021 = vmatprep.mubr.bf16.mxu1 %v4109_v46 }
 0x335   : > { %10022 = vmatmul.mubr.bf16.gmra.mrb[36].mxu1 %v4121_v33 }
 0x336   : > { %10025 = vmatprep.mubr.bf16.mxu1 %v4133_v41 }
 0x33d   : > { %10026 = vmatmul.mubr.bf16.gmra.mrb[40].mxu1 %v4145_v27  ;;  %v11110_v27 = vld [vmem:[%s13343_s3 + $0x20] sm:$0xff]  }
 0x33e   : > { %10029 = vmatprep.mubr.bf16.mxu1 %v4157_v47 }
 0x345   : > { %10030 = vmatmul.mubr.bf16.gmra.mrb[44].mxu1 %v4169_v31 }
 0x3e0   : > { %v10003_v3 = vpop.f32.mrb[16].mxu1 }
 0x3e1   : > { %v4453_v40 = vadd.f32 %v10003_v3, %v12350_v28  ;;  %v4285_v9 = vpop.f32.mrb[17].mxu1 }
 0x3e2   : > { %v4451_v38 = vadd.f32 %v12350_v28, %v4285_v9  ;;  %v10004_v23 = vpop.f32.mrb[18].mxu1 }
 0x3e3   : > { %v4454_v43 = vadd.f32 %v10004_v23, %v12350_v28  ;;  %v4288_v42 = vpop.f32.mrb[19].mxu1  ;;  %v4485_v52 = vmax.f32 %v4453_v40, 0.0  ;;  %v11111_v40 = vld [vmem:[%s13343_s3 + $0x28] sm:$0xff]  }
 0x3e4   : > { %v4452_v17 = vadd.f32 %v12350_v28, %v4288_v42  ;;  %v4483_v51 = vmax.f32 %v4451_v38, 0.0 }
 0x3e5   : > { %v4486_v35 = vmax.f32 %v4454_v43, 0.0 }
 0x3e6   : > { %v4484_v25 = vmax.f32 %v4452_v17, 0.0 }
 0x3e7   : > { %v12356_v56 = vpack.c.bf16 %v4486_v35, %v4485_v52 }
 0x3e8   : > { %v12358_v7 = vpack.c.bf16 %v4484_v25, %v4483_v51  ;;  %v10007_v0 = vpop.f32.mrb[20].mxu1 }
 0x3e9   : > { %4532 = vst [vmem:[#allocation2 + $0x38] sm:$0xff] %v12356_v56  ;;  %v4457_v48 = vadd.f32 %v10007_v0, %v12350_v28  ;;  %v4301_v62 = vpop.f32.mrb[21].mxu1  ;;  %v4611_v14 = vshll.u32 %v12356_v56, 16  ;;  %v4608_v10 = vshrl.u32 %v12356_v56, 16 }
 0x3ea   : > { %4531 = vst [vmem:[#allocation2 + $0x20] sm:$0xff] %v12358_v7  ;;  %v4455_v60 = vadd.f32 %v12350_v28, %v4301_v62  ;;  %v10008_v15 = vpop.f32.mrb[22].mxu1  ;;  %v4599_v44 = vshll.u32 %v12358_v7, 16  ;;  %10050 = vmatmul.mubr.bf16.vlgmr.msra.gmra.mrb[16].mxu0 %v12358_v7  ;;  %v4596_v32 = vshrl.u32 %v12358_v7, 16 }
 0x3eb   : > { %v4458_v2 = vadd.f32 %v10008_v15, %v12350_v28  ;;  %v4304_v46 = vpop.f32.mrb[23].mxu1  ;;  %10082 = vmatpush3.bf16.msra.mxu0 %v11106_v61  ;;  %10053 = vmatprep.mubr.bf16.mxu0 %v12356_v56  ;;  %v5299_v55 = vrot.slane %v4611_v14, 1  ;;  %v4489_v18 = vmax.f32 %v4457_v48, 0.0  ;;  %v11112_v48 = vld [vmem:[%s13343_s3 + $0x30] sm:$0xff]  }
 0x3ec   : > { %v4456_v49 = vadd.f32 %v12350_v28, %v4304_v46  ;;  %10083 = vmatprep.subr.bf16.mxu0 %v11107_v57  ;;  %v5287_v13 = vrot.slane %v4599_v44, 1  ;;  %v4487_v22 = vmax.f32 %v4455_v60, 0.0 }
 0x3ed   : > { %v4490_v11 = vmax.f32 %v4458_v2, 0.0  ;;  %v12384_v50 = vor.u32 %v5299_v55, %v4608_v10 }
 0x3ee   : > { %v4488_v26 = vmax.f32 %v4456_v49, 0.0  ;;  %v12388_v53 = vor.u32 %v5287_v13, %v4596_v32 }
 0x3ef   : > { %v12390_v63 = vpack.c.bf16 %v4490_v11, %v4489_v18  ;;  %10084 = vmatpush3.bf16.msra.mxu0 %v11107_v57  ;;  %v11113_v11 = vld [vmem:[%s13343_s3 + $0x38] sm:$0xff]  }
 0x3f0   : > { %v12392_v33 = vpack.c.bf16 %v4488_v26, %v4487_v22  ;;  %v10011_v21 = vpop.f32.mrb[24].mxu1  ;;  %10085 = vmatprep.subr.bf16.mxu0 %v11108_v39  ;;  %v12611_v7 = vld [vmem:[#allocation2 + $0x38] sm:$0xff] }
 0x3f1   : > { %4534 = vst [vmem:[#allocation2 + $0x68] sm:$0xff] %v12390_v63  ;;  %v4461_v59 = vadd.f32 %v10011_v21, %v12350_v28  ;;  %v4317_v41 = vpop.f32.mrb[25].mxu1  ;;  %v4635_v1 = vshll.u32 %v12390_v63, 16  ;;  %v4632_v34 = vshrl.u32 %v12390_v63, 16 }
 0x3f2   : > { %4533 = vst [vmem:[#allocation2 + $0x50] sm:$0xff] %v12392_v33  ;;  %v4459_v37 = vadd.f32 %v12350_v28, %v4317_v41  ;;  %v10012_v19 = vpop.f32.mrb[26].mxu1  ;;  %v4623_v30 = vshll.u32 %v12392_v33, 16  ;;  %10054 = vmatmul.mubr.bf16.gmra.mrb[20].mxu0 %v12392_v33  ;;  %v4620_v16 = vshrl.u32 %v12392_v33, 16 }
 0x3f3   : > { %v4462_v24 = vadd.f32 %v10012_v19, %v12350_v28  ;;  %v4320_v54 = vpop.f32.mrb[27].mxu1  ;;  %10057 = vmatprep.mubr.bf16.mxu0 %v12390_v63  ;;  %10086 = vmatpush3.bf16.msra.mxu0 %v11108_v39  ;;  %v5323_v29 = vrot.slane %v4635_v1, 1  ;;  %v4493_v12 = vmax.f32 %v4461_v59, 0.0 }
 0x3f4   : > { %v4460_v20 = vadd.f32 %v12350_v28, %v4320_v54  ;;  %10087 = vmatprep.subr.bf16.mxu0 %v11109_v36  ;;  %v5311_v47 = vrot.slane %v4623_v30, 1  ;;  %v4491_v5 = vmax.f32 %v4459_v37, 0.0 }
 0x3f5   : > { %v4494_v58 = vmax.f32 %v4462_v24, 0.0  ;;  %v12418_v31 = vor.u32 %v5323_v29, %v4632_v34 }
 0x3f6   : > { %v4492_v4 = vmax.f32 %v4460_v20, 0.0  ;;  %v12422_v45 = vor.u32 %v5311_v47, %v4620_v16 }
 0x3f7   : > { %v12424_v6 = vpack.c.bf16 %v4494_v58, %v4493_v12  ;;  %10088 = vmatpush3.bf16.msra.mxu0 %v11109_v36 }
 0x3f8   : > { %v12426_v61 = vpack.c.bf16 %v4492_v4, %v4491_v5  ;;  %v10015_v3 = vpop.f32.mrb[28].mxu1  ;;  %10089 = vmatprep.subr.bf16.mxu0 %v11110_v27 }
 0x3f9   : > { %4536 = vst [vmem:[#allocation2 + $0x98] sm:$0xff] %v12424_v6  ;;  %v4465_v9 = vadd.f32 %v10015_v3, %v12350_v28  ;;  %v4333_v38 = vpop.f32.mrb[29].mxu1  ;;  %v4659_v23 = vshll.u32 %v12424_v6, 16  ;;  %v4656_v51 = vshrl.u32 %v12424_v6, 16 }
 0x3fa   : > { %4535 = vst [vmem:[#allocation2 + $0x80] sm:$0xff] %v12426_v61  ;;  %v4463_v43 = vadd.f32 %v12350_v28, %v4333_v38  ;;  %v10016_v42 = vpop.f32.mrb[30].mxu1  ;;  %v4647_v17 = vshll.u32 %v12426_v61, 16  ;;  %10058 = vmatmul.mubr.bf16.gmra.mrb[24].mxu0 %v12426_v61  ;;  %v4644_v57 = vshrl.u32 %v12426_v61, 16  ;;  %v11116_v61 = vld [vmem:[%s13343_s3 + $0x90] sm:$0xff]  }
 0x3fb   : > { %v4466_v52 = vadd.f32 %v10016_v42, %v12350_v28  ;;  %v4336_v35 = vpop.f32.mrb[31].mxu1  ;;  %10061 = vmatprep.mubr.bf16.mxu0 %v12424_v6  ;;  %10090 = vmatpush3.bf16.msra.mxu0 %v11110_v27  ;;  %v5347_v25 = vrot.slane %v4659_v23, 1  ;;  %v4497_v60 = vmax.f32 %v4465_v9, 0.0  ;;  %v12482_v27 = vld [vmem:[%s13343_s3 + $0x80] sm:$0xff]  }
 0x3fc   : > { %v4464_v0 = vadd.f32 %v12350_v28, %v4336_v35  ;;  %10091 = vmatprep.subr.bf16.mxu0 %v11111_v40  ;;  %v5335_v62 = vrot.slane %v4647_v17, 1  ;;  %v4495_v46 = vmax.f32 %v4463_v43, 0.0  ;;  %v4646_v56 = vrot.slane %v4644_v57, 7 }
 0x3fd   : > { %v4498_v15 = vmax.f32 %v4466_v52, 0.0  ;;  %v12452_v2 = vor.u32 %v5347_v25, %v4656_v51 }
 0x3fe   : > { %v4496_v55 = vmax.f32 %v4464_v0, 0.0  ;;  %v12456_v49 = vor.u32 %v5335_v62, %v4644_v57 }
 0x3ff   : > { %v12458_v39 = vpack.c.bf16 %v4498_v15, %v4497_v60  ;;  %10092 = vmatpush3.bf16.msra.mxu0 %v11111_v40 }
 0x400   : > { %v12460_v13 = vpack.c.bf16 %v4496_v55, %v4495_v46  ;;  %v10019_v18 = vpop.f32.mrb[32].mxu1  ;;  %10093 = vmatprep.subr.bf16.mxu0 %v11112_v48 }
 0x401   : > { %4538 = vst [vmem:[#allocation2 + $0xc8] sm:$0xff] %v12458_v39  ;;  %v4469_v22 = vadd.f32 %v10019_v18, %v12350_v28  ;;  %v4349_v26 = vpop.f32.mrb[33].mxu1  ;;  %v13389_v21 = vshll.u32 %v12458_v39, 16  ;;  %v13392_v24 = vshrl.u32 %v12458_v39, 16 }
 0x402   : > { %4537 = vst [vmem:[#allocation2 + $0xb0] sm:$0xff] %v12460_v13  ;;  %v4467_v36 = vadd.f32 %v12350_v28, %v4349_v26  ;;  %v10020_v59 = vpop.f32.mrb[34].mxu1  ;;  %v13390_v41 = vshll.u32 %v12460_v13, 16  ;;  %10062 = vmatmul.mubr.bf16.gmra.mrb[28].mxu0 %v12460_v13  ;;  %v13398_v20 = vshrl.u32 %v12460_v13, 16 }
 0x403   : > { %v4470_v37 = vadd.f32 %v10020_v59, %v12350_v28  ;;  %v4352_v19 = vpop.f32.mrb[35].mxu1  ;;  %10065 = vmatprep.mubr.bf16.mxu0 %v12458_v39  ;;  %10094 = vmatpush3.bf16.msra.mxu0 %v11112_v48  ;;  %v5371_v54 = vrot.slane %v13389_v21, 1  ;;  %v4501_v12 = vmax.f32 %v4469_v22, 0.0 }
 0x404   : > { %v4468_v29 = vadd.f32 %v12350_v28, %v4352_v19  ;;  %10095 = vmatprep.subr.bf16.mxu0 %v11113_v11  ;;  %v5359_v47 = vrot.slane %v13390_v41, 1  ;;  %v4499_v4 = vmax.f32 %v4467_v36, 0.0 }
 0x405   : > { %v4502_v58 = vmax.f32 %v4470_v37, 0.0  ;;  %v12488_v5 = vor.u32 %v5371_v54, %v13392_v24 }
 0x406   : > { %v4500_v3 = vmax.f32 %v4468_v29, 0.0  ;;  %v12492_v40 = vor.u32 %v5359_v47, %v13398_v20 }
 0x407   : > { %v12494_v9 = vpack.c.bf16 %v4502_v58, %v4501_v12  ;;  %10096 = vmatpush3.bf16.msra.mxu0 %v11113_v11 }
 0x408   : > { %v12496_v38 = vpack.c.bf16 %v4500_v3, %v4499_v4  ;;  %v10023_v43 = vpop.f32.mrb[36].mxu1  ;;  %10129 = vmatprep.subr.bf16.mxu0 %v12482_v27 }
 0x409   : > { %4540 = vst [vmem:[#allocation2 + $0xf8] sm:$0xff] %v12494_v9  ;;  %v4473_v42 = vadd.f32 %v10023_v43, %v12350_v28  ;;  %v4365_v52 = vpop.f32.mrb[37].mxu1  ;;  %v13382_v35 = vshll.u32 %v12494_v9, 16  ;;  %v13387_v15 = vshrl.u32 %v12494_v9, 16 }
 0x40a   : > { %4539 = vst [vmem:[#allocation2 + $0xe0] sm:$0xff] %v12496_v38  ;;  %v4471_v25 = vadd.f32 %v12350_v28, %v4365_v52  ;;  %v10024_v0 = vpop.f32.mrb[38].mxu1  ;;  %v13386_v48 = vshll.u32 %v12496_v38, 16  ;;  %10066 = vmatmul.mubr.bf16.gmra.mrb[32].mxu0 %v12496_v38  ;;  %v13388_v18 = vshrl.u32 %v12496_v38, 16 }
 0x40b   : > { %v4474_v62 = vadd.f32 %v10024_v0, %v12350_v28  ;;  %v4368_v60 = vpop.f32.mrb[39].mxu1  ;;  %10069 = vmatprep.mubr.bf16.mxu0 %v12494_v9  ;;  %v5395_v46 = vrot.slane %v13382_v35, 1  ;;  %v4505_v22 = vmax.f32 %v4473_v42, 0.0 }
 0x40c   : > { %v4472_v55 = vadd.f32 %v12350_v28, %v4368_v60  ;;  %v5383_v11 = vrot.slane %v13386_v48, 1  ;;  %v4503_v59 = vmax.f32 %v4471_v25, 0.0 }
 0x40d   : > { %v4506_v26 = vmax.f32 %v4474_v62, 0.0  ;;  %v12517_v36 = vor.u32 %v5395_v46, %v13387_v15  ;;  %v4553_v15 = vld [vmem:[#allocation2 + $0x48] sm:$0x80] }
 0x40e   : > { %v4504_v37 = vmax.f32 %v4472_v55, 0.0  ;;  %v12521_v19 = vor.u32 %v5383_v11, %v13388_v18 }
 0x40f   : > { %v12523_v54 = vpack.c.bf16 %v4506_v26, %v4505_v22  ;;  %v4547_v26 = vld [vmem:[#allocation2] sm:$0x80] }
 0x410   : > { %v12525_v29 = vpack.c.bf16 %v4504_v37, %v4503_v59  ;;  %v10027_v47 = vpop.f32.mrb[40].mxu1  ;;  %v4580_v35 = vshrl.u32 %v4547_v26, 16 }
 0x411   : > { %4542 = vst [vmem:[#allocation2 + $0x128] sm:$0xff] %v12523_v54  ;;  %v4477_v12 = vadd.f32 %v10027_v47, %v12350_v28  ;;  %v4381_v58 = vpop.f32.mrb[41].mxu1  ;;  %v13381_v4 = vshll.u32 %v12523_v54, 16  ;;  %v13384_v0 = vshrl.u32 %v12523_v54, 16 }
 0x412   : > { %4541 = vst [vmem:[#allocation2 + $0x110] sm:$0xff] %v12525_v29  ;;  %v4475_v3 = vadd.f32 %v12350_v28, %v4381_v58  ;;  %v10028_v43 = vpop.f32.mrb[42].mxu1  ;;  %v13383_v42 = vshll.u32 %v12525_v29, 16  ;;  %10070 = vmatmul.mubr.bf16.gmra.mrb[36].mxu0 %v12525_v29  ;;  %v13385_v46 = vshrl.u32 %v12525_v29, 16 }
 0x413   : > { %v4478_v52 = vadd.f32 %v10028_v43, %v12350_v28  ;;  %v4384_v25 = vpop.f32.mrb[43].mxu1  ;;  %10073 = vmatprep.mubr.bf16.mxu0 %v12523_v54  ;;  %v5419_v62 = vrot.slane %v13381_v4, 1  ;;  %v4509_v11 = vmax.f32 %v4477_v12, 0.0 }
 0x414   : > { %v4476_v60 = vadd.f32 %v12350_v28, %v4384_v25  ;;  %v5407_v55 = vrot.slane %v13383_v42, 1  ;;  %v4507_v37 = vmax.f32 %v4475_v3, 0.0  ;;  %v4549_v42 = vld [vmem:[#allocation2 + $0x18] sm:$0x80] }
 0x415   : > { %v4510_v22 = vmax.f32 %v4478_v52, 0.0  ;;  %v12545_v59 = vor.u32 %v5419_v62, %v13384_v0 }
 0x416   : > { %v4508_v47 = vmax.f32 %v4476_v60, 0.0  ;;  %v12549_v58 = vor.u32 %v5407_v55, %v13385_v46 }
 0x417   : > { %v12551_v43 = vpack.c.bf16 %v4510_v22, %v4509_v11 }
 0x418   : > { %v12553_v25 = vpack.c.bf16 %v4508_v47, %v4507_v37  ;;  %v10031_v4 = vpop.f32.mrb[44].mxu1 }
 0x419   : > { %4544 = vst [vmem:[#allocation2 + $0x158] sm:$0xff] %v12551_v43  ;;  %v4481_v12 = vadd.f32 %v10031_v4, %v12350_v28  ;;  %v4397_v52 = vpop.f32.mrb[45].mxu1  ;;  %v13391_v62 = vshll.u32 %v12551_v43, 16  ;;  %v13396_v26 = vshrl.u32 %v12551_v43, 16 }
 0x41a   : > { %4543 = vst [vmem:[#allocation2 + $0x140] sm:$0xff] %v12553_v25  ;;  %v4479_v3 = vadd.f32 %v12350_v28, %v4397_v52  ;;  %v10032_v60 = vpop.f32.mrb[46].mxu1  ;;  %v13393_v55 = vshll.u32 %v12553_v25, 16  ;;  %10074 = vmatmul.mubr.bf16.gmra.mrb[40].mxu0 %v12553_v25  ;;  %v13397_v47 = vshrl.u32 %v12553_v25, 16  ;;  %v4582_v52 = vrot.slane %v4580_v35, 7 }
 0x41b   : > { %v4482_v11 = vadd.f32 %v10032_v60, %v12350_v28  ;;  %v4400_v22 = vpop.f32.mrb[47].mxu1  ;;  %10077 = vmatprep.mubr.bf16.mxu0 %v12551_v43  ;;  %v5443_v4 = vrot.slane %v13391_v62, 1  ;;  %v4513_v46 = vmax.f32 %v4481_v12, 0.0  ;;  %v4551_v60 = vld [vmem:[#allocation2 + $0x30] sm:$0x80]  ;;  %v4592_v35 = vshrl.u32 %v4549_v42, 16 }
 0x41c   : > { %v4480_v37 = vadd.f32 %v12350_v28, %v4400_v22  ;;  %v5431_v0 = vrot.slane %v13393_v55, 1  ;;  %v4511_v21 = vmax.f32 %v4479_v3, 0.0  ;;  %v4555_v62 = vld [vmem:[#allocation2 + $0x60] sm:$0x80]  ;;  %v4590_v12 = vsel %vm776_vm0, %v4582_v52, %v12274_v8 }
 0x41d   : > { %v4514_v48 = vmax.f32 %v4482_v11, 0.0  ;;  %v12573_v18 = vor.u32 %v5443_v4, %v13396_v26  ;;  %v4604_v11 = vshrl.u32 %v4551_v60, 16  ;;  %v4616_v55 = vshrl.u32 %v4553_v15, 16 }
 0x41e   : > { %v4512_v41 = vmax.f32 %v4480_v37, 0.0  ;;  %v12577_v28 = vor.u32 %v5431_v0, %v13397_v47  ;;  %v4598_v4 = vrot.slane %v4596_v32, 7  ;;  %v4610_v3 = vrot.slane %v4608_v10, 7  ;;  %v4557_v37 = vld [vmem:[#allocation2 + $0x78] sm:$0x80] }
 0x41f   : > { %v4530_v22 = vpack.c.bf16 %v4514_v48, %v4513_v46  ;;  %v4559_v0 = vld [vmem:[#allocation2 + $0x90] sm:$0x80]  ;;  %v4622_v48 = vrot.slane %v4620_v16, 7  ;;  %v4594_v32 = vrot.slane %v4592_v35, 7  ;;  %v4640_v15 = vshrl.u32 %v4557_v37, 16  ;;  %v12609_v37 = vld [vmem:[#allocation2 + $0x20] sm:$0xff] }
 0x420   : > { %v12579_v24 = vpack.c.bf16 %v4512_v41, %v4511_v21  ;;  %v4634_v21 = vrot.slane %v4632_v34, 7  ;;  %v4628_v41 = vshrl.u32 %v4555_v62, 16  ;;  %v4652_v42 = vshrl.u32 %v4559_v0, 16 }
 0x421   : > { %4546 = vst [vmem:[#allocation2 + $0x188] sm:$0xff] %v4530_v22  ;;  %v4601_v16 = vor.u32 %v4599_v44, %v4598_v4  ;;  %v4613_v34 = vor.u32 %v4611_v14, %v4610_v3  ;;  %v4606_v52 = vrot.slane %v4604_v11, 7  ;;  %v4618_v60 = vrot.slane %v4616_v55, 7  ;;  %v11115_v44 = vld [vmem:[%s13343_s3 + $0x88] sm:$0xff]   ;;  %v12632_v4 = vld [vmem:[#allocation2 + $0x80] sm:$0xff] }
 0x422   : > { %4545 = vst [vmem:[#allocation2 + $0x170] sm:$0xff] %v12579_v24  ;;  %v13394_v8 = vshll.u32 %v12579_v24, 16  ;;  %10078 = vmatmul.mubr.bf16.gmra.mrb[44].mxu0 %v12579_v24  ;;  %v13395_v10 = vshrl.u32 %v12579_v24, 16  ;;  %v4625_v62 = vor.u32 %v4623_v30, %v4622_v48  ;;  %v4637_v22 = vor.u32 %v4635_v1, %v4634_v21  ;;  %v12624_v1 = vld [vmem:[#allocation2 + $0x50] sm:$0xff]  ;;  %v12626_v30 = vld [vmem:[#allocation2 + $0x68] sm:$0xff]  ;;  %v12694_v47 = vld [vmem:[#allocation2 + $0x140] sm:$0xff] }
 0x423   : > { %10097 = vmatprep.mubr.bf16.mxu0 %v4590_v12  ;;  %v4630_v35 = vrot.slane %v4628_v41, 7  ;;  %v4658_v14 = vrot.slane %v4656_v51, 7  ;;  %v12620_v63 = vrot.slane %v4640_v15, 7  ;;  %v12622_v33 = vrot.slane %v4652_v42, 7  ;;  %v12638_v41 = vld [vmem:[#allocation2 + $0x98] sm:$0xff] }
 0x424   : > { %v5455_v46 = vrot.slane %v13394_v8, 1  ;;  %v4602_v55 = vsel %vm776_vm0, %v4594_v32, %v4601_v16  ;;  %v4614_v11 = vsel %vm776_vm0, %v4606_v52, %v4613_v34  ;;  %v13399_v57 = vshll.u32 %v12609_v37, 16  ;;  %v12640_v32 = vld [vmem:[#allocation2 + $0xb0] sm:$0xff]  ;;  %v12653_v34 = vld [vmem:[#allocation2 + $0xc8] sm:$0xff]  ;;  %v12662_v52 = vld [vmem:[#allocation2 + $0xe0] sm:$0xff] }
 0x425   : > { %v13404_v51 = vshrl.u32 %v12611_v7, 16  ;;  %v4626_v3 = vsel %vm776_vm0, %v4618_v60, %v4625_v62  ;;  %v4638_v0 = vsel %vm776_vm0, %v4630_v35, %v4637_v22  ;;  %v13403_v48 = vshrl.u32 %v12609_v37, 16  ;;  %v12667_v35 = vld [vmem:[#allocation2 + $0xf8] sm:$0xff] }
 0x426   : > { %v12607_v12 = vor.u32 %v5455_v46, %v13395_v10  ;;  %v13400_v21 = vshll.u32 %v12611_v7, 16  ;;  %v12644_v15 = vor.u32 %v4647_v17, %v4646_v56  ;;  %v12648_v42 = vor.u32 %v4659_v23, %v4658_v14  ;;  %v12669_v56 = vld [vmem:[#allocation2 + $0x110] sm:$0xff]  ;;  %v12676_v10 = vld [vmem:[#allocation2 + $0x128] sm:$0xff]  ;;  %v11117_v22 = vld [vmem:[%s13343_s3 + $0x98] sm:$0xff]  }
 0x427   : > { %v13401_v46 = vshll.u32 %v12624_v1, 16  ;;  %v13402_v16 = vshll.u32 %v12626_v30, 16  ;;  %v13408_v17 = vshrl.u32 %v12624_v1, 16  ;;  %v13406_v6 = vshrl.u32 %v12626_v30, 16  ;;  %v12715_v8 = vld [vmem:[#allocation2 + $0x158] sm:$0xff] }
 0x428   : > { %v13410_v23 = vshrl.u32 %v12632_v4, 16  ;;  %v13411_v60 = vshrl.u32 %v12638_v41, 16  ;;  %v13407_v62 = vshll.u32 %v12638_v41, 16  ;;  %v6529_v14 = vrot.slane %v13399_v57, 1 }
 0x429   : > { %v6541_v26 = vrot.slane %v13400_v21, 1  ;;  %v6553_v57 = vrot.slane %v13401_v46, 1 }
 0x42a   : > { %10098 = vmatmul.mubr.bf16.vlgmr.msra.gmra.mrb[16].mxu0 %v4602_v55  ;;  %v13409_v55 = vshll.u32 %v12640_v32, 16  ;;  %v12683_v20 = vor.u32 %v6529_v14, %v13403_v48 }
 0x42b   : > { %10130 = vmatpush3.bf16.msra.mxu0 %v12482_v27  ;;  %10101 = vmatprep.mubr.bf16.mxu0 %v4614_v11  ;;  %v13405_v27 = vshll.u32 %v12632_v4, 16  ;;  %v6565_v11 = vrot.slane %v13402_v16, 1  ;;  %v12698_v14 = vor.u32 %v6541_v26, %v13404_v51  ;;  %v12705_v48 = vor.u32 %v6553_v57, %v13408_v17 }
 0x42c   : > { %10131 = vmatprep.subr.bf16.mxu0 %v11115_v44  ;;  %v6601_v57 = vrot.slane %v13409_v55, 1  ;;  %v13520_v51 = vshll.u32 %v12653_v34, 16  ;;  %v12737_v55 = vld [vmem:[#allocation2 + $0x188] sm:$0xff]  ;;  %v13530_v16 = vshrl.u32 %v12667_v35, 16 }
 0x42d   : > { %13515 = vst [vmem:[#allocation3_spill] sm:$0xff] %v12698_v14  ;;  %v6577_v46 = vrot.slane %v13405_v27, 1  ;;  %13516 = vst [vmem:[#allocation4_spill] sm:$0xff] %v12705_v48  ;;  %v12709_v21 = vor.u32 %v6565_v11, %v13406_v6  ;;  %v4561_v11 = vld [vmem:[#allocation2 + $0xa8] sm:$0x80]  ;;  %v13523_v6 = vshll.u32 %v12662_v52, 16 }
 0x42e   : > { %v13528_v48 = vshll.u32 %v12676_v10, 16 }
 0x42f   : > { %10132 = vmatpush3.bf16.msra.mxu0 %v11115_v44  ;;  %13517 = vst [vmem:[#allocation5_spill] sm:$0xff] %v12709_v21  ;;  %v6589_v44 = vrot.slane %v13407_v62, 1  ;;  %v12719_v27 = vor.u32 %v6577_v46, %v13410_v23  ;;  %v12725_v62 = vld [vmem:[#allocation2 + $0x170] sm:$0xff]  ;;  %v6613_v46 = vrot.slane %v13520_v51, 1  ;;  %v13521_v23 = vshrl.u32 %v12640_v32, 16 }
 0x430   : > { %10133 = vmatprep.subr.bf16.mxu0 %v11116_v61  ;;  %v4563_v51 = vld [vmem:[#allocation2 + $0xc0] sm:$0x80] }
 0x431   : > { %13518 = vst [vmem:[#allocation6_spill] sm:$0xff] %v12719_v27  ;;  %v12729_v17 = vor.u32 %v6589_v44, %v13411_v60  ;;  %v6625_v44 = vrot.slane %v13523_v6, 1  ;;  %v13524_v60 = vshll.u32 %v12667_v35, 16  ;;  %v13534_v6 = vshll.u32 %v12694_v47, 16 }
 0x432   : > { %10102 = vmatmul.mubr.bf16.gmra.mrb[20].mxu0 %v4626_v3  ;;  %v12741_v3 = vor.u32 %v6601_v57, %v13521_v23  ;;  %v6661_v23 = vrot.slane %v13528_v48, 1  ;;  %v13532_v48 = vshrl.u32 %v12676_v10, 16 }
 0x433   : > { %10105 = vmatprep.mubr.bf16.mxu0 %v4638_v0  ;;  %10134 = vmatpush3.bf16.msra.mxu0 %v11116_v61  ;;  %13519 = vst [vmem:[#allocation7_spill] sm:$0xff] %v12729_v17  ;;  %v11118_v0 = vld [vmem:[%s13343_s3 + $0xa0] sm:$0xff]   ;;  %v6637_v26 = vrot.slane %v13524_v60, 1  ;;  %v13525_v17 = vshrl.u32 %v12653_v34, 16  ;;  %v13527_v61 = vshll.u32 %v12669_v56, 16 }
 0x434   : > { %10135 = vmatprep.subr.bf16.mxu0 %v11117_v22  ;;  %13522 = vst [vmem:[#allocation8_spill] sm:$0xff] %v12741_v3  ;;  %v13529_v3 = vshrl.u32 %v12662_v52, 16  ;;  %v12773_v57 = vor.u32 %v6661_v23, %v13532_v48 }
 0x435   : > { %v12750_v27 = vor.u32 %v6613_v46, %v13525_v17  ;;  %v6649_v21 = vrot.slane %v13527_v61, 1  ;;  %v12764_v14 = vor.u32 %v6637_v26, %v13530_v16  ;;  %v13531_v46 = vshrl.u32 %v12669_v56, 16 }
 0x436   : > { %v12760_v60 = vor.u32 %v6625_v44, %v13529_v3  ;;  %13533 = vst [vmem:[#allocation10_spill] sm:$0xff] %v12773_v57  ;;  %v4650_v3 = vsel %vm776_vm0, %v12620_v63, %v12644_v15  ;;  %v4664_v16 = vshrl.u32 %v4561_v11, 16  ;;  %v4676_v26 = vshrl.u32 %v4563_v51, 16  ;;  %v4567_v57 = vld [vmem:[#allocation2 + $0xf0] sm:$0x80] }
 0x437   : > { %13526 = vst [vmem:[#allocation9_spill] sm:$0xff] %v12750_v27  ;;  %10136 = vmatpush3.bf16.msra.mxu0 %v11117_v22  ;;  %v12769_v61 = vor.u32 %v6649_v21, %v13531_v46  ;;  %v6673_v27 = vrot.slane %v13534_v6, 1  ;;  %v11119_v22 = vld [vmem:[%s13343_s3 + $0xa8] sm:$0xff]   ;;  %v13535_v21 = vshrl.u32 %v12460_v13, 16  ;;  %v13536_v46 = vshrl.u32 %v12694_v47, 16 }
 0x438   : > { %10137 = vmatprep.subr.bf16.mxu0 %v11118_v0  ;;  %v13538_v6 = vshll.u32 %v12715_v8, 16  ;;  %v13539_v63 = vshrl.u32 %v12458_v39, 16  ;;  %v4662_v11 = vsel %vm776_vm0, %v12622_v33, %v12648_v42  ;;  %v13413_v51 = vshrl.u32 %v12725_v62, 16  ;;  %v11120_v33 = vld [vmem:[%s13343_s3 + $0xb0] sm:$0xff]  }
 0x439   : > { %v4670_v44 = vrot.slane %v13535_v21, 7  ;;  %v12788_v48 = vor.u32 %v6673_v27, %v13536_v46  ;;  %v13540_v21 = vshll.u32 %v12725_v62, 16  ;;  %v13412_v27 = vshrl.u32 %v12737_v55, 16 }
 0x43a   : > { %v6685_v17 = vrot.slane %v13538_v6, 1  ;;  %v4682_v15 = vrot.slane %v13539_v63, 7  ;;  %10106 = vmatmul.mubr.bf16.gmra.mrb[24].mxu0 %v4650_v3  ;;  %v13541_v46 = vshrl.u32 %v12715_v8, 16  ;;  %v13543_v63 = vshll.u32 %v12737_v55, 16 }
 0x43b   : > { %13537 = vst [vmem:[#allocation11_spill] sm:$0xff] %v12788_v48  ;;  %v6697_v23 = vrot.slane %v13540_v21, 1  ;;  %10109 = vmatprep.mubr.bf16.mxu0 %v4662_v11  ;;  %10138 = vmatpush3.bf16.msra.mxu0 %v11118_v0  ;;  %v13544_v0 = vshll.u32 %v12460_v13, 16  ;;  %v4666_v21 = vrot.slane %v4664_v16, 7  ;;  %v4565_v48 = vld [vmem:[#allocation2 + $0xd8] sm:$0x80] }
 0x43c   : > { %v12803_v6 = vor.u32 %v6685_v17, %v13541_v46  ;;  %v6709_v3 = vrot.slane %v13543_v63, 1  ;;  %10139 = vmatprep.subr.bf16.mxu0 %v11119_v22  ;;  %v13545_v46 = vshll.u32 %v12458_v39, 16  ;;  %v13546_v13 = vshrl.u32 %v12496_v38, 16 }
 0x43d   : > { %v12812_v42 = vor.u32 %v6697_v23, %v13413_v51  ;;  %v4673_v11 = vor.u32 %v13544_v0, %v4670_v44  ;;  %v11121_v23 = vld [vmem:[%s13343_s3 + $0xb8] sm:$0xff]   ;;  %v4688_v0 = vshrl.u32 %v4565_v48, 16  ;;  %v13549_v48 = vshll.u32 %v12494_v9, 16  ;;  %v4575_v51 = vld [vmem:[#allocation2 + $0x150] sm:$0x80] }
 0x43e   : > { %13542 = vst [vmem:[#allocation12_spill] sm:$0xff] %v12803_v6  ;;  %v12818_v17 = vor.u32 %v6709_v3, %v13412_v27  ;;  %v4685_v63 = vor.u32 %v13545_v46, %v4682_v15  ;;  %v4678_v6 = vrot.slane %v4676_v26, 7  ;;  %v4694_v44 = vrot.slane %v13546_v13, 7 }
 0x43f   : > { %10140 = vmatpush3.bf16.msra.mxu0 %v11119_v22  ;;  %v4674_v16 = vsel %vm776_vm0, %v4666_v21, %v4673_v11  ;;  %v13547_v3 = vshrl.u32 %v12494_v9, 16  ;;  %v4700_v26 = vshrl.u32 %v4567_v57, 16  ;;  %v12834_v22 = vld [vmem:[%s13343_s3 + $0xc0] sm:$0xff]   ;;  %v13548_v15 = vshll.u32 %v12496_v38, 16 }
 0x440   : > { %10141 = vmatprep.subr.bf16.mxu0 %v11120_v33  ;;  %v4686_v39 = vsel %vm776_vm0, %v4678_v6, %v4685_v63  ;;  %v4690_v11 = vrot.slane %v4688_v0, 7  ;;  %v13550_v57 = vshrl.u32 %v12525_v29, 16 }
 0x441   : > { %v4706_v27 = vrot.slane %v13547_v3, 7  ;;  %v4697_v46 = vor.u32 %v13548_v15, %v4694_v44  ;;  %v4702_v13 = vrot.slane %v4700_v26, 7  ;;  %v4571_v3 = vld [vmem:[#allocation2 + $0x120] sm:$0x80]  ;;  %v13553_v26 = vshll.u32 %v12523_v54, 16 }
 0x442   : > { %10110 = vmatmul.mubr.bf16.gmra.mrb[28].mxu0 %v4674_v16  ;;  %v4569_v16 = vld [vmem:[#allocation2 + $0x108] sm:$0x80]  ;;  %v4718_v6 = vrot.slane %v13550_v57, 7  ;;  %v4724_v9 = vshrl.u32 %v4571_v3, 16  ;;  %v4573_v57 = vld [vmem:[#allocation2 + $0x138] sm:$0x80] }
 0x443   : > { %10113 = vmatprep.mubr.bf16.mxu0 %v4686_v39  ;;  %10142 = vmatpush3.bf16.msra.mxu0 %v11120_v33  ;;  %v4709_v21 = vor.u32 %v13549_v48, %v4706_v27  ;;  %v4698_v33 = vsel %vm776_vm0, %v4690_v11, %v4697_v46  ;;  %v4712_v63 = vshrl.u32 %v4569_v16, 16  ;;  %v13551_v39 = vshrl.u32 %v12523_v54, 16 }
 0x444   : > { %10143 = vmatprep.subr.bf16.mxu0 %v11121_v23  ;;  %v13552_v27 = vshll.u32 %v12525_v29, 16  ;;  %v4726_v48 = vrot.slane %v4724_v9, 7  ;;  %v13554_v46 = vshrl.u32 %v12553_v25, 16  ;;  %v4748_v3 = vshrl.u32 %v4575_v51, 16 }
 0x445   : > { %v4730_v38 = vrot.slane %v13551_v39, 7  ;;  %v4710_v44 = vsel %vm776_vm0, %v4702_v13, %v4709_v21  ;;  %v13555_v21 = vshrl.u32 %v12551_v43, 16  ;;  %v13557_v9 = vshll.u32 %v12551_v43, 16 }
 0x446   : > { %v4721_v0 = vor.u32 %v13552_v27, %v4718_v6  ;;  %v4742_v11 = vrot.slane %v13554_v46, 7  ;;  %v12857_v6 = vld [vmem:[#allocation2 + $0x8] sm:$0xff] }
 0x447   : > { %10144 = vmatpush3.bf16.msra.mxu0 %v11121_v23  ;;  %v4714_v23 = vrot.slane %v4712_v63, 7  ;;  %v4733_v15 = vor.u32 %v13553_v26, %v4730_v38  ;;  %v4754_v13 = vrot.slane %v13555_v21, 7  ;;  %v5273_v54 = vshll.u32 %v12857_v6, 16 }
 0x448   : > { %10177 = vmatprep.subr.bf16.mxu0 %v12834_v22  ;;  %v13556_v63 = vshll.u32 %v12553_v25, 16  ;;  %v5271_v26 = vshrl.u32 %v12857_v6, 16  ;;  %v11164_v6 = vld [vmem:[%s13343_s3 + $0x210] sm:$0xff]  }
 0x449   : > { %v4722_v16 = vsel %vm776_vm0, %v4714_v23, %v4721_v0  ;;  %v4734_v29 = vsel %vm776_vm0, %v4726_v48, %v4733_v15  ;;  %v4757_v27 = vor.u32 %v13557_v9, %v4754_v13  ;;  %v4750_v0 = vrot.slane %v4748_v3, 7  ;;  %v4577_v23 = vld [vmem:[#allocation2 + $0x168] sm:$0x80]  ;;  %v5243_v3 = vld [vmem:[#allocation2 + $0x40] sm:$0x1] }
 0x44a   : > { %10114 = vmatmul.mubr.bf16.gmra.mrb[32].mxu0 %v4698_v33  ;;  %v4736_v33 = vshrl.u32 %v4573_v57, 16  ;;  %v4745_v39 = vor.u32 %v13556_v63, %v4742_v11  ;;  %v5275_v51 = vrot.slane %v5273_v54, 1  ;;  %v13558_v48 = vshrl.u32 %v12579_v24, 16 }
 0x44b   : > { %10117 = vmatprep.mubr.bf16.mxu0 %v4710_v44  ;;  %v5239_v44 = vld [vmem:[#allocation2 + $0x10] sm:$0x1]  ;;  %v4760_v25 = vshrl.u32 %v4577_v23, 16  ;;  %v4758_v11 = vsel %vm776_vm0, %v4750_v0, %v4757_v27  ;;  %v5245_v0 = vld [vmem:[#allocation2 + $0x58] sm:$0x1] }
 0x44c   : > { %v4738_v38 = vrot.slane %v4736_v33, 7  ;;  %v5278_v15 = vshll.u32 %v5239_v44, 16  ;;  %v4766_v57 = vrot.slane %v13558_v48, 7  ;;  %v12873_v43 = vor.u32 %v5275_v51, %v5271_v26  ;;  %v5247_v23 = vld [vmem:[#allocation2 + $0x70] sm:$0x1] }
 0x44d   : > { %v13559_v33 = vshll.u32 %v12579_v24, 16  ;;  %v4762_v13 = vrot.slane %v4760_v25, 7  ;;  %v5302_v44 = vshll.u32 %v5243_v3, 16  ;;  %v11123_v24 = vld [vmem:[%s13343_s3 + $0xc8] sm:$0xff]  }
 0x44e   : > { %v4746_v46 = vsel %vm776_vm0, %v4738_v38, %v4745_v39 }
 0x44f   : > { %v4769_v21 = vor.u32 %v13559_v33, %v4766_v57  ;;  %v5304_v27 = vrot.slane %v5302_v44, 1  ;;  %v5326_v57 = vshll.u32 %v5247_v23, 16  ;;  %v5251_v33 = vld [vmem:[#allocation2 + $0xa0] sm:$0x1] }
 0x451   : > { %v4770_v39 = vsel %vm776_vm0, %v4762_v13, %v4769_v21  ;;  %v5305_v48 = vsel %vm1468_vm1, %v12384_v50, %v5304_v27  ;;  %v5350_v13 = vshll.u32 %v5251_v33, 16  ;;  %v5261_v33 = vld [vmem:[#allocation2 + $0x118] sm:$0x1] }
 0x452   : > { %10118 = vmatmul.mubr.bf16.gmra.mrb[36].mxu0 %v4722_v16  ;;  %v5280_v16 = vrot.slane %v5278_v15, 1  ;;  %v5314_v15 = vshll.u32 %v5245_v0, 16  ;;  %v11128_v0 = vld [vmem:[%s13343_s3 + $0xf0] sm:$0xff]  }
 0x453   : > { %10121 = vmatprep.mubr.bf16.mxu0 %v4734_v29  ;;  %v5241_v29 = vld [vmem:[#allocation2 + $0x28] sm:$0x1] }
 0x454   : > { %v5281_v63 = vsel %vm1468_vm1, %v12873_v43, %v5280_v16  ;;  %v5290_v38 = vshll.u32 %v5241_v29, 16  ;;  %v5316_v25 = vrot.slane %v5314_v15, 1  ;;  %v5249_v16 = vld [vmem:[#allocation2 + $0x88] sm:$0x1]  ;;  %v11126_v29 = vld [vmem:[%s13343_s3 + $0xe0] sm:$0xff]  }
 0x455   : > { %v5259_v15 = vld [vmem:[#allocation2 + $0x100] sm:$0x1] }
 0x456   : > { %v5292_v9 = vrot.slane %v5290_v38, 1  ;;  %v5317_v50 = vsel %vm1468_vm1, %v12422_v45, %v5316_v25  ;;  %v5255_v38 = vld [vmem:[#allocation2 + $0xd0] sm:$0x1]  ;;  %v11127_v45 = vld [vmem:[%s13343_s3 + $0xe8] sm:$0xff]   ;;  %v11130_v25 = vld [vmem:[%s13343_s3 + $0x100] sm:$0xff]  }
 0x457   : > { %v5374_v27 = vshll.u32 %v5255_v38, 16 }
 0x458   : > { %v5293_v51 = vsel %vm1468_vm1, %v12388_v53, %v5292_v9  ;;  %v11125_v53 = vld [vmem:[%s13343_s3 + $0xd8] sm:$0xff]  }
 0x45a   : > { %10122 = vmatmul.mubr.bf16.gmra.mrb[40].mxu0 %v4746_v46  ;;  %v11124_v46 = vld [vmem:[%s13343_s3 + $0xd0] sm:$0xff]  }
 0x45b   : > { %10125 = vmatprep.mubr.bf16.mxu0 %v4758_v11  ;;  %v5328_v11 = vrot.slane %v5326_v57, 1 }
 0x45d   : > { %v5329_v21 = vsel %vm1468_vm1, %v12418_v31, %v5328_v11 }
 0x462   : > { %10126 = vmatmul.mubr.bf16.gmra.mrb[44].mxu0 %v4770_v39  ;;  %v5253_v39 = vld [vmem:[#allocation2 + $0xb8] sm:$0x1] }
 0x463   : > { %10145 = vmatprep.mubr.bf16.mxu0 %v5281_v63  ;;  %v5352_v63 = vrot.slane %v5350_v13, 1  ;;  %v5362_v44 = vshll.u32 %v5253_v39, 16 }
 0x465   : > { %v5353_v9 = vsel %vm1468_vm1, %v12452_v2, %v5352_v63  ;;  %v5364_v23 = vrot.slane %v5362_v44, 1  ;;  %v5269_v44 = vld [vmem:[#allocation2 + $0x178] sm:$0x1] }
 0x467   : > { %v5365_v2 = vsel %vm1468_vm1, %v12492_v40, %v5364_v23  ;;  %v13560_v23 = vshrl.u32 %v12609_v37, 16 }
 0x46a   : > { %10146 = vmatmul.mubr.bf16.vlgmr.msra.gmra.mrb[16].mxu0 %v5293_v51  ;;  %v5257_v51 = vld [vmem:[#allocation2 + $0xe8] sm:$0x1] }
 0x46b   : > { %10178 = vmatpush3.bf16.msra.mxu0 %v12834_v22  ;;  %10149 = vmatprep.mubr.bf16.mxu0 %v5305_v48  ;;  %v5338_v22 = vshll.u32 %v5249_v16, 16  ;;  %v5386_v48 = vshll.u32 %v5257_v51, 16 }
 0x46c   : > { %10179 = vmatprep.subr.bf16.mxu0 %v11123_v24 }
 0x46d   : > { %v5340_v3 = vrot.slane %v5338_v22, 1  ;;  %v5388_v11 = vrot.slane %v5386_v48, 1  ;;  %v5740_v48 = vld [vmem:[#allocation2 + $0x48] sm:$0x80] }
 0x46f   : > { %10180 = vmatpush3.bf16.msra.mxu0 %v11123_v24  ;;  %v5341_v31 = vsel %vm1468_vm1, %v12456_v49, %v5340_v3  ;;  %v5376_v24 = vrot.slane %v5374_v27, 1  ;;  %v11129_v49 = vld [vmem:[%s13343_s3 + $0xf8] sm:$0xff]   ;;  %v5389_v40 = vsel %vm1468_vm1, %v12521_v19, %v5388_v11  ;;  %v5267_v3 = vld [vmem:[#allocation2 + $0x160] sm:$0x1]  ;;  %v5458_v27 = vshll.u32 %v5269_v44, 16 }
 0x470   : > { %10181 = vmatprep.subr.bf16.mxu0 %v11124_v46  ;;  %v5446_v19 = vshll.u32 %v5267_v3, 16  ;;  %v11131_v3 = vld [vmem:[%s13343_s3 + $0x108] sm:$0xff]   ;;  %v13567_v44 = vshrl.u32 %v12632_v4, 16 }
 0x471   : > { %v5377_v57 = vsel %vm1468_vm1, %v12488_v5, %v5376_v24  ;;  %v5775_v24 = vrot.slane %v13560_v23, 7 }
 0x472   : > { %10150 = vmatmul.mubr.bf16.gmra.mrb[20].mxu0 %v5317_v50  ;;  %v5410_v50 = vshll.u32 %v5261_v33, 16  ;;  %v13563_v33 = vshrl.u32 %v12624_v1, 16 }
 0x473   : > { %10153 = vmatprep.mubr.bf16.mxu0 %v5329_v21  ;;  %10182 = vmatpush3.bf16.msra.mxu0 %v11124_v46  ;;  %v5398_v46 = vshll.u32 %v5259_v15, 16  ;;  %v13561_v15 = vshll.u32 %v12609_v37, 16 }
 0x474   : > { %10183 = vmatprep.subr.bf16.mxu0 %v11125_v53  ;;  %v5412_v21 = vrot.slane %v5410_v50, 1  ;;  %v13564_v50 = vshll.u32 %v12611_v7, 16 }
 0x475   : > { %v5400_v16 = vrot.slane %v5398_v46, 1  ;;  %v13562_v46 = vshrl.u32 %v12611_v7, 16 }
 0x476   : > { %v5413_v63 = vsel %vm1468_vm1, %v12549_v58, %v5412_v21 }
 0x477   : > { %10184 = vmatpush3.bf16.msra.mxu0 %v11125_v53  ;;  %v5263_v53 = vld [vmem:[#allocation2 + $0x130] sm:$0x1]  ;;  %v5401_v5 = vsel %vm1468_vm1, %v12517_v36, %v5400_v16  ;;  %v5736_v36 = vld [vmem:[#allocation2 + $0x18] sm:$0x80]  ;;  %v5787_v11 = vrot.slane %v13562_v46, 7  ;;  %v5793_v16 = vshrl.u32 %v5740_v48, 16 }
 0x478   : > { %10185 = vmatprep.subr.bf16.mxu0 %v11126_v29  ;;  %v5422_v22 = vshll.u32 %v5263_v53, 16  ;;  %v5769_v58 = vshrl.u32 %v5736_v36, 16  ;;  %v5799_v53 = vrot.slane %v13563_v33, 7  ;;  %v5823_v36 = vrot.slane %v13567_v44, 7 }
 0x479   : > { %v13570_v48 = vshrl.u32 %v12638_v41, 16  ;;  %v13575_v44 = vshrl.u32 %v12662_v52, 16 }
 0x47a   : > { %10154 = vmatmul.mubr.bf16.gmra.mrb[24].mxu0 %v5341_v31  ;;  %v5424_v13 = vrot.slane %v5422_v22, 1  ;;  %v5448_v31 = vrot.slane %v5446_v19, 1  ;;  %v5771_v51 = vrot.slane %v5769_v58, 7  ;;  %v5795_v22 = vrot.slane %v5793_v16, 7  ;;  %v11134_v16 = vld [vmem:[%s13343_s3 + $0x120] sm:$0xff]  }
 0x47b   : > { %10157 = vmatprep.mubr.bf16.mxu0 %v5353_v9  ;;  %10186 = vmatpush3.bf16.msra.mxu0 %v11126_v29  ;;  %v5265_v29 = vld [vmem:[#allocation2 + $0x148] sm:$0x1] }
 0x47c   : > { %10187 = vmatprep.subr.bf16.mxu0 %v11127_v45  ;;  %v5434_v39 = vshll.u32 %v5265_v29, 16  ;;  %v5425_v38 = vsel %vm1468_vm1, %v12545_v59, %v5424_v13  ;;  %v5460_v59 = vrot.slane %v5458_v27, 1  ;;  %v5742_v13 = vld [vmem:[#allocation2 + $0x60] sm:$0x80]  ;;  %v5744_v29 = vld [vmem:[#allocation2 + $0x78] sm:$0x80] }
 0x47f   : > { %10188 = vmatpush3.bf16.msra.mxu0 %v11127_v45  ;;  %v5436_v45 = vrot.slane %v5434_v39, 1  ;;  %v5805_v39 = vshrl.u32 %v5742_v13, 16  ;;  %v5750_v13 = vld [vmem:[#allocation2 + $0xc0] sm:$0x80] }
 0x480   : > { %10189 = vmatprep.subr.bf16.mxu0 %v11128_v0 }
 0x481   : > { %v5437_v9 = vsel %vm1468_vm1, %v12577_v28, %v5436_v45  ;;  %v5461_v28 = vsel %vm1468_vm1, %v12607_v12, %v5460_v59  ;;  %v13565_v12 = vshll.u32 %v12624_v1, 16  ;;  %v5807_v27 = vrot.slane %v5805_v39, 7 }
 0x482   : > { %10158 = vmatmul.mubr.bf16.gmra.mrb[28].mxu0 %v5365_v2  ;;  %v5738_v2 = vld [vmem:[#allocation2 + $0x30] sm:$0x80]  ;;  %v5853_v39 = vshrl.u32 %v5750_v13, 16 }
 0x483   : > { %10161 = vmatprep.mubr.bf16.mxu0 %v5377_v57  ;;  %10190 = vmatpush3.bf16.msra.mxu0 %v11128_v0  ;;  %v5449_v0 = vsel %vm1468_vm1, %v12573_v18, %v5448_v31  ;;  %v5781_v57 = vshrl.u32 %v5738_v2, 16  ;;  %v12950_v21 = vor.u32 %v13565_v12, %v5799_v53  ;;  %v5817_v31 = vshrl.u32 %v5744_v29, 16  ;;  %v5752_v29 = vld [vmem:[#allocation2 + $0xd8] sm:$0x80] }
 0x484   : > { %10191 = vmatprep.subr.bf16.mxu0 %v11129_v49  ;;  %v13572_v53 = vshll.u32 %v12638_v41, 16 }
 0x485   : > { %v5803_v45 = vsel %vm776_vm0, %v5795_v22, %v12950_v21  ;;  %v5819_v23 = vrot.slane %v5817_v31, 7  ;;  %v13573_v22 = vshll.u32 %v12640_v32, 16  ;;  %v5865_v31 = vshrl.u32 %v5752_v29, 16 }
 0x487   : > { %10192 = vmatpush3.bf16.msra.mxu0 %v11129_v49  ;;  %v5778_v49 = vor.u32 %v13561_v15, %v5775_v24  ;;  %v13569_v24 = vshll.u32 %v12632_v4, 16  ;;  %v5748_v15 = vld [vmem:[#allocation2 + $0xa8] sm:$0x80] }
 0x488   : > { %10225 = vmatprep.subr.bf16.mxu0 %v11130_v25  ;;  %v5841_v46 = vshrl.u32 %v5748_v15, 16 }
 0x489   : > { %v5779_v18 = vsel %vm776_vm0, %v5771_v51, %v5778_v49  ;;  %v12972_v59 = vor.u32 %v13569_v24, %v5823_v36  ;;  %v5746_v51 = vld [vmem:[#allocation2 + $0x90] sm:$0x80]  ;;  %v5871_v36 = vrot.slane %v13575_v44, 7  ;;  %v5867_v24 = vrot.slane %v5865_v31, 7 }
 0x48a   : > { %10162 = vmatmul.mubr.bf16.gmra.mrb[32].mxu0 %v5389_v40  ;;  %v5783_v40 = vrot.slane %v5781_v57, 7  ;;  %v5829_v2 = vshrl.u32 %v5746_v51, 16  ;;  %v13577_v51 = vshll.u32 %v12662_v52, 16  ;;  %v13582_v31 = vshrl.u32 %v12676_v10, 16 }
 0x48b   : > { %10165 = vmatprep.mubr.bf16.mxu0 %v5401_v5  ;;  %v12946_v5 = vor.u32 %v13564_v50, %v5787_v11  ;;  %v5827_v57 = vsel %vm776_vm0, %v5819_v23, %v12972_v59  ;;  %v13571_v11 = vshrl.u32 %v12640_v32, 16  ;;  %v5843_v50 = vrot.slane %v5841_v46, 7 }
 0x48c   : > { %v5831_v33 = vrot.slane %v5829_v2, 7  ;;  %v13016_v15 = vor.u32 %v13577_v51, %v5871_v36  ;;  %v11137_v2 = vld [vmem:[%s13343_s3 + $0x138] sm:$0xff]   ;;  %v5907_v44 = vrot.slane %v13582_v31, 7  ;;  %v13584_v51 = vshll.u32 %v12676_v10, 16 }
 0x492   : > { %10166 = vmatmul.mubr.bf16.gmra.mrb[36].mxu0 %v5413_v63  ;;  %v5791_v63 = vsel %vm776_vm0, %v5783_v40, %v12946_v5 }
 0x493   : > { %10169 = vmatprep.mubr.bf16.mxu0 %v5425_v38  ;;  %v13566_v38 = vshrl.u32 %v12626_v30, 16 }
 0x495   : > { %v5811_v19 = vrot.slane %v13566_v38, 7  ;;  %v13574_v38 = vshrl.u32 %v12653_v34, 16 }
 0x49a   : > { %10170 = vmatmul.mubr.bf16.gmra.mrb[40].mxu0 %v5437_v9  ;;  %v11132_v9 = vld [vmem:[%s13343_s3 + $0x110] sm:$0xff]  }
 0x49b   : > { %10173 = vmatprep.mubr.bf16.mxu0 %v5449_v0  ;;  %v13568_v0 = vshll.u32 %v12626_v30, 16 }
 0x49d   : > { %v12968_v58 = vor.u32 %v13568_v0, %v5811_v19  ;;  %v5859_v19 = vrot.slane %v13574_v38, 7  ;;  %v13576_v0 = vshll.u32 %v12653_v34, 16  ;;  %v5760_v38 = vld [vmem:[#allocation2 + $0x138] sm:$0x80] }
 0x49f   : > { %v5815_v49 = vsel %vm776_vm0, %v5807_v27, %v12968_v58  ;;  %v5855_v27 = vrot.slane %v5853_v39, 7  ;;  %v13012_v23 = vor.u32 %v13576_v0, %v5859_v19  ;;  %v5758_v39 = vld [vmem:[#allocation2 + $0x120] sm:$0x80] }
 0x4a2   : > { %10174 = vmatmul.mubr.bf16.gmra.mrb[44].mxu0 %v5461_v28  ;;  %v5835_v28 = vrot.slane %v13570_v48, 7  ;;  %v5863_v48 = vsel %vm776_vm0, %v5855_v27, %v13012_v23  ;;  %v13583_v27 = vshrl.u32 %v12694_v47, 16 }
 0x4a3   : > { %10193 = vmatprep.mubr.bf16.mxu0 %v5779_v18  ;;  %v5847_v18 = vrot.slane %v13571_v11, 7  ;;  %v5875_v11 = vsel %vm776_vm0, %v5867_v24, %v13016_v15 }
 0x4a4   : > { %v12990_v40 = vor.u32 %v13572_v53, %v5835_v28  ;;  %v11138_v53 = vld [vmem:[%s13343_s3 + $0x140] sm:$0xff]   ;;  %v5919_v0 = vrot.slane %v13583_v27, 7  ;;  %v13590_v27 = vshrl.u32 %v12737_v55, 16 }
 0x4a5   : > { %v12994_v12 = vor.u32 %v13573_v22, %v5847_v18  ;;  %v13580_v22 = vshll.u32 %v12667_v35, 16 }
 0x4aa   : > { %10194 = vmatmul.mubr.bf16.vlgmr.msra.gmra.mrb[16].mxu0 %v5791_v63  ;;  %v5839_v63 = vsel %vm776_vm0, %v5831_v33, %v12990_v40 }
 0x4ab   : > { %10226 = vmatpush3.bf16.msra.mxu0 %v11130_v25  ;;  %10197 = vmatprep.mubr.bf16.mxu0 %v5803_v45  ;;  %v11133_v25 = vld [vmem:[%s13343_s3 + $0x118] sm:$0xff]   ;;  %v5851_v45 = vsel %vm776_vm0, %v5843_v50, %v12994_v12 }
 0x4ac   : > { %10227 = vmatprep.subr.bf16.mxu0 %v11131_v3 }
 0x4af   : > { %10228 = vmatpush3.bf16.msra.mxu0 %v11131_v3  ;;  %v11135_v3 = vld [vmem:[%s13343_s3 + $0x128] sm:$0xff]  }
 0x4b0   : > { %10229 = vmatprep.subr.bf16.mxu0 %v11132_v9 }
 0x4b2   : > { %10198 = vmatmul.mubr.bf16.gmra.mrb[20].mxu0 %v5815_v49  ;;  %v5756_v49 = vld [vmem:[#allocation2 + $0x108] sm:$0x80] }
 0x4b3   : > { %10201 = vmatprep.mubr.bf16.mxu0 %v5827_v57  ;;  %10230 = vmatpush3.bf16.msra.mxu0 %v11132_v9  ;;  %v11136_v9 = vld [vmem:[%s13343_s3 + $0x130] sm:$0xff]   ;;  %v13578_v57 = vshrl.u32 %v12667_v35, 16  ;;  %v5889_v18 = vshrl.u32 %v5756_v49, 16 }
 0x4b4   : > { %10231 = vmatprep.subr.bf16.mxu0 %v11133_v25 }
 0x4b5   : > { %v5883_v46 = vrot.slane %v13578_v57, 7  ;;  %v5891_v29 = vrot.slane %v5889_v18, 7  ;;  %v5764_v57 = vld [vmem:[#allocation2 + $0x168] sm:$0x80]  ;;  %v13586_v18 = vshrl.u32 %v12715_v8, 16 }
 0x4b7   : > { %10232 = vmatpush3.bf16.msra.mxu0 %v11133_v25  ;;  %v5754_v25 = vld [vmem:[#allocation2 + $0xf0] sm:$0x80]  ;;  %v13034_v13 = vor.u32 %v13580_v22, %v5883_v46  ;;  %v13587_v22 = vshrl.u32 %v12725_v62, 16 }
 0x4b8   : > { %10233 = vmatprep.subr.bf16.mxu0 %v11134_v16  ;;  %v5877_v28 = vshrl.u32 %v5754_v25, 16  ;;  %v13050_v25 = vor.u32 %v13584_v51, %v5907_v44  ;;  %v5766_v44 = vld [vmem:[#allocation2 + $0x180] sm:$0x80] }
 0x4ba   : > { %10202 = vmatmul.mubr.bf16.gmra.mrb[24].mxu0 %v5839_v63  ;;  %v5879_v50 = vrot.slane %v5877_v28, 7  ;;  %v5762_v28 = vld [vmem:[#allocation2 + $0x150] sm:$0x80] }
 0x4bb   : > { %10205 = vmatprep.mubr.bf16.mxu0 %v5851_v45  ;;  %10234 = vmatpush3.bf16.msra.mxu0 %v11134_v16  ;;  %v13579_v16 = vshrl.u32 %v12669_v56, 16  ;;  %v5901_v45 = vshrl.u32 %v5758_v39, 16  ;;  %v13588_v39 = vshll.u32 %v12715_v8, 16 }
 0x4bc   : > { %10235 = vmatprep.subr.bf16.mxu0 %v11135_v3  ;;  %v5887_v19 = vsel %vm776_vm0, %v5879_v50, %v13034_v13  ;;  %v5937_v50 = vshrl.u32 %v5764_v57, 16  ;;  %v11139_v57 = vld [vmem:[%s13343_s3 + $0x148] sm:$0xff]  }
 0x4bd   : > { %v5895_v33 = vrot.slane %v13579_v16, 7  ;;  %v5903_v24 = vrot.slane %v5901_v45, 7  ;;  %v5931_v16 = vrot.slane %v13586_v18, 7  ;;  %v13589_v45 = vshll.u32 %v12725_v62, 16 }
 0x4bf   : > { %10236 = vmatpush3.bf16.msra.mxu0 %v11135_v3  ;;  %v13581_v3 = vshll.u32 %v12669_v56, 16  ;;  %v5911_v46 = vsel %vm776_vm0, %v5903_v24, %v13050_v25 }
 0x4c0   : > { %10237 = vmatprep.subr.bf16.mxu0 %v11136_v9 }
 0x4c1   : > { %v13038_v63 = vor.u32 %v13581_v3, %v5895_v33 }
 0x4c2   : > { %10206 = vmatmul.mubr.bf16.gmra.mrb[28].mxu0 %v5863_v48 }
 0x4c3   : > { %10209 = vmatprep.mubr.bf16.mxu0 %v5875_v11  ;;  %10238 = vmatpush3.bf16.msra.mxu0 %v11136_v9  ;;  %v5899_v36 = vsel %vm776_vm0, %v5891_v29, %v13038_v63  ;;  %v5913_v9 = vshrl.u32 %v5760_v38, 16  ;;  %v5925_v11 = vshrl.u32 %v5762_v28, 16  ;;  %v5943_v29 = vrot.slane %v13587_v22, 7 }
 0x4c4   : > { %10239 = vmatprep.subr.bf16.mxu0 %v11137_v2  ;;  %v13066_v38 = vor.u32 %v13588_v39, %v5931_v16 }
 0x4c5   : > { %v5915_v49 = vrot.slane %v5913_v9, 7  ;;  %v5927_v3 = vrot.slane %v5925_v11, 7  ;;  %v13070_v31 = vor.u32 %v13589_v45, %v5943_v29  ;;  %v5949_v9 = vshrl.u32 %v5766_v44, 16  ;;  %v6497_v11 = vld [vmem:[#allocation2 + $0x58] sm:$0x1] }
 0x4c6   : > { %v13593_v29 = vld [vmem:[#allocation4_spill] sm:$0xff]  ;;  %v6503_v45 = vld [vmem:[#allocation2 + $0xa0] sm:$0x1] }
 0x4c7   : > { %10240 = vmatpush3.bf16.msra.mxu0 %v11137_v2  ;;  %v13585_v2 = vshll.u32 %v12694_v47, 16  ;;  %v5951_v51 = vrot.slane %v5949_v9, 7  ;;  %v6505_v44 = vld [vmem:[#allocation2 + $0xb8] sm:$0x1]  ;;  %v13594_v9 = vld [vmem:[#allocation5_spill] sm:$0xff] }
 0x4c8   : > { %10273 = vmatprep.subr.bf16.mxu0 %v11138_v53 }
 0x4c9   : > { %v13054_v48 = vor.u32 %v13585_v2, %v5919_v0  ;;  %v5955_v0 = vrot.slane %v13590_v27, 7 }
 0x4ca   : > { %10210 = vmatmul.mubr.bf16.gmra.mrb[32].mxu0 %v5887_v19  ;;  %v5939_v19 = vrot.slane %v5937_v50, 7 }
 0x4cb   : > { %10213 = vmatprep.mubr.bf16.mxu0 %v5899_v36  ;;  %v5923_v33 = vsel %vm776_vm0, %v5915_v49, %v13054_v48  ;;  %v5935_v36 = vsel %vm776_vm0, %v5927_v3, %v13066_v38  ;;  %v13591_v49 = vshll.u32 %v12737_v55, 16 }
 0x4cc   : > { %v5947_v24 = vsel %vm776_vm0, %v5939_v19, %v13070_v31 }
 0x4cd   : > { %v13080_v2 = vor.u32 %v13591_v49, %v5955_v0  ;;  %v6592_v0 = vshll.u32 %v6503_v45, 16  ;;  %v6604_v49 = vshll.u32 %v6505_v44, 16 }
 0x4cf   : > { %v5959_v28 = vsel %vm776_vm0, %v5951_v51, %v13080_v2 }
 0x4d2   : > { %10214 = vmatmul.mubr.bf16.gmra.mrb[36].mxu0 %v5911_v46  ;;  %v11140_v46 = vld [vmem:[%s13343_s3 + $0x150] sm:$0xff]  }
 0x4d3   : > { %10217 = vmatprep.mubr.bf16.mxu0 %v5923_v33  ;;  %v6501_v33 = vld [vmem:[#allocation2 + $0x88] sm:$0x1] }
 0x4d4   : > { %v6580_v3 = vshll.u32 %v6501_v33, 16 }
 0x4d6   : > { %v6582_v19 = vrot.slane %v6580_v3, 1  ;;  %v6517_v3 = vld [vmem:[#allocation2 + $0x148] sm:$0x1] }
 0x4da   : > { %10218 = vmatmul.mubr.bf16.gmra.mrb[40].mxu0 %v5935_v36  ;;  %v11149_v36 = vld [vmem:[%s13343_s3 + $0x198] sm:$0xff]  }
 0x4db   : > { %10221 = vmatprep.mubr.bf16.mxu0 %v5947_v24  ;;  %v13595_v24 = vld [vmem:[#allocation6_spill] sm:$0xff] }
 0x4dc   : > { %v6583_v51 = vsel %vm1468_vm1, %v13595_v24, %v6582_v19  ;;  %v6676_v19 = vshll.u32 %v6517_v3, 16  ;;  %v7002_v3 = vld [vmem:[#allocation2 + $0xc0] sm:$0x80] }
 0x4de   : > { %v6678_v44 = vrot.slane %v6676_v19, 1 }
 0x4e2   : > { %10222 = vmatmul.mubr.bf16.gmra.mrb[44].mxu0 %v5959_v28  ;;  %v11150_v28 = vld [vmem:[%s13343_s3 + $0x1a0] sm:$0xff]  }
 0x4e3   : > { %10241 = vmatprep.mubr.bf16.mxu0 %v12609_v37  ;;  %v11141_v37 = vld [vmem:[%s13343_s3 + $0x158] sm:$0xff]  }
 0x4ea   : > { %10242 = vmatmul.mubr.bf16.vlgmr.msra.gmra.mrb[16].mxu0 %v12611_v7  ;;  %v11142_v7 = vld [vmem:[%s13343_s3 + $0x160] sm:$0xff]  }
 0x4eb   : > { %10274 = vmatpush3.bf16.msra.mxu0 %v11138_v53  ;;  %10245 = vmatprep.mubr.bf16.mxu0 %v12624_v1  ;;  %v11143_v1 = vld [vmem:[%s13343_s3 + $0x168] sm:$0xff]   ;;  %v6495_v53 = vld [vmem:[#allocation2 + $0x40] sm:$0x1] }
 0x4ec   : > { %10275 = vmatprep.subr.bf16.mxu0 %v11139_v57  ;;  %v6544_v18 = vshll.u32 %v6495_v53, 16  ;;  %v11152_v53 = vld [vmem:[%s13343_s3 + $0x1b0] sm:$0xff]  }
 0x4ef   : > { %10276 = vmatpush3.bf16.msra.mxu0 %v11139_v57  ;;  %v6594_v57 = vrot.slane %v6592_v0, 1 }
 0x4f0   : > { %10277 = vmatprep.subr.bf16.mxu0 %v11140_v46 }
 0x4f2   : > { %10246 = vmatmul.mubr.bf16.gmra.mrb[20].mxu0 %v12626_v30  ;;  %v11144_v30 = vld [vmem:[%s13343_s3 + $0x170] sm:$0xff]  }
 0x4f3   : > { %10249 = vmatprep.mubr.bf16.mxu0 %v12632_v4  ;;  %10278 = vmatpush3.bf16.msra.mxu0 %v11140_v46  ;;  %v11145_v4 = vld [vmem:[%s13343_s3 + $0x178] sm:$0xff]   ;;  %v6606_v46 = vrot.slane %v6604_v49, 1 }
 0x4f4   : > { %10279 = vmatprep.subr.bf16.mxu0 %v11141_v37 }
 0x4f7   : > { %10280 = vmatpush3.bf16.msra.mxu0 %v11141_v37  ;;  %v6507_v37 = vld [vmem:[#allocation2 + $0xd0] sm:$0x1] }
 0x4f8   : > { %10281 = vmatprep.subr.bf16.mxu0 %v11142_v7 }
 0x4fa   : > { %10250 = vmatmul.mubr.bf16.gmra.mrb[24].mxu0 %v12638_v41  ;;  %v11146_v41 = vld [vmem:[%s13343_s3 + $0x180] sm:$0xff]  }
 0x4fb   : > { %10253 = vmatprep.mubr.bf16.mxu0 %v12640_v32  ;;  %10282 = vmatpush3.bf16.msra.mxu0 %v11142_v7  ;;  %v6493_v32 = vld [vmem:[#allocation2 + $0x28] sm:$0x1] }
 0x4fc   : > { %10283 = vmatprep.subr.bf16.mxu0 %v11143_v1  ;;  %v6509_v7 = vld [vmem:[#allocation2 + $0xe8] sm:$0x1] }
 0x4ff   : > { %10284 = vmatpush3.bf16.msra.mxu0 %v11143_v1  ;;  %v11151_v1 = vld [vmem:[%s13343_s3 + $0x1a8] sm:$0xff]  }
 0x500   : > { %10285 = vmatprep.subr.bf16.mxu0 %v11144_v30 }
 0x502   : > { %10254 = vmatmul.mubr.bf16.gmra.mrb[28].mxu0 %v12653_v34  ;;  %v6532_v34 = vshll.u32 %v6493_v32, 16  ;;  %v13597_v32 = vld [vmem:[#allocation8_spill] sm:$0xff] }
 0x503   : > { %10257 = vmatprep.mubr.bf16.mxu0 %v12662_v52  ;;  %10286 = vmatpush3.bf16.msra.mxu0 %v11144_v30  ;;  %v13596_v30 = vld [vmem:[#allocation7_spill] sm:$0xff] }
 0x504   : > { %10287 = vmatprep.subr.bf16.mxu0 %v11145_v4  ;;  %v6534_v52 = vrot.slane %v6532_v34, 1  ;;  %v6607_v34 = vsel %vm1468_vm1, %v13597_v32, %v6606_v46  ;;  %v6523_v46 = vld [vmem:[#allocation2 + $0x190] sm:$0x1] }
 0x507   : > { %10288 = vmatpush3.bf16.msra.mxu0 %v11145_v4  ;;  %v6595_v4 = vsel %vm1468_vm1, %v13596_v30, %v6594_v57 }
 0x508   : > { %10321 = vmatprep.subr.bf16.mxu0 %v11146_v41 }
 0x50a   : > { %10258 = vmatmul.mubr.bf16.gmra.mrb[32].mxu0 %v12667_v35  ;;  %v6535_v35 = vsel %vm1468_vm1, %v12683_v20, %v6534_v52  ;;  %v11148_v20 = vld [vmem:[%s13343_s3 + $0x190] sm:$0xff]   ;;  %v6628_v52 = vshll.u32 %v6509_v7, 16 }
 0x50b   : > { %10261 = vmatprep.mubr.bf16.mxu0 %v12669_v56  ;;  %v6556_v56 = vshll.u32 %v6497_v11, 16 }
 0x50d   : > { %v6558_v16 = vrot.slane %v6556_v56, 1  ;;  %v6513_v56 = vld [vmem:[#allocation2 + $0x118] sm:$0x1] }
 0x512   : > { %10262 = vmatmul.mubr.bf16.gmra.mrb[36].mxu0 %v12676_v10  ;;  %v6546_v10 = vrot.slane %v6544_v18, 1  ;;  %v6630_v18 = vrot.slane %v6628_v52, 1  ;;  %v6994_v52 = vld [vmem:[#allocation2 + $0x60] sm:$0x80] }
 0x513   : > { %10265 = vmatprep.mubr.bf16.mxu0 %v12694_v47  ;;  %v6499_v47 = vld [vmem:[#allocation2 + $0x70] sm:$0x1] }
 0x514   : > { %v6568_v22 = vshll.u32 %v6499_v47, 16 }
 0x516   : > { %v6570_v39 = vrot.slane %v6568_v22, 1 }
 0x518   : > { %v6571_v27 = vsel %vm1468_vm1, %v13594_v9, %v6570_v39  ;;  %v6521_v9 = vld [vmem:[#allocation2 + $0x178] sm:$0x1] }
 0x51a   : > { %10266 = vmatmul.mubr.bf16.gmra.mrb[40].mxu0 %v12715_v8  ;;  %v11147_v8 = vld [vmem:[%s13343_s3 + $0x188] sm:$0xff]  }
 0x51b   : > { %10269 = vmatprep.mubr.bf16.mxu0 %v12725_v62  ;;  %v13592_v62 = vld [vmem:[#allocation3_spill] sm:$0xff] }
 0x51c   : > { %v6547_v50 = vsel %vm1468_vm1, %v13592_v62, %v6546_v10  ;;  %v11153_v10 = vld [vmem:[%s13343_s3 + $0x1b8] sm:$0xff]   ;;  %v6652_v62 = vshll.u32 %v6513_v56, 16 }
 0x522   : > { %10270 = vmatmul.mubr.bf16.gmra.mrb[44].mxu0 %v12737_v55  ;;  %v6559_v55 = vsel %vm1468_vm1, %v13593_v29, %v6558_v16  ;;  %v13598_v16 = vld [vmem:[#allocation9_spill] sm:$0xff]  ;;  %v6654_v29 = vrot.slane %v6652_v62, 1 }
 0x523   : > { %10289 = vmatprep.mubr.bf16.mxu0 %v6535_v35  ;;  %v6511_v35 = vld [vmem:[#allocation2 + $0x100] sm:$0x1] }
 0x524   : > { %v6640_v33 = vshll.u32 %v6511_v35, 16  ;;  %v7047_v35 = vshrl.u32 %v6994_v52, 16 }
 0x526   : > { %v6642_v22 = vrot.slane %v6640_v33, 1 }
 0x52a   : > { %10290 = vmatmul.mubr.bf16.vlgmr.msra.gmra.mrb[16].mxu0 %v6547_v50  ;;  %v11154_v50 = vld [vmem:[%s13343_s3 + $0x1c0] sm:$0xff]  }
 0x52b   : > { %10322 = vmatpush3.bf16.msra.mxu0 %v11146_v41  ;;  %10293 = vmatprep.mubr.bf16.mxu0 %v6559_v55  ;;  %v6616_v41 = vshll.u32 %v6507_v37, 16  ;;  %v6515_v55 = vld [vmem:[#allocation2 + $0x130] sm:$0x1]  ;;  %v13601_v37 = vld [vmem:[#allocation12_spill] sm:$0xff] }
 0x52c   : > { %10323 = vmatprep.subr.bf16.mxu0 %v11147_v8  ;;  %v6664_v39 = vshll.u32 %v6515_v55, 16  ;;  %v7000_v55 = vld [vmem:[#allocation2 + $0xa8] sm:$0x80] }
 0x52d   : > { %v6618_v11 = vrot.slane %v6616_v41, 1 }
 0x52e   : > { %v6666_v45 = vrot.slane %v6664_v39, 1  ;;  %v7095_v39 = vshrl.u32 %v7002_v3, 16  ;;  %v11192_v3 = vld [vmem:[#allocation2 + $0xb0] sm:$0xff] }
 0x52f   : > { %10324 = vmatpush3.bf16.msra.mxu0 %v11147_v8  ;;  %v6619_v47 = vsel %vm1468_vm1, %v13598_v16, %v6618_v11  ;;  %v6631_v8 = vsel %vm1468_vm1, %v12760_v60, %v6630_v18  ;;  %v6655_v60 = vsel %vm1468_vm1, %v12769_v61, %v6654_v29  ;;  %v6990_v61 = vld [vmem:[#allocation2 + $0x30] sm:$0x80]  ;;  %v6996_v16 = vld [vmem:[#allocation2 + $0x78] sm:$0x80] }
 0x530   : > { %10325 = vmatprep.subr.bf16.mxu0 %v11148_v20 }
 0x532   : > { %10294 = vmatmul.mubr.bf16.gmra.mrb[20].mxu0 %v6571_v27  ;;  %v13599_v27 = vld [vmem:[#allocation10_spill] sm:$0xff] }
 0x533   : > { %10297 = vmatprep.mubr.bf16.mxu0 %v6583_v51  ;;  %10326 = vmatpush3.bf16.msra.mxu0 %v11148_v20  ;;  %v6643_v20 = vsel %vm1468_vm1, %v12764_v14, %v6642_v22  ;;  %v6667_v0 = vsel %vm1468_vm1, %v13599_v27, %v6666_v45  ;;  %v13600_v51 = vld [vmem:[#allocation11_spill] sm:$0xff]  ;;  %v6700_v14 = vshll.u32 %v6521_v9, 16  ;;  %v7097_v45 = vrot.slane %v7095_v39, 7  ;;  %v11195_v39 = vld [vmem:[#allocation2 + $0xf8] sm:$0xff] }
 0x534   : > { %10327 = vmatprep.subr.bf16.mxu0 %v11149_v36  ;;  %v6679_v49 = vsel %vm1468_vm1, %v13600_v51, %v6678_v44  ;;  %v7004_v44 = vld [vmem:[#allocation2 + $0xd8] sm:$0x80] }
 0x535   : > { %v6702_v57 = vrot.slane %v6700_v14, 1  ;;  %v7107_v9 = vshrl.u32 %v7004_v44, 16  ;;  %v7105_v27 = vsel %vm776_vm0, %v7097_v45, %v13012_v23  ;;  %v7008_v14 = vld [vmem:[#allocation2 + $0x108] sm:$0x80]  ;;  %v11198_v45 = vld [vmem:[#allocation2 + $0x140] sm:$0xff]  ;;  %v11199_v44 = vld [vmem:[#allocation2 + $0x158] sm:$0xff] }
 0x537   : > { %10328 = vmatpush3.bf16.msra.mxu0 %v11149_v36  ;;  %v6519_v36 = vld [vmem:[#allocation2 + $0x160] sm:$0x1]  ;;  %v6703_v30 = vsel %vm1468_vm1, %v12812_v42, %v6702_v57  ;;  %v6998_v42 = vld [vmem:[#allocation2 + $0x90] sm:$0x80]  ;;  %v7109_v51 = vrot.slane %v7107_v9, 7  ;;  %v7131_v57 = vshrl.u32 %v7008_v14, 16 }
 0x538   : > { %10329 = vmatprep.subr.bf16.mxu0 %v11150_v28  ;;  %v6688_v24 = vshll.u32 %v6519_v36, 16  ;;  %v7071_v62 = vshrl.u32 %v6998_v42, 16  ;;  %v7006_v36 = vld [vmem:[#allocation2 + $0xf0] sm:$0x80] }
 0x539   : > { %v7117_v23 = vsel %vm776_vm0, %v7109_v51, %v13016_v15  ;;  %v11200_v9 = vld [vmem:[#allocation2 + $0x170] sm:$0xff]  ;;  %v11201_v51 = vld [vmem:[#allocation2 + $0x188] sm:$0xff] }
 0x53a   : > { %10298 = vmatmul.mubr.bf16.gmra.mrb[24].mxu0 %v6595_v4  ;;  %v7023_v4 = vshrl.u32 %v6990_v61, 16  ;;  %v7073_v29 = vrot.slane %v7071_v62, 7  ;;  %v11187_v62 = vld [vmem:[#allocation2 + $0x38] sm:$0xff] }
 0x53b   : > { %10301 = vmatprep.mubr.bf16.mxu0 %v6607_v34  ;;  %10330 = vmatpush3.bf16.msra.mxu0 %v11150_v28  ;;  %v6690_v28 = vrot.slane %v6688_v24, 1  ;;  %v6992_v34 = vld [vmem:[#allocation2 + $0x48] sm:$0x80]  ;;  %v11160_v24 = vld [vmem:[%s13343_s3 + $0x1f0] sm:$0xff]  }
 0x53c   : > { %10331 = vmatprep.subr.bf16.mxu0 %v11151_v1  ;;  %v7025_v32 = vrot.slane %v7023_v4, 7  ;;  %v7035_v11 = vshrl.u32 %v6992_v34, 16  ;;  %v7014_v4 = vld [vmem:[#allocation2 + $0x150] sm:$0x80] }
 0x53d   : > { %v6691_v7 = vsel %vm1468_vm1, %v13601_v37, %v6690_v28  ;;  %v7010_v28 = vld [vmem:[#allocation2 + $0x120] sm:$0x80] }
 0x53e   : > { %v7033_v18 = vsel %vm776_vm0, %v7025_v32, %v12946_v5  ;;  %v7037_v56 = vrot.slane %v7035_v11, 7  ;;  %v11156_v5 = vld [vmem:[%s13343_s3 + $0x1d0] sm:$0xff]   ;;  %v7143_v61 = vshrl.u32 %v7010_v28, 16  ;;  %v11162_v37 = vld [vmem:[%s13343_s3 + $0x200] sm:$0xff]   ;;  %v7167_v32 = vshrl.u32 %v7014_v4, 16 }
 0x53f   : > { %10332 = vmatpush3.bf16.msra.mxu0 %v11151_v1  ;;  %v6712_v1 = vshll.u32 %v6523_v46, 16  ;;  %v7018_v11 = vld [vmem:[#allocation2 + $0x180] sm:$0x80] }
 0x540   : > { %10333 = vmatprep.subr.bf16.mxu0 %v11152_v53  ;;  %v7045_v33 = vsel %vm776_vm0, %v7037_v56, %v12950_v21  ;;  %v11157_v21 = vld [vmem:[%s13343_s3 + $0x1d8] sm:$0xff]   ;;  %v7169_v52 = vrot.slane %v7167_v32, 7 }
 0x541   : > { %v6714_v41 = vrot.slane %v6712_v1, 1  ;;  %v7145_v1 = vrot.slane %v7143_v61, 7  ;;  %v7751_v61 = vld [vmem:[#allocation2 + $0x70] sm:$0x1]  ;;  %v7754_v32 = vld [vmem:[#allocation2 + $0x98] sm:$0xff] }
 0x542   : > { %10302 = vmatmul.mubr.bf16.gmra.mrb[28].mxu0 %v6619_v47  ;;  %v11155_v47 = vld [vmem:[%s13343_s3 + $0x1c8] sm:$0xff]   ;;  %v7177_v56 = vsel %vm776_vm0, %v7169_v52, %v13066_v38 }
 0x543   : > { %10305 = vmatprep.mubr.bf16.mxu0 %v6631_v8  ;;  %10334 = vmatpush3.bf16.msra.mxu0 %v11152_v53  ;;  %v6715_v53 = vsel %vm1468_vm1, %v12818_v17, %v6714_v41  ;;  %v7059_v8 = vshrl.u32 %v6996_v16, 16 }
 0x544   : > { %10335 = vmatprep.subr.bf16.mxu0 %v11153_v10 }
 0x545   : > { %v7061_v22 = vrot.slane %v7059_v8, 7 }
 0x547   : > { %10336 = vmatpush3.bf16.msra.mxu0 %v11153_v10  ;;  %v7049_v10 = vrot.slane %v7047_v35, 7 }
 0x548   : > { %10369 = vmatprep.subr.bf16.mxu0 %v11154_v50 }
 0x549   : > { %v7057_v17 = vsel %vm776_vm0, %v7049_v10, %v12968_v58  ;;  %v7069_v58 = vsel %vm776_vm0, %v7061_v22, %v12972_v59  ;;  %v11159_v59 = vld [vmem:[%s13343_s3 + $0x1e8] sm:$0xff]   ;;  %v7020_v10 = vld [vmem:[#allocation2 + $0x198] sm:$0x80] }
 0x54a   : > { %10306 = vmatmul.mubr.bf16.gmra.mrb[32].mxu0 %v6643_v20  ;;  %v7081_v20 = vsel %vm776_vm0, %v7073_v29, %v12990_v40  ;;  %v11191_v22 = vld [vmem:[#allocation2 + $0x98] sm:$0xff]  ;;  %v11166_v29 = vld [vmem:[%s13343_s3 + $0x220] sm:$0xff]  }
 0x54b   : > { %10309 = vmatprep.mubr.bf16.mxu0 %v6655_v60  ;;  %v11158_v60 = vld [vmem:[%s13343_s3 + $0x1e0] sm:$0xff]  }
 0x552   : > { %10310 = vmatmul.mubr.bf16.gmra.mrb[36].mxu0 %v6667_v0  ;;  %v7119_v0 = vshrl.u32 %v7006_v36, 16  ;;  %v7746_v36 = vld [vmem:[#allocation2 + $0x38] sm:$0xff] }
 0x553   : > { %10313 = vmatprep.mubr.bf16.mxu0 %v6679_v49  ;;  %v7779_v14 = vshrl.u32 %v7746_v36, 16 }
 0x554   : > { %v7121_v49 = vrot.slane %v7119_v0, 7 }
 0x556   : > { %v7129_v46 = vsel %vm776_vm0, %v7121_v49, %v13034_v13  ;;  %v7153_v13 = vsel %vm776_vm0, %v7145_v1, %v13050_v25  ;;  %v7203_v25 = vshrl.u32 %v7020_v10, 16  ;;  %v7750_v49 = vld [vmem:[#allocation2 + $0x68] sm:$0xff]  ;;  %v7755_v10 = vld [vmem:[#allocation2 + $0xa0] sm:$0x1] }
 0x557   : > { %v11202_v1 = vld [vmem:[#allocation2 + $0x8] sm:$0xff] }
 0x558   : > { %v7205_v8 = vrot.slane %v7203_v25, 7 }
 0x55a   : > { %10314 = vmatmul.mubr.bf16.gmra.mrb[40].mxu0 %v6691_v7  ;;  %v7133_v7 = vrot.slane %v7131_v57, 7  ;;  %v7749_v57 = vld [vmem:[#allocation2 + $0x58] sm:$0x1] }
 0x55b   : > { %10317 = vmatprep.mubr.bf16.mxu0 %v6703_v30  ;;  %v7012_v30 = vld [vmem:[#allocation2 + $0x138] sm:$0x80] }
 0x55c   : > { %v7141_v15 = vsel %vm776_vm0, %v7133_v7, %v13038_v63  ;;  %v7155_v41 = vshrl.u32 %v7012_v30, 16  ;;  %v7191_v63 = vshrl.u32 %v7018_v11, 16  ;;  %v7798_v7 = vshll.u32 %v7749_v57, 16  ;;  %v7764_v57 = vld [vmem:[#allocation2 + $0x110] sm:$0xff] }
 0x55e   : > { %v7157_v34 = vrot.slane %v7155_v41, 7  ;;  %v7193_v42 = vrot.slane %v7191_v63, 7  ;;  %v7752_v41 = vld [vmem:[#allocation2 + $0x80] sm:$0xff]  ;;  %v7829_v63 = vshll.u32 %v7754_v32, 16 }
 0x55f   : > { %v7817_v11 = vshll.u32 %v7752_v41, 16 }
 0x562   : > { %10318 = vmatmul.mubr.bf16.gmra.mrb[44].mxu0 %v6715_v53  ;;  %v7016_v53 = vld [vmem:[#allocation2 + $0x168] sm:$0x80] }
 0x563   : > { %10337 = vmatprep.mubr.bf16.mxu0 %v7033_v18  ;;  %v7165_v18 = vsel %vm776_vm0, %v7157_v34, %v13054_v48  ;;  %v7179_v35 = vshrl.u32 %v7016_v53, 16  ;;  %v7201_v48 = vsel %vm776_vm0, %v7193_v42, %v13080_v2  ;;  %v11190_v2 = vld [vmem:[#allocation2 + $0x80] sm:$0xff]  ;;  %v7803_v34 = vshrl.u32 %v7750_v49, 16 }
 0x564   : > { %v7800_v53 = vrot.slane %v7798_v7, 1  ;;  %v7819_v42 = vrot.slane %v7817_v11, 1 }
 0x565   : > { %v7181_v16 = vrot.slane %v7179_v35, 7 }
 0x56a   : > { %10338 = vmatmul.mubr.bf16.vlgmr.msra.gmra.mrb[16].mxu0 %v7045_v33  ;;  %v7189_v33 = vsel %vm776_vm0, %v7181_v16, %v13070_v31  ;;  %v11189_v31 = vld [vmem:[#allocation2 + $0x68] sm:$0xff] }
 0x56b   : > { %10370 = vmatpush3.bf16.msra.mxu0 %v11154_v50  ;;  %10341 = vmatprep.mubr.bf16.mxu0 %v7057_v17  ;;  %v7083_v50 = vshrl.u32 %v7000_v55, 16  ;;  %v11167_v55 = vld [vmem:[%s13343_s3 + $0x228] sm:$0xff]  }
 0x56c   : > { %10371 = vmatprep.subr.bf16.mxu0 %v11155_v47 }
 0x56d   : > { %v7085_v19 = vrot.slane %v7083_v50, 7  ;;  %v11169_v50 = vld [vmem:[%s13343_s3 + $0x238] sm:$0xff]  }
 0x56f   : > { %10372 = vmatpush3.bf16.msra.mxu0 %v11155_v47  ;;  %v7093_v40 = vsel %vm776_vm0, %v7085_v19, %v12994_v12  ;;  %v11161_v12 = vld [vmem:[%s13343_s3 + $0x1f8] sm:$0xff]   ;;  %v7209_v47 = vrot.slane %v5271_v26, 7  ;;  %v11163_v26 = vld [vmem:[%s13343_s3 + $0x208] sm:$0xff]  }
 0x570   : > { %10373 = vmatprep.subr.bf16.mxu0 %v11156_v5  ;;  %v11197_v19 = vld [vmem:[#allocation2 + $0x128] sm:$0xff] }
 0x571   : > { %v7212_v38 = vor.u32 %v7209_v47, %v5273_v54  ;;  %v11165_v54 = vld [vmem:[%s13343_s3 + $0x218] sm:$0xff]  }
 0x572   : > { %10342 = vmatmul.mubr.bf16.gmra.mrb[20].mxu0 %v7069_v58  ;;  %v11168_v58 = vld [vmem:[%s13343_s3 + $0x230] sm:$0xff]  }
 0x573   : > { %10345 = vmatprep.mubr.bf16.mxu0 %v7081_v20  ;;  %10374 = vmatpush3.bf16.msra.mxu0 %v11156_v5  ;;  %v7213_v17 = vsel %vm776_vm0, %v7205_v8, %v7212_v38  ;;  %v11188_v5 = vld [vmem:[#allocation2 + $0x50] sm:$0xff]  ;;  %v11194_v20 = vld [vmem:[#allocation2 + $0xe0] sm:$0xff]  ;;  %v7815_v38 = vshrl.u32 %v7752_v41, 16  ;;  %v7765_v41 = vld [vmem:[#allocation2 + $0x118] sm:$0x1] }
 0x574   : > { %10375 = vmatprep.subr.bf16.mxu0 %v11157_v21  ;;  %v7756_v8 = vld [vmem:[#allocation2 + $0xb0] sm:$0xff] }
 0x577   : > { %10376 = vmatpush3.bf16.msra.mxu0 %v11157_v21  ;;  %v11193_v21 = vld [vmem:[#allocation2 + $0xc8] sm:$0xff] }
 0x578   : > { %10377 = vmatprep.subr.bf16.mxu0 %v11158_v60 }
 0x57a   : > { %10346 = vmatmul.mubr.bf16.gmra.mrb[24].mxu0 %v7093_v40  ;;  %v7747_v40 = vld [vmem:[#allocation2 + $0x40] sm:$0x1] }
 0x57b   : > { %10349 = vmatprep.mubr.bf16.mxu0 %v7105_v27  ;;  %10378 = vmatpush3.bf16.msra.mxu0 %v11158_v60  ;;  %v11196_v60 = vld [vmem:[#allocation2 + $0x110] sm:$0xff]  ;;  %v7786_v0 = vshll.u32 %v7747_v40, 16 }
 0x57c   : > { %10379 = vmatprep.subr.bf16.mxu0 %v11159_v59 }
 0x57f   : > { %10380 = vmatpush3.bf16.msra.mxu0 %v11159_v59  ;;  %v7781_v59 = vshll.u32 %v7746_v36, 16 }
 0x580   : > { %10381 = vmatprep.subr.bf16.mxu0 %v11160_v24 }
 0x581   : > { %v7783_v27 = vrot.slane %v7781_v59, 1 }
 0x582   : > { %10350 = vmatmul.mubr.bf16.gmra.mrb[28].mxu0 %v7117_v23  ;;  %v7788_v23 = vrot.slane %v7786_v0, 1 }
 0x583   : > { %10353 = vmatprep.mubr.bf16.mxu0 %v7129_v46  ;;  %10382 = vmatpush3.bf16.msra.mxu0 %v11160_v24  ;;  %v7748_v24 = vld [vmem:[#allocation2 + $0x50] sm:$0xff]  ;;  %v7805_v46 = vshll.u32 %v7750_v49, 16 }
 0x584   : > { %10383 = vmatprep.subr.bf16.mxu0 %v11161_v12  ;;  %v7793_v28 = vshll.u32 %v7748_v24, 16 }
 0x585   : > { %v7807_v4 = vrot.slane %v7805_v46, 1 }
 0x587   : > { %10384 = vmatpush3.bf16.msra.mxu0 %v11161_v12  ;;  %v7784_v12 = vor.u32 %v7783_v27, %v7779_v14  ;;  %v7761_v27 = vld [vmem:[#allocation2 + $0xe8] sm:$0x1] }
 0x588   : > { %10417 = vmatprep.subr.bf16.mxu0 %v11162_v37  ;;  %v7870_v14 = vshll.u32 %v7761_v27, 16 }
 0x589   : > { %v7789_v30 = vsel %vm1468_vm1, %v7784_v12, %v7788_v23 }
 0x58a   : > { %10354 = vmatmul.mubr.bf16.gmra.mrb[32].mxu0 %v7141_v15  ;;  %v7810_v15 = vshll.u32 %v7751_v61, 16  ;;  %v7766_v61 = vld [vmem:[#allocation2 + $0x128] sm:$0xff] }
 0x58b   : > { %10357 = vmatprep.mubr.bf16.mxu0 %v7153_v13  ;;  %v7791_v13 = vshrl.u32 %v7748_v24, 16  ;;  %v7763_v24 = vld [vmem:[#allocation2 + $0x100] sm:$0x1] }
 0x58c   : > { %v7812_v35 = vrot.slane %v7810_v15, 1  ;;  %v7882_v23 = vshll.u32 %v7763_v24, 16  ;;  %v7777_v24 = vld [vmem:[#allocation2 + $0x1a8] sm:$0x1] }
 0x58e   : > { %v7884_v15 = vrot.slane %v7882_v23, 1 }
 0x592   : > { %10358 = vmatmul.mubr.bf16.gmra.mrb[36].mxu0 %v7165_v18  ;;  %v7808_v18 = vor.u32 %v7807_v4, %v7803_v34 }
 0x593   : > { %10361 = vmatprep.mubr.bf16.mxu0 %v7177_v56  ;;  %v7753_v56 = vld [vmem:[#allocation2 + $0x88] sm:$0x1] }
 0x594   : > { %v7822_v25 = vshll.u32 %v7753_v56, 16  ;;  %v7813_v47 = vsel %vm1468_vm1, %v7808_v18, %v7812_v35  ;;  %v7768_v56 = vld [vmem:[#allocation2 + $0x140] sm:$0xff] }
 0x59a   : > { %10362 = vmatmul.mubr.bf16.gmra.mrb[40].mxu0 %v7189_v33  ;;  %v7831_v33 = vrot.slane %v7829_v63, 1  ;;  %v7887_v63 = vshrl.u32 %v7764_v57, 16 }
 0x59b   : > { %10365 = vmatprep.mubr.bf16.mxu0 %v7201_v48  ;;  %v7834_v48 = vshll.u32 %v7755_v10, 16  ;;  %v7770_v10 = vld [vmem:[#allocation2 + $0x158] sm:$0xff] }
 0x5a2   : > { %10366 = vmatmul.mubr.bf16.gmra.mrb[44].mxu0 %v7213_v17  ;;  %v7758_v17 = vld [vmem:[#allocation2 + $0xc8] sm:$0xff] }
 0x5a3   : > { %10385 = vmatprep.mubr.bf16.mxu0 %v11187_v62  ;;  %v7827_v62 = vshrl.u32 %v7754_v32, 16  ;;  %v7767_v32 = vld [vmem:[#allocation2 + $0x130] sm:$0x1] }
 0x5a4   : > { %v7906_v35 = vshll.u32 %v7767_v32, 16 }
 0x5aa   : > { %10386 = vmatmul.mubr.bf16.vlgmr.msra.gmra.mrb[16].mxu0 %v11188_v5  ;;  %v7824_v5 = vrot.slane %v7822_v25, 1 }
 0x5ab   : > { %10418 = vmatpush3.bf16.msra.mxu0 %v11162_v37  ;;  %10389 = vmatprep.mubr.bf16.mxu0 %v11189_v31  ;;  %v7795_v37 = vrot.slane %v7793_v28, 1  ;;  %v7841_v31 = vshll.u32 %v7756_v8, 16 }
 0x5ac   : > { %10419 = vmatprep.subr.bf16.mxu0 %v11163_v26 }
 0x5ad   : > { %v7796_v52 = vor.u32 %v7795_v37, %v7791_v13  ;;  %v7901_v13 = vshll.u32 %v7766_v61, 16 }
 0x5af   : > { %10420 = vmatpush3.bf16.msra.mxu0 %v11163_v26  ;;  %v7801_v16 = vsel %vm1468_vm1, %v7796_v52, %v7800_v53  ;;  %v7820_v26 = vor.u32 %v7819_v42, %v7815_v38  ;;  %v7894_v53 = vshll.u32 %v7765_v41, 16  ;;  %v7903_v18 = vrot.slane %v7901_v13, 1 }
 0x5b0   : > { %10421 = vmatprep.subr.bf16.mxu0 %v11164_v6  ;;  %v7925_v38 = vshll.u32 %v7770_v10, 16 }
 0x5b1   : > { %v7896_v25 = vrot.slane %v7894_v53, 1 }
 0x5b2   : > { %10390 = vmatmul.mubr.bf16.gmra.mrb[20].mxu0 %v11190_v2  ;;  %v7757_v2 = vld [vmem:[#allocation2 + $0xb8] sm:$0x1] }
 0x5b3   : > { %10393 = vmatprep.mubr.bf16.mxu0 %v11191_v22  ;;  %10422 = vmatpush3.bf16.msra.mxu0 %v11164_v6  ;;  %v7832_v6 = vor.u32 %v7831_v33, %v7827_v62  ;;  %v7853_v22 = vshll.u32 %v7758_v17, 16 }
 0x5b4   : > { %10423 = vmatprep.subr.bf16.mxu0 %v11165_v54 }
 0x5b7   : > { %10424 = vmatpush3.bf16.msra.mxu0 %v11165_v54  ;;  %v7836_v54 = vrot.slane %v7834_v48, 1  ;;  %v7908_v48 = vrot.slane %v7906_v35, 1 }
 0x5b8   : > { %10425 = vmatprep.subr.bf16.mxu0 %v11166_v29 }
 0x5ba   : > { %10394 = vmatmul.mubr.bf16.gmra.mrb[24].mxu0 %v11192_v3  ;;  %v7843_v3 = vrot.slane %v7841_v31, 1 }
 0x5bb   : > { %10397 = vmatprep.mubr.bf16.mxu0 %v11193_v21  ;;  %10426 = vmatpush3.bf16.msra.mxu0 %v11166_v29  ;;  %v7759_v29 = vld [vmem:[#allocation2 + $0xd0] sm:$0x1]  ;;  %v7846_v21 = vshll.u32 %v7757_v2, 16 }
 0x5bc   : > { %10427 = vmatprep.subr.bf16.mxu0 %v11167_v55  ;;  %v7772_v2 = vld [vmem:[#allocation2 + $0x170] sm:$0xff] }
 0x5bd   : > { %v7848_v36 = vrot.slane %v7846_v21, 1  ;;  %v7935_v27 = vshrl.u32 %v7772_v2, 16 }
 0x5bf   : > { %10428 = vmatpush3.bf16.msra.mxu0 %v11167_v55  ;;  %v7825_v55 = vsel %vm1468_vm1, %v7820_v26, %v7824_v5 }
 0x5c0   : > { %10429 = vmatprep.subr.bf16.mxu0 %v11168_v58 }
 0x5c2   : > { %10398 = vmatmul.mubr.bf16.gmra.mrb[28].mxu0 %v11194_v20  ;;  %v7858_v20 = vshll.u32 %v7759_v29, 16  ;;  %v7774_v29 = vld [vmem:[#allocation2 + $0x188] sm:$0xff] }
 0x5c3   : > { %10401 = vmatprep.mubr.bf16.mxu0 %v11195_v39  ;;  %10430 = vmatpush3.bf16.msra.mxu0 %v11168_v58  ;;  %v7837_v58 = vsel %vm1468_vm1, %v7832_v6, %v7836_v54  ;;  %v7760_v39 = vld [vmem:[#allocation2 + $0xe0] sm:$0xff]  ;;  %v7927_v6 = vrot.slane %v7925_v38, 1 }
 0x5c4   : > { %10431 = vmatprep.subr.bf16.mxu0 %v11169_v50  ;;  %v7865_v59 = vshll.u32 %v7760_v39, 16  ;;  %v7863_v46 = vshrl.u32 %v7760_v39, 16  ;;  %v7773_v39 = vld [vmem:[#allocation2 + $0x178] sm:$0x1] }
 0x5c6   : > { %v7867_v49 = vrot.slane %v7865_v59, 1 }
 0x5c7   : > { %10432 = vmatpush3.bf16.msra.mxu0 %v11169_v50  ;;  %v7855_v50 = vrot.slane %v7853_v22, 1  ;;  %v7911_v22 = vshrl.u32 %v7768_v56, 16 }
 0x5c8   : > { %v7868_v7 = vor.u32 %v7867_v49, %v7863_v46 }
 0x5ca   : > { %10402 = vmatmul.mubr.bf16.gmra.mrb[32].mxu0 %v11196_v60  ;;  %v7839_v60 = vshrl.u32 %v7756_v8, 16  ;;  %v7769_v8 = vld [vmem:[#allocation2 + $0x148] sm:$0x1] }
 0x5cb   : > { %10405 = vmatprep.mubr.bf16.mxu0 %v11197_v19  ;;  %v7762_v19 = vld [vmem:[#allocation2 + $0xf8] sm:$0xff]  ;;  %v7918_v5 = vshll.u32 %v7769_v8, 16 }
 0x5cc   : > { %v7877_v0 = vshll.u32 %v7762_v19, 16  ;;  %v7875_v37 = vshrl.u32 %v7762_v19, 16  ;;  %v7775_v19 = vld [vmem:[#allocation2 + $0x190] sm:$0x1] }
 0x5cd   : > { %v7920_v21 = vrot.slane %v7918_v5, 1 }
 0x5ce   : > { %v7879_v12 = vrot.slane %v7877_v0, 1  ;;  %v7947_v0 = vshrl.u32 %v7774_v29, 16 }
 0x5d0   : > { %v7880_v4 = vor.u32 %v7879_v12, %v7875_v37  ;;  %v7966_v12 = vshll.u32 %v7777_v24, 16 }
 0x5d2   : > { %10406 = vmatmul.mubr.bf16.gmra.mrb[36].mxu0 %v11198_v45  ;;  %v7851_v45 = vshrl.u32 %v7758_v17, 16  ;;  %v7885_v11 = vsel %vm1468_vm1, %v7880_v4, %v7884_v15  ;;  %v7771_v17 = vld [vmem:[#allocation2 + $0x160] sm:$0x1]  ;;  %v7968_v46 = vrot.slane %v7966_v12, 1 }
 0x5d3   : > { %10409 = vmatprep.mubr.bf16.mxu0 %v11199_v44  ;;  %v7844_v44 = vor.u32 %v7843_v3, %v7839_v60  ;;  %v7930_v54 = vshll.u32 %v7771_v17, 16  ;;  %v7949_v60 = vshll.u32 %v7774_v29, 16 }
 0x5d4   : > { %v7856_v40 = vor.u32 %v7855_v50, %v7851_v45 }
 0x5da   : > { %10410 = vmatmul.mubr.bf16.gmra.mrb[40].mxu0 %v11200_v9  ;;  %v7860_v9 = vrot.slane %v7858_v20, 1  ;;  %v7932_v20 = vrot.slane %v7930_v54, 1 }
 0x5db   : > { %10413 = vmatprep.mubr.bf16.mxu0 %v11201_v51  ;;  %v7849_v51 = vsel %vm1468_vm1, %v7844_v44, %v7848_v36  ;;  %v7942_v36 = vshll.u32 %v7773_v39, 16 }
 0x5dc   : > { %v7861_v28 = vsel %vm1468_vm1, %v7856_v40, %v7860_v9  ;;  %v7951_v40 = vrot.slane %v7949_v60, 1  ;;  %v7954_v9 = vshll.u32 %v7775_v19, 16 }
 0x5dd   : > { %v7944_v49 = vrot.slane %v7942_v36, 1 }
 0x5e2   : > { %10414 = vmatmul.mubr.bf16.gmra.mrb[44].mxu0 %v11202_v1  ;;  %v7872_v1 = vrot.slane %v7870_v14, 1  ;;  %v7952_v14 = vor.u32 %v7951_v40, %v7947_v0 }
 0x5e3   : > { %10433 = vmatprep.mubr.bf16.mxu0 %v7789_v30  ;;  %v7889_v30 = vshll.u32 %v7764_v57, 16 }
 0x5e4   : > { %v7873_v34 = vsel %vm1468_vm1, %v7868_v7, %v7872_v1  ;;  %v13280_v7 = vld [vmem:[%s13346_s6] ss:$0 sm:$0xff] }
 0x5e5   : > { %v7891_v52 = vrot.slane %v7889_v30, 1 }
 0x5e7   : > { %v7892_v42 = vor.u32 %v7891_v52, %v7887_v63 }
 0x5e9   : > { %v7897_v62 = vsel %vm1468_vm1, %v7892_v42, %v7896_v25 }
 0x5ea   : > { %10434 = vmatmul.mubr.bf16.vlgmr.msra.gmra.mrb[16].mxu0 %v7801_v16  ;;  %v7899_v16 = vshrl.u32 %v7766_v61, 16  ;;  %v7969_v61 = vsel %vm1468_vm1, %v12873_v43, %v7968_v46 }
 0x5eb   : > { %10437 = vmatprep.mubr.bf16.mxu0 %v7813_v47  ;;  %v7913_v47 = vshll.u32 %v7768_v56, 16 }
 0x5ec   : > { %v7904_v33 = vor.u32 %v7903_v18, %v7899_v16 }
 0x5ed   : > { %v7915_v26 = vrot.slane %v7913_v47, 1 }
 0x5ee   : > { %v7909_v31 = vsel %vm1468_vm1, %v7904_v33, %v7908_v48 }
 0x5ef   : > { %v7916_v3 = vor.u32 %v7915_v26, %v7911_v22 }
 0x5f1   : > { %v7921_v45 = vsel %vm1468_vm1, %v7916_v3, %v7920_v21 }
 0x5f2   : > { %10438 = vmatmul.mubr.bf16.gmra.mrb[20].mxu0 %v7825_v55  ;;  %v7923_v55 = vshrl.u32 %v7770_v10, 16 }
 0x5f3   : > { %10441 = vmatprep.mubr.bf16.mxu0 %v7837_v58  ;;  %v7937_v58 = vshll.u32 %v7772_v2, 16 }
 0x5f4   : > { %v7928_v50 = vor.u32 %v7927_v6, %v7923_v55 }
 0x5f5   : > { %v7939_v44 = vrot.slane %v7937_v58, 1 }
 0x5f6   : > { %v7933_v59 = vsel %vm1468_vm1, %v7928_v50, %v7932_v20 }
 0x5fa   : > { %10442 = vmatmul.mubr.bf16.gmra.mrb[24].mxu0 %v7849_v51  ;;  %v7940_v51 = vor.u32 %v7939_v44, %v7935_v27 }
 0x5fb   : > { %10445 = vmatprep.mubr.bf16.mxu0 %v7861_v28  ;;  %v7956_v28 = vrot.slane %v7954_v9, 1 }
 0x5fc   : > { %v7945_v23 = vsel %vm1468_vm1, %v7940_v51, %v7944_v49 }
 0x5fd   : > { %v7957_v57 = vsel %vm1468_vm1, %v7952_v14, %v7956_v28 }
 0x602   : > { %10446 = vmatmul.mubr.bf16.gmra.mrb[28].mxu0 %v7873_v34 }
 0x603   : > { %10449 = vmatprep.mubr.bf16.mxu0 %v7885_v11 }
 0x60a   : > { %10450 = vmatmul.mubr.bf16.gmra.mrb[32].mxu0 %v7897_v62 }
 0x60b   : > { %10453 = vmatprep.mubr.bf16.mxu0 %v7909_v31 }
 0x612   : > { %10454 = vmatmul.mubr.bf16.gmra.mrb[36].mxu0 %v7921_v45 }
 0x613   : > { %10457 = vmatprep.mubr.bf16.mxu0 %v7933_v59 }
 0x61a   : > { %10458 = vmatmul.mubr.bf16.gmra.mrb[40].mxu0 %v7945_v23 }
 0x61b   : > { %10461 = vmatprep.mubr.bf16.mxu0 %v7957_v57 }
 0x622   : > { %10462 = vmatmul.mubr.bf16.gmra.mrb[44].mxu0 %v7969_v61 }
 0x6bd   : > { %v10435_v37 = vpop.f32.mrb[16].mxu0 }
 0x6be   : > { %v8085_v1 = vpop.f32.mrb[17].mxu0  ;;  %v8253_v4 = vadd.f32 %v10435_v37, %v13280_v7 }
 0x6bf   : > { %v10436_v30 = vpop.f32.mrb[18].mxu0  ;;  %v8251_v13 = vadd.f32 %v13280_v7, %v8085_v1 }
 0x6c0   : > { %v8254_v15 = vadd.f32 %v10436_v30, %v13280_v7  ;;  %v8088_v41 = vpop.f32.mrb[19].mxu0 }
 0x6c1   : > { %v8252_v43 = vadd.f32 %v13280_v7, %v8088_v41 }
 0x6c2   : > { %v9010_v32 = vpack.c.bf16 %v8254_v15, %v8253_v4 }
 0x6c3   : > { %v9005_v34 = vpack.c.bf16 %v8252_v43, %v8251_v13 }
 0x6c4   : > { %9082 = vst [vmem:[%s13290_s19 + $0x8] sm:$0xff] %v9010_v32  }
 0x6c5   : > { %9006 = vst [vmem:[%s13290_s19] sm:$0xff] %v9005_v34   ;;  %v10439_v52 = vpop.f32.mrb[20].mxu0 }
 0x6c6   : > { %v8101_v53 = vpop.f32.mrb[21].mxu0  ;;  %v8257_v18 = vadd.f32 %v10439_v52, %v13280_v7 }
 0x6c7   : > { %v10440_v11 = vpop.f32.mrb[22].mxu0  ;;  %v8255_v63 = vadd.f32 %v13280_v7, %v8101_v53 }
 0x6c8   : > { %v8258_v35 = vadd.f32 %v10440_v11, %v13280_v7  ;;  %v8104_v56 = vpop.f32.mrb[23].mxu0 }
 0x6c9   : > { %v8256_v10 = vadd.f32 %v13280_v7, %v8104_v56 }
 0x6ca   : > { %v9020_v16 = vpack.c.bf16 %v8258_v35, %v8257_v18 }
 0x6cb   : > { %v9015_v42 = vpack.c.bf16 %v8256_v10, %v8255_v63 }
 0x6cc   : > { %9084 = vst [vmem:[%s13290_s19 + $0x18] sm:$0xff] %v9020_v16  }
 0x6cd   : > { %9083 = vst [vmem:[%s13290_s19 + $0x10] sm:$0xff] %v9015_v42   ;;  %v10443_v25 = vpop.f32.mrb[24].mxu0 }
 0x6ce   : > { %v8117_v47 = vpop.f32.mrb[25].mxu0  ;;  %v8261_v48 = vadd.f32 %v10443_v25, %v13280_v7 }
 0x6cf   : > { %v10444_v33 = vpop.f32.mrb[26].mxu0  ;;  %v8259_v17 = vadd.f32 %v13280_v7, %v8117_v47 }
 0x6d0   : > { %v8262_v8 = vadd.f32 %v10444_v33, %v13280_v7  ;;  %v8120_v38 = vpop.f32.mrb[27].mxu0 }
 0x6d1   : > { %v8260_v62 = vadd.f32 %v13280_v7, %v8120_v38 }
 0x6d2   : > { %v9030_v26 = vpack.c.bf16 %v8262_v8, %v8261_v48 }
 0x6d3   : > { %v9025_v5 = vpack.c.bf16 %v8260_v62, %v8259_v17 }
 0x6d4   : > { %9086 = vst [vmem:[%s13290_s19 + $0x28] sm:$0xff] %v9030_v26  }
 0x6d5   : > { %9085 = vst [vmem:[%s13290_s19 + $0x20] sm:$0xff] %v9025_v5   ;;  %v10447_v31 = vpop.f32.mrb[28].mxu0 }
 0x6d6   : > { %v8133_v6 = vpop.f32.mrb[29].mxu0  ;;  %v8265_v2 = vadd.f32 %v10447_v31, %v13280_v7 }
 0x6d7   : > { %v10448_v54 = vpop.f32.mrb[30].mxu0  ;;  %v8263_v55 = vadd.f32 %v13280_v7, %v8133_v6 }
 0x6d8   : > { %v8266_v22 = vadd.f32 %v10448_v54, %v13280_v7  ;;  %v8136_v29 = vpop.f32.mrb[31].mxu0 }
 0x6d9   : > { %v8264_v3 = vadd.f32 %v13280_v7, %v8136_v29 }
 0x6da   : > { %v9040_v21 = vpack.c.bf16 %v8266_v22, %v8265_v2 }
 0x6db   : > { %v9035_v58 = vpack.c.bf16 %v8264_v3, %v8263_v55 }
 0x6dc   : > { %9088 = vst [vmem:[%s13290_s19 + $0x38] sm:$0xff] %v9040_v21  }
 0x6dd   : > { %9087 = vst [vmem:[%s13290_s19 + $0x30] sm:$0xff] %v9035_v58   ;;  %v10451_v50 = vpop.f32.mrb[32].mxu0 }
 0x6de   : > { %v8149_v20 = vpop.f32.mrb[33].mxu0  ;;  %v8269_v60 = vadd.f32 %v10451_v50, %v13280_v7 }
 0x6df   : > { %v10452_v39 = vpop.f32.mrb[34].mxu0  ;;  %v8267_v44 = vadd.f32 %v13280_v7, %v8149_v20 }
 0x6e0   : > { %v8270_v19 = vadd.f32 %v10452_v39, %v13280_v7  ;;  %v8152_v45 = vpop.f32.mrb[35].mxu0 }
 0x6e1   : > { %v8268_v36 = vadd.f32 %v13280_v7, %v8152_v45 }
 0x6e2   : > { %v9050_v59 = vpack.c.bf16 %v8270_v19, %v8269_v60 }
 0x6e3   : > { %v9045_v40 = vpack.c.bf16 %v8268_v36, %v8267_v44 }
 0x6e4   : > { %9090 = vst [vmem:[%s13290_s19 + $0x48] sm:$0xff] %v9050_v59  }
 0x6e5   : > { %9089 = vst [vmem:[%s13290_s19 + $0x40] sm:$0xff] %v9045_v40   ;;  %v10455_v9 = vpop.f32.mrb[36].mxu0 }
 0x6e6   : > { %v8165_v27 = vpop.f32.mrb[37].mxu0  ;;  %v8273_v24 = vadd.f32 %v10455_v9, %v13280_v7 }
 0x6e7   : > { %v10456_v0 = vpop.f32.mrb[38].mxu0  ;;  %v8271_v14 = vadd.f32 %v13280_v7, %v8165_v27 }
 0x6e8   : > { %v8274_v51 = vadd.f32 %v10456_v0, %v13280_v7  ;;  %v8168_v49 = vpop.f32.mrb[39].mxu0 }
 0x6e9   : > { %v8272_v28 = vadd.f32 %v13280_v7, %v8168_v49 }
 0x6ea   : > { %v9060_v12 = vpack.c.bf16 %v8274_v51, %v8273_v24 }
 0x6eb   : > { %v9055_v23 = vpack.c.bf16 %v8272_v28, %v8271_v14 }
 0x6ec   : > { %9092 = vst [vmem:[%s13290_s19 + $0x58] sm:$0xff] %v9060_v12  }
 0x6ed   : > { %9091 = vst [vmem:[%s13290_s19 + $0x50] sm:$0xff] %v9055_v23   ;;  %v10459_v57 = vpop.f32.mrb[40].mxu0 }
 0x6ee   : > { %v8181_v46 = vpop.f32.mrb[41].mxu0  ;;  %v8277_v37 = vadd.f32 %v10459_v57, %v13280_v7 }
 0x6ef   : > { %v10460_v61 = vpop.f32.mrb[42].mxu0  ;;  %v8275_v4 = vadd.f32 %v13280_v7, %v8181_v46 }
 0x6f0   : > { %v8278_v1 = vadd.f32 %v10460_v61, %v13280_v7  ;;  %v8184_v30 = vpop.f32.mrb[43].mxu0 }
 0x6f1   : > { %v8276_v15 = vadd.f32 %v13280_v7, %v8184_v30 }
 0x6f2   : > { %v9070_v41 = vpack.c.bf16 %v8278_v1, %v8277_v37 }
 0x6f3   : > { %v9065_v13 = vpack.c.bf16 %v8276_v15, %v8275_v4 }
 0x6f4   : > { %9094 = vst [vmem:[%s13290_s19 + $0x68] sm:$0xff] %v9070_v41  }
 0x6f5   : > { %9093 = vst [vmem:[%s13290_s19 + $0x60] sm:$0xff] %v9065_v13   ;;  %v10463_v43 = vpop.f32.mrb[44].mxu0 }
 0x6f6   : > { %v8197_v32 = vpop.f32.mrb[45].mxu0  ;;  %v8281_v52 = vadd.f32 %v10463_v43, %v13280_v7 }
 0x6f7   : > { %v10464_v34 = vpop.f32.mrb[46].mxu0  ;;  %v8279_v18 = vadd.f32 %v13280_v7, %v8197_v32 }
 0x6f8   : > { %v8282_v53 = vadd.f32 %v10464_v34, %v13280_v7  ;;  %v8200_v11 = vpop.f32.mrb[47].mxu0 }
 0x6f9   : > { %v8280_v35 = vadd.f32 %v13280_v7, %v8200_v11 }
 0x6fa   : > { %v9080_v56 = vpack.c.bf16 %v8282_v53, %v8281_v52 }
 0x6fb   : > { %v9075_v63 = vpack.c.bf16 %v8280_v35, %v8279_v18 }
 0x6fc   : > { %9096 = vst [vmem:[%s13290_s19 + $0x78] sm:$0xff] %v9080_v56  }
 0x6fd   : > { %9095 = vst [vmem:[%s13290_s19 + $0x70] sm:$0xff] %v9075_v63  }
 0x6fe PF: > { %s17_s24 = sadd.s32 1, %s11209_s24  }
 0x6ff   : > { %p14_p4 = scmp.ge.s32.totalorder %s17_s24, 4  }
 0x701   :  { %16 = sbr.rel (!%p14_p4) target bundleno = 1 (0x1), region = 97 }

</bundles_post_ra>
